<compile_context>
chip_gen: v6e
topology: v6e:2x2x1
jax: 0.10.0
libtpu: 0.0.40
codegen_flags: <defaults>
</compile_context>

<pallas_src>
import math

import jax
import jax.numpy as jnp
from jax.experimental import pallas as pl
from jax.experimental.pallas import tpu as pltpu

LN_EPS = 1e-5   # torch.nn.LayerNorm default
LANES = 128     # TPU lane width


# ------------------------------ small helpers ------------------------------ #
def _round_up(n, m):
    return ((n + m - 1) // m) * m


def _pad_to(a, shape):
    pads = [(0, s - d) for d, s in zip(a.shape, shape)]
    return jnp.pad(a, pads)


def _layernorm(v, gamma, beta, inv_n):
    """Mask-free LayerNorm over the last dim.  Only the first `hidden` lanes
    are ever non-zero (padded weight columns and gamma/beta are zero), so
    sums over the padded width equal sums over the true width and
    var = E[x^2] - mean^2 needs no lane mask.  Padded output lanes are
    gamma(=0)*... + beta(=0) = 0, preserving the invariant."""
    mean = jnp.sum(v, axis=-1, keepdims=True) * inv_n
    var = jnp.sum(v * v, axis=-1, keepdims=True) * inv_n - mean * mean
    return (v - mean) * jax.lax.rsqrt(var + LN_EPS) * gamma + beta


def _device_vmem_and_tiles():
    """(usable VMEM capacity, preferred #batch tiles) per TPU generation."""
    kind = ""
    try:
        kind = jax.devices()[0].device_kind.lower()
    except Exception:
        pass
    if "v7" in kind:                       # 64 MiB / TC, 2 TCs per chip
        return 64 * 1024 * 1024, 2
    if ("v2" in kind) or ("v3" in kind):   # small VMEM parts
        return 16 * 1024 * 1024, 1
    return 128 * 1024 * 1024, 1            # v4 / v5e / v6e


# --------------------------- fused kernel bodies ---------------------------- #
def _make_collapsed_kernel(depth, hidden, has_head):
    """Whole network in ONE grid step per batch tile (weights fully resident)."""
    inv_n = 1.0 / float(hidden)

    def kernel(*refs):
        if has_head:
            x_ref, w0_ref, w1s_ref, w2s_ref, lnc_ref, lnr_ref, wH_ref, o_ref = refs
        else:
            x_ref, w0_ref, w1s_ref, w2s_ref, lnc_ref, lnr_ref, o_ref = refs

        # stem: Linear -> LN -> ReLU   (x already bf16)
        h = jnp.dot(x_ref[...], w0_ref[...], preferred_element_type=jnp.float32)
        h = jnp.maximum(_layernorm(h, lnc_ref[0:1, :], lnc_ref[1:2, :], inv_n), 0.0)

        # residual layers, statically unrolled (weights resident in VMEM)
        for d in range(depth):
            lnp = lnr_ref[d]                                   # (8, Hp)
            t = jnp.maximum(_layernorm(h, lnp[0:1, :], lnp[1:2, :], inv_n), 0.0)
            t = jnp.dot(t.astype(jnp.bfloat16), w1s_ref[d],
                        preferred_element_type=jnp.float32)
            # dropout(p=0.0) -> identity
            t = jnp.maximum(_layernorm(t, lnp[2:3, :], lnp[3:4, :], inv_n), 0.0)
            t = jnp.dot(t.astype(jnp.bfloat16), w2s_ref[d],
                        preferred_element_type=jnp.float32)
            h = jnp.maximum(t + h, 0.0)                        # residual add (f32)

        if has_head:
            t = jnp.maximum(_layernorm(h, lnc_ref[2:3, :], lnc_ref[3:4, :], inv_n), 0.0)
            o_ref[...] = jnp.dot(t.astype(jnp.bfloat16), wH_ref[...],
                                 preferred_element_type=jnp.float32
                                 ).astype(o_ref.dtype)
        else:
            o_ref[...] = h.astype(o_ref.dtype)

    return kernel


def _make_streaming_kernel(depth, hidden, has_head):
    """Fallback for large Hp: layer grid axis last ("arbitrary"); per-layer
    weights streamed by BlockSpec; activation resident in VMEM scratch."""
    inv_n = 1.0 / float(hidden)
    n_steps = depth + 2 if has_head else depth + 1

    def kernel(*refs):
        if has_head:
            (x_ref, w0_ref, lnc_ref, w1_ref, w2_ref, lnr_ref,
             wH_ref, o_ref, h_acc) = refs
        else:
            (x_ref, w0_ref, lnc_ref, w1_ref, w2_ref, lnr_ref,
             o_ref, h_acc) = refs

        l = pl.program_id(1)

        @pl.when(l == 0)
        def _stem():
            h = jnp.dot(x_ref[...], w0_ref[...], preferred_element_type=jnp.float32)
            h_acc[...] = jnp.maximum(
                _layernorm(h, lnc_ref[0:1, :], lnc_ref[1:2, :], inv_n), 0.0)

        @pl.when(jnp.logical_and(l > 0, l <= depth))
        def _res():
            lnp = lnr_ref[0]                                   # (8, Hp)
            t = jnp.maximum(_layernorm(h_acc[...], lnp[0:1, :], lnp[1:2, :], inv_n), 0.0)
            t = jnp.dot(t.astype(jnp.bfloat16), w1_ref[0],
                        preferred_element_type=jnp.float32)
            t = jnp.maximum(_layernorm(t, lnp[2:3, :], lnp[3:4, :], inv_n), 0.0)
            t = jnp.dot(t.astype(jnp.bfloat16), w2_ref[0],
                        preferred_element_type=jnp.float32)
            # re-read h_acc for the residual add instead of holding it live
            h_acc[...] = jnp.maximum(t + h_acc[...], 0.0)

        if has_head:
            @pl.when(l == n_steps - 1)
            def _head():
                t = jnp.maximum(
                    _layernorm(h_acc[...], lnc_ref[2:3, :], lnc_ref[3:4, :], inv_n), 0.0)
                o_ref[...] = jnp.dot(t.astype(jnp.bfloat16), wH_ref[...],
                                     preferred_element_type=jnp.float32
                                     ).astype(o_ref.dtype)
        else:
            @pl.when(l == n_steps - 1)
            def _write():
                o_ref[...] = h_acc[...].astype(o_ref.dtype)

    return kernel


# --------------------------- parameter handling ---------------------------- #
def _init_linear(key, in_features, out_features):
    """Matches weight_initializer: trunc normal(0, std) clipped at +/-2*std,
    std = sqrt(1 / fan_avg / 10), fan_avg = 0.5*(in+out). Returns (in, out)."""
    fan_avg = 0.5 * (in_features + out_features)
    std = math.sqrt(1.0 / fan_avg / 10.0)
    w = jax.random.truncated_normal(
        key, -2.0, 2.0, (out_features, in_features), dtype=jnp.float32) * std
    return jnp.transpose(w)   # kernel layout: (in, out) so we compute x @ W


def make_params(key, feature_dim, depth, output_dims):
    """Logical (unpadded, f32) parameters, mirroring the PyTorch module."""
    hidden = feature_dim * 2
    keys = jax.random.split(key, 2 * depth + 2)
    params = {}
    params["stem"] = (
        _init_linear(keys[0], feature_dim, hidden),
        jnp.ones((hidden,), jnp.float32),    # LayerNorm gamma
        jnp.zeros((hidden,), jnp.float32),   # LayerNorm beta
    )
    res = []
    for d in range(depth):
        w1 = _init_linear(keys[1 + 2 * d], hidden, hidden)
        w2 = _init_linear(keys[2 + 2 * d], hidden, hidden)
        res.append((w1,
                    jnp.ones((hidden,), jnp.float32),
                    jnp.zeros((hidden,), jnp.float32),
                    w2,
                    jnp.ones((hidden,), jnp.float32),
                    jnp.zeros((hidden,), jnp.float32)))
    params["res"] = res
    if output_dims is not None:
        params["head"] = (
            jnp.ones((hidden,), jnp.float32),
            jnp.zeros((hidden,), jnp.float32),
            _init_linear(keys[-1], hidden, output_dims),
        )
    else:
        params["head"] = None
    return params


def pack_params(params):
    """Pad feature dims to 128-lane multiples, cast matmul weights to bf16,
    stack per-layer weights along a leading depth axis, and merge LayerNorm
    params into 8-sublane-aligned f32 slabs."""
    w0, g0, b0 = params["stem"]
    D, H = w0.shape
    res = params["res"]
    depth = len(res)
    assert depth >= 1, "fused kernel expects at least one residual layer"
    Dp, Hp = _round_up(D, LANES), _round_up(H, LANES)

    packed = {"dims": (D, H, depth)}
    packed["w0"] = _pad_to(w0, (Dp, Hp)).astype(jnp.bfloat16)
    packed["w1s"] = jnp.stack(
        [_pad_to(w1, (Hp, Hp)) for (w1, _, _, _, _, _) in res]).astype(jnp.bfloat16)
    packed["w2s"] = jnp.stack(
        [_pad_to(w2, (Hp, Hp)) for (_, _, _, w2, _, _) in res]).astype(jnp.bfloat16)

    def slab(rows):
        out = jnp.zeros((8, Hp), jnp.float32)
        for r, v in enumerate(rows):
            out = out.at[r, :].set(_pad_to(v, (Hp,)))
        return out

    packed["ln_res"] = jnp.stack(
        [slab([g1, b1, g2, b2]) for (_, g1, b1, _, g2, b2) in res])   # (depth,8,Hp)

    if params["head"] is not None:
        gH, bH, wH = params["head"]
        O = wH.shape[1]
        Op = _round_up(O, LANES)
        packed["ln_const"] = slab([g0, b0, gH, bH])                    # (8,Hp)
        packed["wH"] = _pad_to(wH, (Hp, Op)).astype(jnp.bfloat16)
        packed["out_dim"] = O
    else:
        packed["ln_const"] = slab([g0, b0])
        packed["wH"] = None
        packed["out_dim"] = H
    return packed


# ------------------------------ pallas wrapper ------------------------------ #
def mlp_forward(x, packed, *, tb=None, force_streaming=False):
    D, H, depth = packed["dims"]
    has_head = packed["wH"] is not None
    Dp, Hp = packed["w0"].shape
    O = packed["out_dim"]
    Op = packed["wH"].shape[1] if has_head else Hp

    vmem_cap, pref_tiles = _device_vmem_and_tiles()
    budget = int(0.55 * vmem_cap)

    # resident-weight bytes for each path
    wH_elems = packed["wH"].size if has_head else 0
    w_full = (packed["w0"].size + packed["w1s"].size + packed["w2s"].size
              + wH_elems) * 2 \
             + (packed["ln_const"].size + packed["ln_res"].size) * 4
    w_layer = (packed["w0"].size + 2 * Hp * Hp + wH_elems) * 2 \
              + (packed["ln_const"].size + 8 * Hp) * 4

    def act_bytes(t):
        # double-buffered x (bf16) + output (f32) tiles, plus ~4 live f32 temps
        return 2 * (t * Dp * 2 + t * Op * 4) + 4 * t * Hp * 4

    use_streaming = force_streaming or (2 * w_full + act_bytes(8) > budget)
    resident_w = w_layer if use_streaming else w_full

    B = x.shape[0]
    if tb is None:
        # fewest, largest batch tiles the VMEM budget allows; 2 tiles on v7x
        Bp8 = _round_up(max(B, 8), 8)
        tiles = pref_tiles if Bp8 >= 16 * pref_tiles else 1
        tb = _round_up(-(-Bp8 // tiles), 8)
        tb = min(tb, 1024)
        while tb > 8 and 2 * resident_w + act_bytes(tb) > budget:
            tb = max(8, _round_up(tb // 2, 8))
    tb = max(8, _round_up(tb, 8))
    Bp = _round_up(B, tb)

    xp = _pad_to(x.astype(jnp.float32), (Bp, Dp)).astype(jnp.bfloat16)

    vmem_limit = int(min(0.9 * vmem_cap,
                         max(32 * 1024 * 1024,
                             2 * resident_w + act_bytes(tb) + 8 * 1024 * 1024)))

    if not use_streaming:
        # ---- collapsed path: one grid step per batch tile ------------------
        kernel = _make_collapsed_kernel(depth, H, has_head)
        in_specs = [
            pl.BlockSpec((tb, Dp), lambda i: (i, 0)),                 # x tile
            pl.BlockSpec((Dp, Hp), lambda i: (0, 0)),                 # stem weight
            pl.BlockSpec((depth, Hp, Hp), lambda i: (0, 0, 0)),       # all w1
            pl.BlockSpec((depth, Hp, Hp), lambda i: (0, 0, 0)),       # all w2
            pl.BlockSpec((8, Hp), lambda i: (0, 0)),                  # stem/head LN
            pl.BlockSpec((depth, 8, Hp), lambda i: (0, 0, 0)),        # residual LN
        ]
        operands = [xp, packed["w0"], packed["w1s"], packed["w2s"],
                    packed["ln_const"], packed["ln_res"]]
        if has_head:
            in_specs.append(pl.BlockSpec((Hp, Op), lambda i: (0, 0)))  # head weight
            operands.append(packed["wH"])

        out = pl.pallas_call(
            kernel,
            out_shape=jax.ShapeDtypeStruct((Bp, Op), jnp.float32),
            grid_spec=pltpu.PrefetchScalarGridSpec(
                num_scalar_prefetch=0,
                grid=(Bp // tb,),
                in_specs=in_specs,
                out_specs=pl.BlockSpec((tb, Op), lambda i: (i, 0)),
                scratch_shapes=(),
            ),
            compiler_params=pltpu.CompilerParams(
                dimension_semantics=("parallel",),
                vmem_limit_bytes=vmem_limit,
            ),
        )(*operands)
        return out[:B, :O]

    # ---- streaming path: layer axis last, per-layer weights pipelined ------
    n_steps = depth + 2 if has_head else depth + 1
    d_last = depth - 1
    kernel = _make_streaming_kernel(depth, H, has_head)
    in_specs = [
        pl.BlockSpec((tb, Dp), lambda i, l: (i, 0)),                            # x
        pl.BlockSpec((Dp, Hp), lambda i, l: (0, 0)),                            # stem w
        pl.BlockSpec((8, Hp), lambda i, l: (0, 0)),                             # stem/head LN
        pl.BlockSpec((1, Hp, Hp), lambda i, l: (jnp.clip(l - 1, 0, d_last), 0, 0)),  # w1[l-1]
        pl.BlockSpec((1, Hp, Hp), lambda i, l: (jnp.clip(l - 1, 0, d_last), 0, 0)),  # w2[l-1]
        pl.BlockSpec((1, 8, Hp), lambda i, l: (jnp.clip(l - 1, 0, d_last), 0, 0)),   # LN[l-1]
    ]
    operands = [xp, packed["w0"], packed["ln_const"],
                packed["w1s"], packed["w2s"], packed["ln_res"]]
    if has_head:
        in_specs.append(pl.BlockSpec((Hp, Op), lambda i, l: (0, 0)))             # head w
        operands.append(packed["wH"])

    out = pl.pallas_call(
        kernel,
        out_shape=jax.ShapeDtypeStruct((Bp, Op), jnp.float32),
        grid_spec=pltpu.PrefetchScalarGridSpec(
            num_scalar_prefetch=0,
            grid=(Bp // tb, n_steps),
            in_specs=in_specs,
            # same block across the layer axis -> output tile stays resident,
            # written only on the final layer step.
            out_specs=pl.BlockSpec((tb, Op), lambda i, l: (i, 0)),
            scratch_shapes=[pltpu.VMEM((tb, Hp), jnp.float32)],   # resident activation
        ),
        compiler_params=pltpu.CompilerParams(
            dimension_semantics=("parallel", "arbitrary"),
            vmem_limit_bytes=vmem_limit,
        ),
    )(*operands)
    return out[:B, :O]


# -------------------------------- reference --------------------------------- #
def reference_forward(x, params, mxu_dtype=None):
    """Pure-JAX reference matching the PyTorch module. If `mxu_dtype` is set,
    matmul operands are rounded to that dtype (f32 accumulation), mirroring
    the kernel's bf16 MXU path."""
    def dot(a, b):
        if mxu_dtype is not None:
            a = a.astype(mxu_dtype)
            b = b.astype(mxu_dtype)
        return jnp.dot(a, b, preferred_element_type=jnp.float32)

    def ln(v, g, b):
        m = jnp.mean(v, -1, keepdims=True)
        c = v - m
        var = jnp.mean(c * c, -1, keepdims=True)
        return c * jax.lax.rsqrt(var + LN_EPS) * g + b

    relu = lambda v: jnp.maximum(v, 0.0)

    w0, g0, b0 = params["stem"]
    h = relu(ln(dot(x, w0), g0, b0))
    for (w1, g1, b1, w2, g2, b2) in params["res"]:
        r = h
        o = dot(relu(ln(h, g1, b1)), w1)
        o = dot(relu(ln(o, g2, b2)), w2)
        h = relu(o + r)
    if params["head"] is not None:
        gH, bH, wH = params["head"]
        h = dot(relu(ln(h, gH, bH)), wH)
    return h


# ----------------------------------- main ------------------------------------ #
if __name__ == "__main__":
    feature_dim = 48       # hidden = 96  -> padded to 128 lanes inside the kernel
    depth = 3
    output_dims = 24       # padded to 128 lanes; sliced back after the call
    batch = 128

    key = jax.random.PRNGKey(0)
    kx, kp = jax.random.split(key)
    x = jax.random.normal(kx, (batch, feature_dim), dtype=jnp.float32)

    params = make_params(kp, feature_dim, depth, output_dims)
    packed = pack_params(params)

    # Primary (collapsed) path: tb auto-selected (1 tile on v5e/v6e, 2 on v7x).
    out = mlp_forward(x, packed)
    out = jax.block_until_ready(out)
    assert out.shape == (batch, output_dims)

    # References.
    ref_bf16 = reference_forward(x, params, mxu_dtype=jnp.bfloat16)
    ref_f32 = reference_forward(x, params)

    assert jnp.allclose(out, ref_bf16, atol=2e-3, rtol=2e-3), \
        "collapsed path: mismatch vs matched (bf16-operand) reference"
    assert float(jnp.max(jnp.abs(out - ref_f32))) < 0.1, \
        "collapsed path: unexpectedly large drift vs f32 reference"

    # Also exercise the streaming fallback path (used for large hidden sizes).
    out_s = jax.block_until_ready(mlp_forward(x, packed, force_streaming=True))
    assert out_s.shape == (batch, output_dims)
    assert jnp.allclose(out_s, ref_bf16, atol=2e-3, rtol=2e-3), \
        "streaming path: mismatch vs matched (bf16-operand) reference"

    print("KERNEL_OK")
</pallas_src>

<mosaic_0001>
module attributes {stable_mosaic.version = 11 : i64} {
  func.func @kernel(%arg0: i32, %arg1: memref<128x128xbf16, #tpu.memory_space<vmem>>, %arg2: memref<128x128xbf16, #tpu.memory_space<vmem>>, %arg3: memref<3x128x128xbf16, #tpu.memory_space<vmem>>, %arg4: memref<3x128x128xbf16, #tpu.memory_space<vmem>>, %arg5: memref<8x128xf32, #tpu.memory_space<vmem>>, %arg6: memref<3x8x128xf32, #tpu.memory_space<vmem>>, %arg7: memref<128x128xbf16, #tpu.memory_space<vmem>>, %arg8: memref<128x128xf32, #tpu.memory_space<vmem>>) attributes {dimension_semantics = [#tpu.dimension_semantics<parallel>], iteration_bounds = array<i64: 1>, scalar_prefetch = 0 : i64, scratch_operands = 0 : i64, tpu.core_type = #tpu.core_type<tc>, window_params = [{transform_indices = @transform_0, window_bounds = array<i64: 128, 128>}, {pipeline_mode = #tpu.pipeline_mode<synchronous>, transform_indices = @transform_1, window_bounds = array<i64: 128, 128>}, {pipeline_mode = #tpu.pipeline_mode<synchronous>, transform_indices = @transform_2, window_bounds = array<i64: 3, 128, 128>}, {pipeline_mode = #tpu.pipeline_mode<synchronous>, transform_indices = @transform_3, window_bounds = array<i64: 3, 128, 128>}, {pipeline_mode = #tpu.pipeline_mode<synchronous>, transform_indices = @transform_4, window_bounds = array<i64: 8, 128>}, {pipeline_mode = #tpu.pipeline_mode<synchronous>, transform_indices = @transform_5, window_bounds = array<i64: 3, 8, 128>}, {pipeline_mode = #tpu.pipeline_mode<synchronous>, transform_indices = @transform_6, window_bounds = array<i64: 128, 128>}, {transform_indices = @transform_7, window_bounds = array<i64: 128, 128>}]} {
    %c0 = arith.constant 0 : index
    %c0_0 = arith.constant 0 : index
    %0 = vector.load %arg1[%c0, %c0_0] : memref<128x128xbf16, #tpu.memory_space<vmem>>, vector<128x128xbf16>
    %c0_1 = arith.constant 0 : index
    %c0_2 = arith.constant 0 : index
    %1 = vector.load %arg2[%c0_1, %c0_2] : memref<128x128xbf16, #tpu.memory_space<vmem>>, vector<128x128xbf16>
    %cst = arith.constant dense<0.000000e+00> : vector<128x128xf32>
    %2 = tpu.matmul %0, %1, %cst {dimension_numbers = #tpu.dot_dimension_numbers<[1], [0], [0], [1], [0, 0, 1, 1], [], []>} : vector<128x128xbf16>, vector<128x128xbf16>, vector<128x128xf32> -> vector<128x128xf32>
    %c0_3 = arith.constant 0 : index
    %c0_4 = arith.constant 0 : index
    %3 = vector.load %arg5[%c0_3, %c0_4] : memref<8x128xf32, #tpu.memory_space<vmem>>, vector<1x128xf32>
    %c1 = arith.constant 1 : index
    %c0_5 = arith.constant 0 : index
    %4 = vector.load %arg5[%c1, %c0_5] : memref<8x128xf32, #tpu.memory_space<vmem>>, vector<1x128xf32>
    %cst_6 = arith.constant dense<0.000000e+00> : vector<128xf32>
    %5 = vector.multi_reduction <add>, %2, %cst_6 [1] : vector<128x128xf32> to vector<128xf32>
    %6 = vector.shape_cast %5 : vector<128xf32> to vector<128x1xf32>
    %cst_7 = arith.constant 0.010416667 : f32
    %7 = vector.broadcast %cst_7 : f32 to vector<128x1xf32>
    %8 = arith.mulf %6, %7 : vector<128x1xf32>
    %9 = arith.mulf %2, %2 : vector<128x128xf32>
    %cst_8 = arith.constant dense<0.000000e+00> : vector<128xf32>
    %10 = vector.multi_reduction <add>, %9, %cst_8 [1] : vector<128x128xf32> to vector<128xf32>
    %11 = vector.shape_cast %10 : vector<128xf32> to vector<128x1xf32>
    %cst_9 = arith.constant 0.010416667 : f32
    %12 = vector.broadcast %cst_9 : f32 to vector<128x1xf32>
    %13 = arith.mulf %11, %12 : vector<128x1xf32>
    %14 = arith.mulf %8, %8 : vector<128x1xf32>
    %15 = arith.subf %13, %14 : vector<128x1xf32>
    %16 = vector.broadcast %8 : vector<128x1xf32> to vector<128x128xf32>
    %17 = arith.subf %2, %16 : vector<128x128xf32>
    %cst_10 = arith.constant 9.99999974E-6 : f32
    %18 = vector.broadcast %cst_10 : f32 to vector<128x1xf32>
    %19 = arith.addf %15, %18 : vector<128x1xf32>
    %20 = math.rsqrt %19 : vector<128x1xf32>
    %21 = vector.broadcast %20 : vector<128x1xf32> to vector<128x128xf32>
    %22 = arith.mulf %17, %21 : vector<128x128xf32>
    %23 = vector.broadcast %3 : vector<1x128xf32> to vector<128x128xf32>
    %24 = arith.mulf %22, %23 : vector<128x128xf32>
    %25 = vector.broadcast %4 : vector<1x128xf32> to vector<128x128xf32>
    %26 = arith.addf %24, %25 : vector<128x128xf32>
    %cst_11 = arith.constant 0.000000e+00 : f32
    %27 = vector.broadcast %cst_11 : f32 to vector<128x128xf32>
    %28 = arith.maximumf %26, %27 : vector<128x128xf32>
    %c0_12 = arith.constant 0 : index
    %c0_13 = arith.constant 0 : index
    %c0_14 = arith.constant 0 : index
    %29 = vector.load %arg6[%c0_12, %c0_13, %c0_14] : memref<3x8x128xf32, #tpu.memory_space<vmem>>, vector<1x8x128xf32>
    %30 = vector.shape_cast %29 : vector<1x8x128xf32> to vector<8x128xf32>
    %31 = vector.extract_strided_slice %30 {offsets = [0, 0], sizes = [1, 128], strides = [1, 1]} : vector<8x128xf32> to vector<1x128xf32>
    %32 = vector.extract_strided_slice %30 {offsets = [1, 0], sizes = [1, 128], strides = [1, 1]} : vector<8x128xf32> to vector<1x128xf32>
    %cst_15 = arith.constant dense<0.000000e+00> : vector<128xf32>
    %33 = vector.multi_reduction <add>, %28, %cst_15 [1] : vector<128x128xf32> to vector<128xf32>
    %34 = vector.shape_cast %33 : vector<128xf32> to vector<128x1xf32>
    %cst_16 = arith.constant 0.010416667 : f32
    %35 = vector.broadcast %cst_16 : f32 to vector<128x1xf32>
    %36 = arith.mulf %34, %35 : vector<128x1xf32>
    %37 = arith.mulf %28, %28 : vector<128x128xf32>
    %cst_17 = arith.constant dense<0.000000e+00> : vector<128xf32>
    %38 = vector.multi_reduction <add>, %37, %cst_17 [1] : vector<128x128xf32> to vector<128xf32>
    %39 = vector.shape_cast %38 : vector<128xf32> to vector<128x1xf32>
    %cst_18 = arith.constant 0.010416667 : f32
    %40 = vector.broadcast %cst_18 : f32 to vector<128x1xf32>
    %41 = arith.mulf %39, %40 : vector<128x1xf32>
    %42 = arith.mulf %36, %36 : vector<128x1xf32>
    %43 = arith.subf %41, %42 : vector<128x1xf32>
    %44 = vector.broadcast %36 : vector<128x1xf32> to vector<128x128xf32>
    %45 = arith.subf %28, %44 : vector<128x128xf32>
    %cst_19 = arith.constant 9.99999974E-6 : f32
    %46 = vector.broadcast %cst_19 : f32 to vector<128x1xf32>
    %47 = arith.addf %43, %46 : vector<128x1xf32>
    %48 = math.rsqrt %47 : vector<128x1xf32>
    %49 = vector.broadcast %48 : vector<128x1xf32> to vector<128x128xf32>
    %50 = arith.mulf %45, %49 : vector<128x128xf32>
    %51 = vector.broadcast %31 : vector<1x128xf32> to vector<128x128xf32>
    %52 = arith.mulf %50, %51 : vector<128x128xf32>
    %53 = vector.broadcast %32 : vector<1x128xf32> to vector<128x128xf32>
    %54 = arith.addf %52, %53 : vector<128x128xf32>
    %cst_20 = arith.constant 0.000000e+00 : f32
    %55 = vector.broadcast %cst_20 : f32 to vector<128x128xf32>
    %56 = arith.maximumf %54, %55 : vector<128x128xf32>
    %57 = arith.truncf %56 : vector<128x128xf32> to vector<128x128xbf16>
    %c0_21 = arith.constant 0 : index
    %c0_22 = arith.constant 0 : index
    %c0_23 = arith.constant 0 : index
    %58 = vector.load %arg3[%c0_21, %c0_22, %c0_23] : memref<3x128x128xbf16, #tpu.memory_space<vmem>>, vector<1x128x128xbf16>
    %59 = vector.shape_cast %58 : vector<1x128x128xbf16> to vector<128x128xbf16>
    %cst_24 = arith.constant dense<0.000000e+00> : vector<128x128xf32>
    %60 = tpu.matmul %57, %59, %cst_24 {dimension_numbers = #tpu.dot_dimension_numbers<[1], [0], [0], [1], [0, 0, 1, 1], [], []>} : vector<128x128xbf16>, vector<128x128xbf16>, vector<128x128xf32> -> vector<128x128xf32>
    %61 = vector.extract_strided_slice %30 {offsets = [2, 0], sizes = [1, 128], strides = [1, 1]} : vector<8x128xf32> to vector<1x128xf32>
    %62 = vector.extract_strided_slice %30 {offsets = [3, 0], sizes = [1, 128], strides = [1, 1]} : vector<8x128xf32> to vector<1x128xf32>
    %cst_25 = arith.constant dense<0.000000e+00> : vector<128xf32>
    %63 = vector.multi_reduction <add>, %60, %cst_25 [1] : vector<128x128xf32> to vector<128xf32>
    %64 = vector.shape_cast %63 : vector<128xf32> to vector<128x1xf32>
    %cst_26 = arith.constant 0.010416667 : f32
    %65 = vector.broadcast %cst_26 : f32 to vector<128x1xf32>
    %66 = arith.mulf %64, %65 : vector<128x1xf32>
    %67 = arith.mulf %60, %60 : vector<128x128xf32>
    %cst_27 = arith.constant dense<0.000000e+00> : vector<128xf32>
    %68 = vector.multi_reduction <add>, %67, %cst_27 [1] : vector<128x128xf32> to vector<128xf32>
    %69 = vector.shape_cast %68 : vector<128xf32> to vector<128x1xf32>
    %cst_28 = arith.constant 0.010416667 : f32
    %70 = vector.broadcast %cst_28 : f32 to vector<128x1xf32>
    %71 = arith.mulf %69, %70 : vector<128x1xf32>
    %72 = arith.mulf %66, %66 : vector<128x1xf32>
    %73 = arith.subf %71, %72 : vector<128x1xf32>
    %74 = vector.broadcast %66 : vector<128x1xf32> to vector<128x128xf32>
    %75 = arith.subf %60, %74 : vector<128x128xf32>
    %cst_29 = arith.constant 9.99999974E-6 : f32
    %76 = vector.broadcast %cst_29 : f32 to vector<128x1xf32>
    %77 = arith.addf %73, %76 : vector<128x1xf32>
    %78 = math.rsqrt %77 : vector<128x1xf32>
    %79 = vector.broadcast %78 : vector<128x1xf32> to vector<128x128xf32>
    %80 = arith.mulf %75, %79 : vector<128x128xf32>
    %81 = vector.broadcast %61 : vector<1x128xf32> to vector<128x128xf32>
    %82 = arith.mulf %80, %81 : vector<128x128xf32>
    %83 = vector.broadcast %62 : vector<1x128xf32> to vector<128x128xf32>
    %84 = arith.addf %82, %83 : vector<128x128xf32>
    %cst_30 = arith.constant 0.000000e+00 : f32
    %85 = vector.broadcast %cst_30 : f32 to vector<128x128xf32>
    %86 = arith.maximumf %84, %85 : vector<128x128xf32>
    %87 = arith.truncf %86 : vector<128x128xf32> to vector<128x128xbf16>
    %c0_31 = arith.constant 0 : index
    %c0_32 = arith.constant 0 : index
    %c0_33 = arith.constant 0 : index
    %88 = vector.load %arg4[%c0_31, %c0_32, %c0_33] : memref<3x128x128xbf16, #tpu.memory_space<vmem>>, vector<1x128x128xbf16>
    %89 = vector.shape_cast %88 : vector<1x128x128xbf16> to vector<128x128xbf16>
    %cst_34 = arith.constant dense<0.000000e+00> : vector<128x128xf32>
    %90 = tpu.matmul %87, %89, %cst_34 {dimension_numbers = #tpu.dot_dimension_numbers<[1], [0], [0], [1], [0, 0, 1, 1], [], []>} : vector<128x128xbf16>, vector<128x128xbf16>, vector<128x128xf32> -> vector<128x128xf32>
    %91 = arith.addf %90, %28 : vector<128x128xf32>
    %cst_35 = arith.constant 0.000000e+00 : f32
    %92 = vector.broadcast %cst_35 : f32 to vector<128x128xf32>
    %93 = arith.maximumf %91, %92 : vector<128x128xf32>
    %c1_36 = arith.constant 1 : index
    %c0_37 = arith.constant 0 : index
    %c0_38 = arith.constant 0 : index
    %94 = vector.load %arg6[%c1_36, %c0_37, %c0_38] : memref<3x8x128xf32, #tpu.memory_space<vmem>>, vector<1x8x128xf32>
    %95 = vector.shape_cast %94 : vector<1x8x128xf32> to vector<8x128xf32>
    %96 = vector.extract_strided_slice %95 {offsets = [0, 0], sizes = [1, 128], strides = [1, 1]} : vector<8x128xf32> to vector<1x128xf32>
    %97 = vector.extract_strided_slice %95 {offsets = [1, 0], sizes = [1, 128], strides = [1, 1]} : vector<8x128xf32> to vector<1x128xf32>
    %cst_39 = arith.constant dense<0.000000e+00> : vector<128xf32>
    %98 = vector.multi_reduction <add>, %93, %cst_39 [1] : vector<128x128xf32> to vector<128xf32>
    %99 = vector.shape_cast %98 : vector<128xf32> to vector<128x1xf32>
    %cst_40 = arith.constant 0.010416667 : f32
    %100 = vector.broadcast %cst_40 : f32 to vector<128x1xf32>
    %101 = arith.mulf %99, %100 : vector<128x1xf32>
    %102 = arith.mulf %93, %93 : vector<128x128xf32>
    %cst_41 = arith.constant dense<0.000000e+00> : vector<128xf32>
    %103 = vector.multi_reduction <add>, %102, %cst_41 [1] : vector<128x128xf32> to vector<128xf32>
    %104 = vector.shape_cast %103 : vector<128xf32> to vector<128x1xf32>
    %cst_42 = arith.constant 0.010416667 : f32
    %105 = vector.broadcast %cst_42 : f32 to vector<128x1xf32>
    %106 = arith.mulf %104, %105 : vector<128x1xf32>
    %107 = arith.mulf %101, %101 : vector<128x1xf32>
    %108 = arith.subf %106, %107 : vector<128x1xf32>
    %109 = vector.broadcast %101 : vector<128x1xf32> to vector<128x128xf32>
    %110 = arith.subf %93, %109 : vector<128x128xf32>
    %cst_43 = arith.constant 9.99999974E-6 : f32
    %111 = vector.broadcast %cst_43 : f32 to vector<128x1xf32>
    %112 = arith.addf %108, %111 : vector<128x1xf32>
    %113 = math.rsqrt %112 : vector<128x1xf32>
    %114 = vector.broadcast %113 : vector<128x1xf32> to vector<128x128xf32>
    %115 = arith.mulf %110, %114 : vector<128x128xf32>
    %116 = vector.broadcast %96 : vector<1x128xf32> to vector<128x128xf32>
    %117 = arith.mulf %115, %116 : vector<128x128xf32>
    %118 = vector.broadcast %97 : vector<1x128xf32> to vector<128x128xf32>
    %119 = arith.addf %117, %118 : vector<128x128xf32>
    %cst_44 = arith.constant 0.000000e+00 : f32
    %120 = vector.broadcast %cst_44 : f32 to vector<128x128xf32>
    %121 = arith.maximumf %119, %120 : vector<128x128xf32>
    %122 = arith.truncf %121 : vector<128x128xf32> to vector<128x128xbf16>
    %c1_45 = arith.constant 1 : index
    %c0_46 = arith.constant 0 : index
    %c0_47 = arith.constant 0 : index
    %123 = vector.load %arg3[%c1_45, %c0_46, %c0_47] : memref<3x128x128xbf16, #tpu.memory_space<vmem>>, vector<1x128x128xbf16>
    %124 = vector.shape_cast %123 : vector<1x128x128xbf16> to vector<128x128xbf16>
    %cst_48 = arith.constant dense<0.000000e+00> : vector<128x128xf32>
    %125 = tpu.matmul %122, %124, %cst_48 {dimension_numbers = #tpu.dot_dimension_numbers<[1], [0], [0], [1], [0, 0, 1, 1], [], []>} : vector<128x128xbf16>, vector<128x128xbf16>, vector<128x128xf32> -> vector<128x128xf32>
    %126 = vector.extract_strided_slice %95 {offsets = [2, 0], sizes = [1, 128], strides = [1, 1]} : vector<8x128xf32> to vector<1x128xf32>
    %127 = vector.extract_strided_slice %95 {offsets = [3, 0], sizes = [1, 128], strides = [1, 1]} : vector<8x128xf32> to vector<1x128xf32>
    %cst_49 = arith.constant dense<0.000000e+00> : vector<128xf32>
    %128 = vector.multi_reduction <add>, %125, %cst_49 [1] : vector<128x128xf32> to vector<128xf32>
    %129 = vector.shape_cast %128 : vector<128xf32> to vector<128x1xf32>
    %cst_50 = arith.constant 0.010416667 : f32
    %130 = vector.broadcast %cst_50 : f32 to vector<128x1xf32>
    %131 = arith.mulf %129, %130 : vector<128x1xf32>
    %132 = arith.mulf %125, %125 : vector<128x128xf32>
    %cst_51 = arith.constant dense<0.000000e+00> : vector<128xf32>
    %133 = vector.multi_reduction <add>, %132, %cst_51 [1] : vector<128x128xf32> to vector<128xf32>
    %134 = vector.shape_cast %133 : vector<128xf32> to vector<128x1xf32>
    %cst_52 = arith.constant 0.010416667 : f32
    %135 = vector.broadcast %cst_52 : f32 to vector<128x1xf32>
    %136 = arith.mulf %134, %135 : vector<128x1xf32>
    %137 = arith.mulf %131, %131 : vector<128x1xf32>
    %138 = arith.subf %136, %137 : vector<128x1xf32>
    %139 = vector.broadcast %131 : vector<128x1xf32> to vector<128x128xf32>
    %140 = arith.subf %125, %139 : vector<128x128xf32>
    %cst_53 = arith.constant 9.99999974E-6 : f32
    %141 = vector.broadcast %cst_53 : f32 to vector<128x1xf32>
    %142 = arith.addf %138, %141 : vector<128x1xf32>
    %143 = math.rsqrt %142 : vector<128x1xf32>
    %144 = vector.broadcast %143 : vector<128x1xf32> to vector<128x128xf32>
    %145 = arith.mulf %140, %144 : vector<128x128xf32>
    %146 = vector.broadcast %126 : vector<1x128xf32> to vector<128x128xf32>
    %147 = arith.mulf %145, %146 : vector<128x128xf32>
    %148 = vector.broadcast %127 : vector<1x128xf32> to vector<128x128xf32>
    %149 = arith.addf %147, %148 : vector<128x128xf32>
    %cst_54 = arith.constant 0.000000e+00 : f32
    %150 = vector.broadcast %cst_54 : f32 to vector<128x128xf32>
    %151 = arith.maximumf %149, %150 : vector<128x128xf32>
    %152 = arith.truncf %151 : vector<128x128xf32> to vector<128x128xbf16>
    %c1_55 = arith.constant 1 : index
    %c0_56 = arith.constant 0 : index
    %c0_57 = arith.constant 0 : index
    %153 = vector.load %arg4[%c1_55, %c0_56, %c0_57] : memref<3x128x128xbf16, #tpu.memory_space<vmem>>, vector<1x128x128xbf16>
    %154 = vector.shape_cast %153 : vector<1x128x128xbf16> to vector<128x128xbf16>
    %cst_58 = arith.constant dense<0.000000e+00> : vector<128x128xf32>
    %155 = tpu.matmul %152, %154, %cst_58 {dimension_numbers = #tpu.dot_dimension_numbers<[1], [0], [0], [1], [0, 0, 1, 1], [], []>} : vector<128x128xbf16>, vector<128x128xbf16>, vector<128x128xf32> -> vector<128x128xf32>
    %156 = arith.addf %155, %93 : vector<128x128xf32>
    %cst_59 = arith.constant 0.000000e+00 : f32
    %157 = vector.broadcast %cst_59 : f32 to vector<128x128xf32>
    %158 = arith.maximumf %156, %157 : vector<128x128xf32>
    %c2 = arith.constant 2 : index
    %c0_60 = arith.constant 0 : index
    %c0_61 = arith.constant 0 : index
    %159 = vector.load %arg6[%c2, %c0_60, %c0_61] : memref<3x8x128xf32, #tpu.memory_space<vmem>>, vector<1x8x128xf32>
    %160 = vector.shape_cast %159 : vector<1x8x128xf32> to vector<8x128xf32>
    %161 = vector.extract_strided_slice %160 {offsets = [0, 0], sizes = [1, 128], strides = [1, 1]} : vector<8x128xf32> to vector<1x128xf32>
    %162 = vector.extract_strided_slice %160 {offsets = [1, 0], sizes = [1, 128], strides = [1, 1]} : vector<8x128xf32> to vector<1x128xf32>
    %cst_62 = arith.constant dense<0.000000e+00> : vector<128xf32>
    %163 = vector.multi_reduction <add>, %158, %cst_62 [1] : vector<128x128xf32> to vector<128xf32>
    %164 = vector.shape_cast %163 : vector<128xf32> to vector<128x1xf32>
    %cst_63 = arith.constant 0.010416667 : f32
    %165 = vector.broadcast %cst_63 : f32 to vector<128x1xf32>
    %166 = arith.mulf %164, %165 : vector<128x1xf32>
    %167 = arith.mulf %158, %158 : vector<128x128xf32>
    %cst_64 = arith.constant dense<0.000000e+00> : vector<128xf32>
    %168 = vector.multi_reduction <add>, %167, %cst_64 [1] : vector<128x128xf32> to vector<128xf32>
    %169 = vector.shape_cast %168 : vector<128xf32> to vector<128x1xf32>
    %cst_65 = arith.constant 0.010416667 : f32
    %170 = vector.broadcast %cst_65 : f32 to vector<128x1xf32>
    %171 = arith.mulf %169, %170 : vector<128x1xf32>
    %172 = arith.mulf %166, %166 : vector<128x1xf32>
    %173 = arith.subf %171, %172 : vector<128x1xf32>
    %174 = vector.broadcast %166 : vector<128x1xf32> to vector<128x128xf32>
    %175 = arith.subf %158, %174 : vector<128x128xf32>
    %cst_66 = arith.constant 9.99999974E-6 : f32
    %176 = vector.broadcast %cst_66 : f32 to vector<128x1xf32>
    %177 = arith.addf %173, %176 : vector<128x1xf32>
    %178 = math.rsqrt %177 : vector<128x1xf32>
    %179 = vector.broadcast %178 : vector<128x1xf32> to vector<128x128xf32>
    %180 = arith.mulf %175, %179 : vector<128x128xf32>
    %181 = vector.broadcast %161 : vector<1x128xf32> to vector<128x128xf32>
    %182 = arith.mulf %180, %181 : vector<128x128xf32>
    %183 = vector.broadcast %162 : vector<1x128xf32> to vector<128x128xf32>
    %184 = arith.addf %182, %183 : vector<128x128xf32>
    %cst_67 = arith.constant 0.000000e+00 : f32
    %185 = vector.broadcast %cst_67 : f32 to vector<128x128xf32>
    %186 = arith.maximumf %184, %185 : vector<128x128xf32>
    %187 = arith.truncf %186 : vector<128x128xf32> to vector<128x128xbf16>
    %c2_68 = arith.constant 2 : index
    %c0_69 = arith.constant 0 : index
    %c0_70 = arith.constant 0 : index
    %188 = vector.load %arg3[%c2_68, %c0_69, %c0_70] : memref<3x128x128xbf16, #tpu.memory_space<vmem>>, vector<1x128x128xbf16>
    %189 = vector.shape_cast %188 : vector<1x128x128xbf16> to vector<128x128xbf16>
    %cst_71 = arith.constant dense<0.000000e+00> : vector<128x128xf32>
    %190 = tpu.matmul %187, %189, %cst_71 {dimension_numbers = #tpu.dot_dimension_numbers<[1], [0], [0], [1], [0, 0, 1, 1], [], []>} : vector<128x128xbf16>, vector<128x128xbf16>, vector<128x128xf32> -> vector<128x128xf32>
    %191 = vector.extract_strided_slice %160 {offsets = [2, 0], sizes = [1, 128], strides = [1, 1]} : vector<8x128xf32> to vector<1x128xf32>
    %192 = vector.extract_strided_slice %160 {offsets = [3, 0], sizes = [1, 128], strides = [1, 1]} : vector<8x128xf32> to vector<1x128xf32>
    %cst_72 = arith.constant dense<0.000000e+00> : vector<128xf32>
    %193 = vector.multi_reduction <add>, %190, %cst_72 [1] : vector<128x128xf32> to vector<128xf32>
    %194 = vector.shape_cast %193 : vector<128xf32> to vector<128x1xf32>
    %cst_73 = arith.constant 0.010416667 : f32
    %195 = vector.broadcast %cst_73 : f32 to vector<128x1xf32>
    %196 = arith.mulf %194, %195 : vector<128x1xf32>
    %197 = arith.mulf %190, %190 : vector<128x128xf32>
    %cst_74 = arith.constant dense<0.000000e+00> : vector<128xf32>
    %198 = vector.multi_reduction <add>, %197, %cst_74 [1] : vector<128x128xf32> to vector<128xf32>
    %199 = vector.shape_cast %198 : vector<128xf32> to vector<128x1xf32>
    %cst_75 = arith.constant 0.010416667 : f32
    %200 = vector.broadcast %cst_75 : f32 to vector<128x1xf32>
    %201 = arith.mulf %199, %200 : vector<128x1xf32>
    %202 = arith.mulf %196, %196 : vector<128x1xf32>
    %203 = arith.subf %201, %202 : vector<128x1xf32>
    %204 = vector.broadcast %196 : vector<128x1xf32> to vector<128x128xf32>
    %205 = arith.subf %190, %204 : vector<128x128xf32>
    %cst_76 = arith.constant 9.99999974E-6 : f32
    %206 = vector.broadcast %cst_76 : f32 to vector<128x1xf32>
    %207 = arith.addf %203, %206 : vector<128x1xf32>
    %208 = math.rsqrt %207 : vector<128x1xf32>
    %209 = vector.broadcast %208 : vector<128x1xf32> to vector<128x128xf32>
    %210 = arith.mulf %205, %209 : vector<128x128xf32>
    %211 = vector.broadcast %191 : vector<1x128xf32> to vector<128x128xf32>
    %212 = arith.mulf %210, %211 : vector<128x128xf32>
    %213 = vector.broadcast %192 : vector<1x128xf32> to vector<128x128xf32>
    %214 = arith.addf %212, %213 : vector<128x128xf32>
    %cst_77 = arith.constant 0.000000e+00 : f32
    %215 = vector.broadcast %cst_77 : f32 to vector<128x128xf32>
    %216 = arith.maximumf %214, %215 : vector<128x128xf32>
    %217 = arith.truncf %216 : vector<128x128xf32> to vector<128x128xbf16>
    %c2_78 = arith.constant 2 : index
    %c0_79 = arith.constant 0 : index
    %c0_80 = arith.constant 0 : index
    %218 = vector.load %arg4[%c2_78, %c0_79, %c0_80] : memref<3x128x128xbf16, #tpu.memory_space<vmem>>, vector<1x128x128xbf16>
    %219 = vector.shape_cast %218 : vector<1x128x128xbf16> to vector<128x128xbf16>
    %cst_81 = arith.constant dense<0.000000e+00> : vector<128x128xf32>
    %220 = tpu.matmul %217, %219, %cst_81 {dimension_numbers = #tpu.dot_dimension_numbers<[1], [0], [0], [1], [0, 0, 1, 1], [], []>} : vector<128x128xbf16>, vector<128x128xbf16>, vector<128x128xf32> -> vector<128x128xf32>
    %221 = arith.addf %220, %158 : vector<128x128xf32>
    %cst_82 = arith.constant 0.000000e+00 : f32
    %222 = vector.broadcast %cst_82 : f32 to vector<128x128xf32>
    %223 = arith.maximumf %221, %222 : vector<128x128xf32>
    %c2_83 = arith.constant 2 : index
    %c0_84 = arith.constant 0 : index
    %224 = vector.load %arg5[%c2_83, %c0_84] : memref<8x128xf32, #tpu.memory_space<vmem>>, vector<1x128xf32>
    %c3 = arith.constant 3 : index
    %c0_85 = arith.constant 0 : index
    %225 = vector.load %arg5[%c3, %c0_85] : memref<8x128xf32, #tpu.memory_space<vmem>>, vector<1x128xf32>
    %cst_86 = arith.constant dense<0.000000e+00> : vector<128xf32>
    %226 = vector.multi_reduction <add>, %223, %cst_86 [1] : vector<128x128xf32> to vector<128xf32>
    %227 = vector.shape_cast %226 : vector<128xf32> to vector<128x1xf32>
    %cst_87 = arith.constant 0.010416667 : f32
    %228 = vector.broadcast %cst_87 : f32 to vector<128x1xf32>
    %229 = arith.mulf %227, %228 : vector<128x1xf32>
    %230 = arith.mulf %223, %223 : vector<128x128xf32>
    %cst_88 = arith.constant dense<0.000000e+00> : vector<128xf32>
    %231 = vector.multi_reduction <add>, %230, %cst_88 [1] : vector<128x128xf32> to vector<128xf32>
    %232 = vector.shape_cast %231 : vector<128xf32> to vector<128x1xf32>
    %cst_89 = arith.constant 0.010416667 : f32
    %233 = vector.broadcast %cst_89 : f32 to vector<128x1xf32>
    %234 = arith.mulf %232, %233 : vector<128x1xf32>
    %235 = arith.mulf %229, %229 : vector<128x1xf32>
    %236 = arith.subf %234, %235 : vector<128x1xf32>
    %237 = vector.broadcast %229 : vector<128x1xf32> to vector<128x128xf32>
    %238 = arith.subf %223, %237 : vector<128x128xf32>
    %cst_90 = arith.constant 9.99999974E-6 : f32
    %239 = vector.broadcast %cst_90 : f32 to vector<128x1xf32>
    %240 = arith.addf %236, %239 : vector<128x1xf32>
    %241 = math.rsqrt %240 : vector<128x1xf32>
    %242 = vector.broadcast %241 : vector<128x1xf32> to vector<128x128xf32>
    %243 = arith.mulf %238, %242 : vector<128x128xf32>
    %244 = vector.broadcast %224 : vector<1x128xf32> to vector<128x128xf32>
    %245 = arith.mulf %243, %244 : vector<128x128xf32>
    %246 = vector.broadcast %225 : vector<1x128xf32> to vector<128x128xf32>
    %247 = arith.addf %245, %246 : vector<128x128xf32>
    %cst_91 = arith.constant 0.000000e+00 : f32
    %248 = vector.broadcast %cst_91 : f32 to vector<128x128xf32>
    %249 = arith.maximumf %247, %248 : vector<128x128xf32>
    %250 = arith.truncf %249 : vector<128x128xf32> to vector<128x128xbf16>
    %c0_92 = arith.constant 0 : index
    %c0_93 = arith.constant 0 : index
    %251 = vector.load %arg7[%c0_92, %c0_93] : memref<128x128xbf16, #tpu.memory_space<vmem>>, vector<128x128xbf16>
    %cst_94 = arith.constant dense<0.000000e+00> : vector<128x128xf32>
    %252 = tpu.matmul %250, %251, %cst_94 {dimension_numbers = #tpu.dot_dimension_numbers<[1], [0], [0], [1], [0, 0, 1, 1], [], []>} : vector<128x128xbf16>, vector<128x128xbf16>, vector<128x128xf32> -> vector<128x128xf32>
    %c0_95 = arith.constant 0 : index
    %c0_96 = arith.constant 0 : index
    %253 = vector.load %arg8[%c0_95, %c0_96] : memref<128x128xf32, #tpu.memory_space<vmem>>, vector<128x128xf32>
    tpu.vector_store %arg8[%c0_95, %c0_96], %252 {strides = array<i32>} : memref<128x128xf32, #tpu.memory_space<vmem>>, vector<128x128xf32>,
    return
  }
  func.func @transform_0(%arg0: i32) -> (i32, i32) {
    %c0_i32 = arith.constant 0 : i32
    %c0_i32_0 = arith.constant 0 : i32
    return %arg0, %c0_i32 : i32, i32
  }
  func.func @transform_1(%arg0: i32) -> (i32, i32) {
    %c0_i32 = arith.constant 0 : i32
    %c0_i32_0 = arith.constant 0 : i32
    %c0_i32_1 = arith.constant 0 : i32
    return %c0_i32, %c0_i32_0 : i32, i32
  }
  func.func @transform_2(%arg0: i32) -> (i32, i32, i32) {
    %c0_i32 = arith.constant 0 : i32
    %c0_i32_0 = arith.constant 0 : i32
    %c0_i32_1 = arith.constant 0 : i32
    %c0_i32_2 = arith.constant 0 : i32
    return %c0_i32, %c0_i32_0, %c0_i32_1 : i32, i32, i32
  }
  func.func @transform_3(%arg0: i32) -> (i32, i32, i32) {
    %c0_i32 = arith.constant 0 : i32
    %c0_i32_0 = arith.constant 0 : i32
    %c0_i32_1 = arith.constant 0 : i32
    %c0_i32_2 = arith.constant 0 : i32
    return %c0_i32, %c0_i32_0, %c0_i32_1 : i32, i32, i32
  }
  func.func @transform_4(%arg0: i32) -> (i32, i32) {
    %c0_i32 = arith.constant 0 : i32
    %c0_i32_0 = arith.constant 0 : i32
    %c0_i32_1 = arith.constant 0 : i32
    return %c0_i32, %c0_i32_0 : i32, i32
  }
  func.func @transform_5(%arg0: i32) -> (i32, i32, i32) {
    %c0_i32 = arith.constant 0 : i32
    %c0_i32_0 = arith.constant 0 : i32
    %c0_i32_1 = arith.constant 0 : i32
    %c0_i32_2 = arith.constant 0 : i32
    return %c0_i32, %c0_i32_0, %c0_i32_1 : i32, i32, i32
  }
  func.func @transform_6(%arg0: i32) -> (i32, i32) {
    %c0_i32 = arith.constant 0 : i32
    %c0_i32_0 = arith.constant 0 : i32
    %c0_i32_1 = arith.constant 0 : i32
    return %c0_i32, %c0_i32_0 : i32, i32
  }
  func.func @transform_7(%arg0: i32) -> (i32, i32) {
    %c0_i32 = arith.constant 0 : i32
    %c0_i32_0 = arith.constant 0 : i32
    return %arg0, %c0_i32 : i32, i32
  }
}

</mosaic_0001>

<bundles_post_ra>
// kernel: tpu_custom_call.1
= control target key start
LH: loop header
LB: loop body
LE: loop exit
PB: predicated region body
PF: predicated region fallthrough
CT: control target
= control target key end

     0   :  { %12 = vsyncpa [#allocation3], 0  ;;  %s6488_s0 = inlined_call_operand.hbm [shape: bf16[128,128], index: 0, kind: input, shape index: {}]   ;;  %s6489_s1 = inlined_call_operand.hbm [shape: bf16[128,128], index: 1, kind: input, shape index: {}]   ;;  %s6490_s2 = inlined_call_operand.hbm [shape: bf16[3,128,128], index: 2, kind: input, shape index: {}]   ;;  %s6491_s3 = inlined_call_operand.hbm [shape: bf16[3,128,128], index: 3, kind: input, shape index: {}]   ;;  %s6492_s4 = inlined_call_operand.hbm [shape: f32[8,128], index: 4, kind: input, shape index: {}]   ;;  %s6493_s5 = inlined_call_operand.hbm [shape: f32[3,8,128], index: 5, kind: input, shape index: {}]   ;;  %s6494_s6 = inlined_call_operand.hbm [shape: bf16[128,128], index: 6, kind: input, shape index: {}]   ;;  %s6495_s7 = inlined_call_operand.hbm [shape: f32[128,128], index: 7, kind: output, shape index: {}]  }
   0x1   :  { %13 = vsyncpa [#allocation6], 0 }
   0x2   :  { %14 = vsyncpa [#allocation9], 0 }
   0x3   :  { %15 = vsyncpa [#allocation12], 0 }
   0x4   :  { %16 = vsyncpa [#allocation4], 0  ;;  %s4708_s24 = smov [#allocation5]   ;;  %s4709_s26 = smov [#allocation8]  }
   0x5   :  { %s34_s25 = sshll.u32 %s4708_s24, 4  ;;  %s58_s27 = sshll.u32 %s4709_s26, 4  ;;  %s35_s25 = int_to_ptr.vmem [resolvable:$true] %s34_s25  ;;  %s59_s27 = int_to_ptr.vmem [resolvable:$true] %s58_s27 }
   0x6   :  { %s4546_s28 = scalar_lea.vmem %s35_s25, 1024  ;;  %p4551_p1 = scmp.lt.s32.totalorder %s35_s25, %s35_s25 }
   0x7   :  { %p4547_p0 = scmp.ne.s32.totalorder %s35_s25, %s4546_s28  ;;  %p4552_p2 = scmp.lt.s32.totalorder %s4546_s28, %s4546_s28 }
   0x9   :  { %p4553_p3 = por %p4552_p2, %p4551_p1 }
   0xb   :  { %p4554_p4 = pnand %p4553_p3, %p4547_p0 }
   0xd   :  { %4557 = shalt.err (!%p4554_p4)
}
   0xe   :  { %s4710_s29 = smov 64   ;;  %s4711_s30 = smov 4  }
   0xf   :  { %40 = dma.hbm_to_vmem [thread:$0]  %s6489_s1, 1024, %s35_s25, [#allocation6], %s4710_s29, %s4710_s29, %s4711_s30  }
  0x10   :  { %s4566_s10 = scalar_lea.vmem %s59_s27, 3072  ;;  %p4571_p6 = scmp.lt.s32.totalorder %s59_s27, %s59_s27 }
  0x11   :  { %p4567_p5 = scmp.ne.s32.totalorder %s59_s27, %s4566_s10  ;;  %p4572_p7 = scmp.lt.s32.totalorder %s4566_s10, %s4566_s10 }
  0x13   :  { %p4573_p8 = por %p4572_p7, %p4571_p6 }
  0x15   :  { %p4574_p9 = pnand %p4573_p8, %p4567_p5 }
  0x17   :  { %4577 = shalt.err (!%p4574_p9)
}
  0x18   :  { %64 = dma.hbm_to_vmem [thread:$0]  %s6491_s3, 3072, %s59_s27, [#allocation9], %s4710_s29, %s4710_s29, %s4711_s30  }
  0x19   :  { %s4712_s13 = smov [#allocation11]  }
  0x1a   :  { %s80_s14 = sshll.u32 %s4712_s13, 4  ;;  %s81_s14 = int_to_ptr.vmem [resolvable:$true] %s80_s14 }
  0x1b   :  { %s4586_s15 = scalar_lea.vmem %s81_s14, 384  ;;  %p4591_p11 = scmp.lt.s32.totalorder %s81_s14, %s81_s14 }
  0x1c   :  { %p4587_p10 = scmp.ne.s32.totalorder %s81_s14, %s4586_s15  ;;  %p4592_p12 = scmp.lt.s32.totalorder %s4586_s15, %s4586_s15 }
  0x1e   :  { %p4593_p13 = por %p4592_p12, %p4591_p11 }
  0x20   :  { %p4594_p0 = pnand %p4593_p13, %p4587_p10 }
  0x22   :  { %4597 = shalt.err (!%p4594_p0)
}
  0x23   :  { %s4713_s1 = smov 128   ;;  %s4714_s16 = smov 8  }
  0x24   :  { %86 = dma.hbm_to_vmem [thread:$0]  %s6493_s5, 384, %s81_s14, [#allocation12], %s4713_s1, %s4713_s1, %s4714_s16  }
  0x25   :  { %s4715_s3 = smov [#allocation2]   ;;  %s4716_s20 = smov [#allocation7]  }
  0x26   :  { %s22_s19 = sshll.u32 %s4715_s3, 4  ;;  %s46_s21 = sshll.u32 %s4716_s20, 4  ;;  %s23_s19 = int_to_ptr.vmem [resolvable:$true] %s22_s19  ;;  %s47_s21 = int_to_ptr.vmem [resolvable:$true] %s46_s21 }
  0x27   :  { %s4606_s22 = scalar_lea.vmem %s23_s19, 1024  ;;  %p4611_p2 = scmp.lt.s32.totalorder %s23_s19, %s23_s19 }
  0x28   :  { %p4607_p1 = scmp.ne.s32.totalorder %s23_s19, %s4606_s22  ;;  %p4612_p3 = scmp.lt.s32.totalorder %s4606_s22, %s4606_s22 }
  0x2a   :  { %p4613_p4 = por %p4612_p3, %p4611_p2 }
  0x2c   :  { %p4614_p5 = pnand %p4613_p4, %p4607_p1 }
  0x2e   :  { %4617 = shalt.err (!%p4614_p5)
}
  0x2f   :  { %28 = dma.hbm_to_vmem [thread:$0]  %s6488_s0, 1024, %s23_s19, [#allocation3], %s4710_s29, %s4710_s29, %s4711_s30  }
  0x30   :  { %s4626_s5 = scalar_lea.vmem %s47_s21, 3072  ;;  %p4631_p7 = scmp.lt.s32.totalorder %s47_s21, %s47_s21 }
  0x31   :  { %p4627_p6 = scmp.ne.s32.totalorder %s47_s21, %s4626_s5  ;;  %p4632_p8 = scmp.lt.s32.totalorder %s4626_s5, %s4626_s5 }
  0x33   :  { %p4633_p9 = por %p4632_p8, %p4631_p7 }
  0x35   :  { %p4634_p10 = pnand %p4633_p9, %p4627_p6 }
  0x37   :  { %4637 = shalt.err (!%p4634_p10)
}
  0x38   :  { %52 = dma.hbm_to_vmem [thread:$0]  %s6490_s2, 3072, %s47_s21, [#allocation6], %s4710_s29, %s4710_s29, %s4711_s30  }
  0x39   :  { %s4717_s27 = smov [#allocation10]   ;;  %s4718_s8 = smov [#allocation13]  }
  0x3a   :  { %s71_s28 = sshll.u32 %s4717_s27, 4  ;;  %s92_s0 = sshll.u32 %s4718_s8, 4  ;;  %s72_s28 = int_to_ptr.vmem [resolvable:$true] %s71_s28  ;;  %s93_s0 = int_to_ptr.vmem [resolvable:$true] %s92_s0 }
  0x3b   :  { %s4646_s9 = scalar_lea.vmem %s72_s28, 128  ;;  %p4651_p12 = scmp.lt.s32.totalorder %s72_s28, %s72_s28 }
  0x3c   :  { %p4647_p11 = scmp.ne.s32.totalorder %s72_s28, %s4646_s9  ;;  %p4652_p13 = scmp.lt.s32.totalorder %s4646_s9, %s4646_s9 }
  0x3e   :  { %p4653_p0 = por %p4652_p13, %p4651_p12 }
  0x40   :  { %p4654_p1 = pnand %p4653_p0, %p4647_p11 }
  0x42   :  { %4657 = shalt.err (!%p4654_p1)
}
  0x43   :  { %74 = dma.hbm_to_vmem [thread:$0]  %s6492_s4, 128, %s72_s28, [#allocation9]  }
  0x44   :  { %s4666_s12 = scalar_lea.vmem %s93_s0, 1024  ;;  %p4671_p3 = scmp.lt.s32.totalorder %s93_s0, %s93_s0 }
  0x45   :  { %p4667_p2 = scmp.ne.s32.totalorder %s93_s0, %s4666_s12  ;;  %p4672_p4 = scmp.lt.s32.totalorder %s4666_s12, %s4666_s12 }
  0x47   :  { %p4673_p5 = por %p4672_p4, %p4671_p3 }
  0x49   :  { %p4674_p6 = pnand %p4673_p5, %p4667_p2 }
  0x4b   :  { %4677 = shalt.err (!%p4674_p6)
}
  0x4c   :  { %98 = dma.hbm_to_vmem [thread:$0]  %s6494_s6, 1024, %s93_s0, [#allocation12], %s4710_s29, %s4710_s29, %s4711_s30  }
  0x4d   :  { %4698 = dma.done.wait [#allocation3], 1024  }
  0x4e   :  { %4699 = vsyncadd [#allocation3], 4294966272 }
  0x4f   :  { %4700 = dma.done.wait [#allocation6], 4096  }
  0x50   :  { %4701 = vsyncadd [#allocation6], 4294963200 }
  0x51   :  { %4702 = dma.done.wait [#allocation9], 3200  }
  0x52   :  { %4703 = vsyncadd [#allocation9], 4294964096 }
  0x53   :  { %4704 = dma.done.wait [#allocation12], 1408  }
  0x54   :  { %4705 = vsyncadd [#allocation12], 4294965888  ;;  %v4210_v0 = vld [vmem:[#allocation5 + $0x38] sm:$0xff]   ;;  %v4211_v1 = vld [vmem:[#allocation5 + $0x30] sm:$0xff]   ;;  %s4719_s4 = smov [#allocation14]  }
  0x55   :  { %3942 = vmatprep.subr.bf16.mxu0 %v4210_v0  ;;  %v4212_v2 = vld [vmem:[#allocation5 + $0x28] sm:$0xff]   ;;  %v4213_v3 = vld [vmem:[#allocation5 + $0x20] sm:$0xff]   ;;  %v4214_v5 = vld [vmem:[#allocation5 + $0x18] sm:$0xff]   ;;  %s3723_s6 = sshll.u32 %s4719_s4, 4  ;;  %s3724_s6 = int_to_ptr.vmem [resolvable:$true] %s3723_s6 }
  0x56   :  { %3943 = vmatpush3.bf16.msra.mxu0 %v4210_v0  ;;  %v4218_v4 = vld [vmem:[#allocation2] sm:$0xff]   ;;  %v4215_v6 = vld [vmem:[#allocation5 + $0x10] sm:$0xff]   ;;  %v4216_v7 = vld [vmem:[#allocation5 + $0x8] sm:$0xff]   ;;  %s4678_s29 = scalar_lea.vmem %s3724_s6, 2048  ;;  %p4683_p8 = scmp.lt.s32.totalorder %s3724_s6, %s3724_s6 }
  0x57   :  { %3944 = vmatprep.subr.bf16.mxu0 %v4211_v1  ;;  %3958 = vmatprep.mubr.bf16.mxu0 %v4218_v4  ;;  %v4217_v8 = vld [vmem:[#allocation5] sm:$0xff]   ;;  %v4219_v9 = vld [vmem:[#allocation2 + $0x8] sm:$0xff]   ;;  %v4220_v10 = vld [vmem:[#allocation2 + $0x10] sm:$0xff]   ;;  %p4679_p7 = scmp.ne.s32.totalorder %s3724_s6, %s4678_s29  ;;  %p4684_p9 = scmp.lt.s32.totalorder %s4678_s29, %s4678_s29 }
  0x58   :  { %v4221_v11 = vld [vmem:[#allocation2 + $0x18] sm:$0xff]   ;;  %v4222_v12 = vld [vmem:[#allocation2 + $0x20] sm:$0xff]   ;;  %v4223_v13 = vld [vmem:[#allocation2 + $0x28] sm:$0xff]  }
  0x59   :  { %v4224_v14 = vld [vmem:[#allocation2 + $0x30] sm:$0xff]   ;;  %v4225_v15 = vld [vmem:[#allocation2 + $0x38] sm:$0xff]   ;;  %p4685_p10 = por %p4684_p9, %p4683_p8 }
  0x5a   :  { %3945 = vmatpush3.bf16.msra.mxu0 %v4211_v1 }
  0x5b   :  { %3946 = vmatprep.subr.bf16.mxu0 %v4212_v2  ;;  %p4686_p11 = pnand %p4685_p10, %p4679_p7 }
  0x5e   :  { %3947 = vmatpush3.bf16.msra.mxu0 %v4212_v2 }
  0x5f   :  { %3948 = vmatprep.subr.bf16.mxu0 %v4213_v3 }
  0x62   :  { %3949 = vmatpush3.bf16.msra.mxu0 %v4213_v3 }
  0x63   :  { %3950 = vmatprep.subr.bf16.mxu0 %v4214_v5 }
  0x66   :  { %3951 = vmatpush3.bf16.msra.mxu0 %v4214_v5 }
  0x67   :  { %3952 = vmatprep.subr.bf16.mxu0 %v4215_v6 }
  0x6a   :  { %3953 = vmatpush3.bf16.msra.mxu0 %v4215_v6 }
  0x6b   :  { %3954 = vmatprep.subr.bf16.mxu0 %v4216_v7 }
  0x6e   :  { %3955 = vmatpush3.bf16.msra.mxu0 %v4216_v7 }
  0x6f   :  { %3956 = vmatprep.subr.bf16.mxu0 %v4217_v8 }
  0x72   :  { %3957 = vmatpush3.bf16.msra.mxu0 %v4217_v8 }
  0x75   :  { %3959 = vmatmul.mubr.bf16.vlgmr.msra.gmra.mxu0 %v4219_v9 }
  0x76   :  { %3962 = vmatprep.mubr.bf16.mxu0 %v4220_v10 }
  0x7d   :  { %3963 = vmatmul.mubr.bf16.gmra.mxu0 %v4221_v11 }
  0x7e   :  { %3966 = vmatprep.mubr.bf16.mxu0 %v4222_v12 }
  0x85   :  { %3967 = vmatmul.mubr.bf16.gmra.mxu0 %v4223_v13 }
  0x86   :  { %3970 = vmatprep.mubr.bf16.mxu0 %v4224_v14 }
  0x8d   :  { %3971 = vmatmul.mubr.bf16.gmra.mxu0 %v4225_v15 }
 0x135   :  { %v4799_v16 = vpop.f32.mrf.mxu0 }
 0x136   :  { %352 = vadd.xlane.f32.xlu1 %v4799_v16  ;;  %v398_v19 = vmul.f32 %v4799_v16, %v4799_v16 }
 0x137   :  { %v4802_v17 = vpop.f32.mrf.mxu0 }
 0x138   :  { %348 = vadd.xlane.f32.xlu0 %v4802_v17  ;;  %v396_v23 = vmul.f32 %v4802_v17, %v4802_v17 }
 0x139   :  { %v4805_v18 = vpop.f32.mrf.mxu0 }
 0x13a   :  { %354 = vadd.xlane.f32.xlu1 %v4805_v18  ;;  %v399_v21 = vmul.f32 %v4805_v18, %v4805_v18 }
 0x13b   :  { %v4810_v20 = vpop.f32.mrf.mxu0 }
 0x13c   :  { %416 = vadd.xlane.f32.xlu0 %v398_v19  ;;  %v397_v24 = vmul.f32 %v4810_v20, %v4810_v20 }
 0x13d   :  { %v4814_v22 = vpop.f32.mrf.mxu0 }
 0x13e   :  { %418 = vadd.xlane.f32.xlu1 %v399_v21  ;;  %v402_v30 = vmul.f32 %v4814_v22, %v4814_v22 }
 0x13f   :  { %v4820_v25 = vpop.f32.mrf.mxu0 }
 0x140   :  { %412 = vadd.xlane.f32.xlu0 %v396_v23  ;;  %v400_v33 = vmul.f32 %v4820_v25, %v4820_v25 }
 0x141   :  { %v4823_v26 = vpop.f32.mrf.mxu0 }
 0x142   :  { %414 = vadd.xlane.f32.xlu1 %v397_v24  ;;  %v403_v28 = vmul.f32 %v4823_v26, %v4823_v26 }
 0x143   :  { %v4827_v27 = vpop.f32.mrf.mxu0 }
 0x144   :  { %350 = vadd.xlane.f32.xlu0 %v4810_v20  ;;  %v401_v31 = vmul.f32 %v4827_v27, %v4827_v27 }
 0x145   :  { %v4833_v29 = vpop.f32.mrf.mxu0 }
 0x146   :  { %362 = vadd.xlane.f32.xlu1 %v4823_v26  ;;  %v406_v38 = vmul.f32 %v4833_v29, %v4833_v29 }
 0x147   :  { %v4839_v32 = vpop.f32.mrf.mxu0 }
 0x148   :  { %360 = vadd.xlane.f32.xlu0 %v4814_v22  ;;  %v404_v41 = vmul.f32 %v4839_v32, %v4839_v32 }
 0x149   :  { %v4843_v34 = vpop.f32.mrf.mxu0 }
 0x14a   :  { %358 = vadd.xlane.f32.xlu1 %v4827_v27  ;;  %v407_v37 = vmul.f32 %v4843_v34, %v4843_v34 }
 0x14b   :  { %v4847_v35 = vpop.f32.mrf.mxu0 }
 0x14c   :  { %356 = vadd.xlane.f32.xlu0 %v4820_v25  ;;  %v405_v40 = vmul.f32 %v4847_v35, %v4847_v35 }
 0x14d   :  { %v4850_v36 = vpop.f32.mrf.mxu0 }
 0x14e   :  { %426 = vadd.xlane.f32.xlu1 %v403_v28  ;;  %v410_v47 = vmul.f32 %v4850_v36, %v4850_v36 }
 0x14f   :  { %v4857_v39 = vpop.f32.mrf.mxu0 }
 0x150   :  { %424 = vadd.xlane.f32.xlu0 %v402_v30  ;;  %v408_v45 = vmul.f32 %v4857_v39, %v4857_v39 }
 0x151   :  { %v4863_v42 = vpop.f32.mrf.mxu0 }
 0x152   :  { %422 = vadd.xlane.f32.xlu1 %v401_v31  ;;  %v411_v46 = vmul.f32 %v4863_v42, %v4863_v42 }
 0x153   :  { %v4867_v43 = vpop.f32.mrf.mxu0 }
 0x154   :  { %420 = vadd.xlane.f32.xlu0 %v400_v33  ;;  %v409_v44 = vmul.f32 %v4867_v43, %v4867_v43 }
 0x156   :  { %370 = vadd.xlane.f32.xlu1 %v4843_v34 }
 0x158   :  { %368 = vadd.xlane.f32.xlu0 %v4833_v29 }
 0x15a   :  { %366 = vadd.xlane.f32.xlu1 %v4847_v35 }
 0x15c   :  { %364 = vadd.xlane.f32.xlu0 %v4839_v32 }
 0x15e   :  { %434 = vadd.xlane.f32.xlu1 %v407_v37  ;;  %v4896_v37 = vld [vmem:[#allocation10] ss:$0 sm:$0xff] }
 0x160   :  { %432 = vadd.xlane.f32.xlu0 %v406_v38 }
 0x162   :  { %430 = vadd.xlane.f32.xlu1 %v405_v40 }
 0x164   :  { %428 = vadd.xlane.f32.xlu0 %v404_v41 }
 0x166   :  { %378 = vadd.xlane.f32.xlu1 %v4863_v42 }
 0x168   :  { %376 = vadd.xlane.f32.xlu0 %v4850_v36 }
 0x16a   :  { %374 = vadd.xlane.f32.xlu1 %v4867_v43 }
 0x16c   :  { %372 = vadd.xlane.f32.xlu0 %v4857_v39 }
 0x16e   :  { %438 = vadd.xlane.f32.xlu1 %v409_v44 }
 0x170   :  { %436 = vadd.xlane.f32.xlu0 %v408_v45 }
 0x172   :  { %442 = vadd.xlane.f32.xlu1 %v411_v46 }
 0x174   :  { %440 = vadd.xlane.f32.xlu0 %v410_v47 }
 0x1bf   :  { %v353_v48 = vpop.xlane.xlu1 %352 }
 0x1c0   :  { %v382_v50 = vmul.f32 0.010416667, %v353_v48 }
 0x1c1   :  { %v349_v49 = vpop.xlane.xlu0 %348 }
 0x1c2   :  { %v462_v54 = vmul.f32 %v382_v50, %v382_v50  ;;  %v4879_v55 = vmul.f32 0.010416667, %v349_v49  ;;  %v494_v28 = vsub.f32 %v4799_v16, %v382_v50 }
 0x1c3   :  { %v355_v51 = vpop.xlane.xlu1 %354 }
 0x1c4   :  { %v383_v52 = vmul.f32 0.010416667, %v355_v51  ;;  %v460_v62 = vmul.f32 %v4879_v55, %v4879_v55 }
 0x1c5   :  { %v417_v53 = vpop.xlane.xlu0 %416 }
 0x1c6   :  { %v446_v56 = vmul.f32 0.010416667, %v417_v53  ;;  %v463_v58 = vmul.f32 %v383_v52, %v383_v52  ;;  %v495_v48 = vsub.f32 %v4805_v18, %v383_v52 }
 0x1c7   :  { %v419_v57 = vpop.xlane.xlu1 %418 }
 0x1c8   :  { %v478_v59 = vsub.f32 %v446_v56, %v462_v54  ;;  %v447_v60 = vmul.f32 0.010416667, %v419_v57  ;;  %v4905_v54 = vld [vmem:[#allocation10 + $0x1] ss:$0 sm:$0xff] }
 0x1c9   :  { %v413_v61 = vpop.xlane.xlu0 %412 }
 0x1ca   :  { %v510_v63 = vadd.f32 1e-05, %v478_v59  ;;  %v479_v0 = vsub.f32 %v447_v60, %v463_v58  ;;  %v444_v1 = vmul.f32 0.010416667, %v413_v61  ;;  %v492_v58 = vsub.f32 %v4802_v17, %v4879_v55 }
 0x1cb   :  { %v415_v2 = vpop.xlane.xlu1 %414 }
 0x1cc   :  { %4282 = vrsqrt.f32 %v510_v63  ;;  %v511_v3 = vadd.f32 1e-05, %v479_v0  ;;  %v476_v4 = vsub.f32 %v444_v1, %v460_v62  ;;  %v445_v9 = vmul.f32 0.010416667, %v415_v2 }
 0x1cd   :  { %v351_v5 = vpop.xlane.xlu0 %350 }
 0x1ce   :  { %4284 = vrsqrt.f32 %v511_v3  ;;  %v508_v6 = vadd.f32 1e-05, %v476_v4  ;;  %v4883_v7 = vmul.f32 0.010416667, %v351_v5 }
 0x1cf   :  { %v363_v8 = vpop.xlane.xlu1 %362 }
 0x1d0   :  { %4286 = vrsqrt.f32 %v508_v6  ;;  %v461_v10 = vmul.f32 %v4883_v7, %v4883_v7  ;;  %v4887_v15 = vmul.f32 0.010416667, %v363_v8  ;;  %v493_v8 = vsub.f32 %v4810_v20, %v4883_v7 }
 0x1d1   :  { %v361_v11 = vpop.xlane.xlu0 %360 }
 0x1d2   :  { %v477_v12 = vsub.f32 %v445_v9, %v461_v10  ;;  %v4889_v21 = vmul.f32 0.010416667, %v361_v11  ;;  %v467_v30 = vmul.f32 %v4887_v15, %v4887_v15 }
 0x1d3   :  { %v359_v13 = vpop.xlane.xlu1 %358 }
 0x1d4   :  { %v509_v14 = vadd.f32 1e-05, %v477_v12  ;;  %v4891_v23 = vmul.f32 0.010416667, %v359_v13  ;;  %v466_v41 = vmul.f32 %v4889_v21, %v4889_v21 }
 0x1d5   :  { %v357_v19 = vpop.xlane.xlu0 %356 }
 0x1d6   :  { %4288 = vrsqrt.f32 %v509_v14  ;;  %v4898_v38 = vmul.f32 0.010416667, %v357_v19  ;;  %v465_v16 = vmul.f32 %v4891_v23, %v4891_v23 }
 0x1d7   :  { %v427_v24 = vpop.xlane.xlu1 %426 }
 0x1d8   :  { %v451_v31 = vmul.f32 0.010416667, %v427_v24  ;;  %v464_v59 = vmul.f32 %v4898_v38, %v4898_v38 }
 0x1d9   :  { %v4283_v33 = vpop.eup %4282  ;;  %v425_v40 = vpop.xlane.xlu0 %424 }
 0x1da   :  { %v483_v44 = vsub.f32 %v451_v31, %v467_v30  ;;  %v450_v45 = vmul.f32 0.010416667, %v425_v40  ;;  %v542_v46 = vmul.f32 %v4283_v33, %v494_v28 }
 0x1db   :  { %v4285_v47 = vpop.eup %4284  ;;  %v423_v49 = vpop.xlane.xlu1 %422 }
 0x1dc   :  { %v515_v50 = vadd.f32 1e-05, %v483_v44  ;;  %v482_v51 = vsub.f32 %v450_v45, %v466_v41  ;;  %v449_v53 = vmul.f32 0.010416667, %v423_v49  ;;  %v562_v56 = vmul.f32 %v4896_v37, %v542_v46 }
 0x1dd   :  { %v4287_v57 = vpop.eup %4286  ;;  %v421_v60 = vpop.xlane.xlu0 %420  ;;  %v543_v18 = vmul.f32 %v4285_v47, %v495_v48 }
 0x1de   :  { %4290 = vrsqrt.f32 %v515_v50  ;;  %v514_v52 = vadd.f32 1e-05, %v482_v51  ;;  %v481_v61 = vsub.f32 %v449_v53, %v465_v16  ;;  %v448_v62 = vmul.f32 0.010416667, %v421_v60 }
 0x1df   :  { %v371_v63 = vpop.xlane.xlu1 %370  ;;  %v582_v0 = vadd.f32 %v4905_v54, %v562_v56  ;;  %v563_v1 = vmul.f32 %v4896_v37, %v543_v18  ;;  %v540_v2 = vmul.f32 %v4287_v57, %v492_v58  ;;  %v499_v51 = vsub.f32 %v4823_v26, %v4887_v15 }
 0x1e0   :  { %4292 = vrsqrt.f32 %v514_v52  ;;  %v513_v3 = vadd.f32 1e-05, %v481_v61  ;;  %v480_v4 = vsub.f32 %v448_v62, %v464_v59  ;;  %v4924_v19 = vmul.f32 0.010416667, %v371_v63 }
 0x1e1   :  { %v369_v5 = vpop.xlane.xlu0 %368  ;;  %v4914_v17 = vmax.f32 %v582_v0, 0.0  ;;  %v583_v55 = vadd.f32 %v4905_v54, %v563_v1  ;;  %v560_v6 = vmul.f32 %v4896_v37, %v540_v2  ;;  %v498_v53 = vsub.f32 %v4814_v22, %v4889_v21 }
 0x1e2   :  { %4294 = vrsqrt.f32 %v513_v3  ;;  %v512_v9 = vadd.f32 1e-05, %v480_v4  ;;  %v4930_v7 = vmul.f32 0.010416667, %v369_v5  ;;  %v471_v31 = vmul.f32 %v4924_v19, %v4924_v19 }
 0x1e3   :  { %v4289_v10 = vpop.eup %4288  ;;  %617 = vadd.xlane.f32.xlu0 %v4914_v17  ;;  %v367_v11 = vpop.xlane.xlu1 %366  ;;  %v4921_v12 = vmax.f32 %v583_v55, 0.0  ;;  %v580_v13 = vadd.f32 %v4905_v54, %v560_v6  ;;  %v663_v46 = vmul.f32 %v4914_v17, %v4914_v17  ;;  %v497_v1 = vsub.f32 %v4827_v27, %v4891_v23 }
 0x1e4   :  { %v541_v14 = vmul.f32 %v4289_v10, %v493_v8  ;;  %4296 = vrsqrt.f32 %v512_v9  ;;  %v4935_v33 = vmul.f32 0.010416667, %v367_v11  ;;  %v470_v47 = vmul.f32 %v4930_v7, %v4930_v7 }
 0x1e5   :  { %619 = vadd.xlane.f32.xlu1 %v4921_v12  ;;  %v365_v24 = vpop.xlane.xlu0 %364  ;;  %v4927_v28 = vmax.f32 %v580_v13, 0.0  ;;  %v664_v22 = vmul.f32 %v4921_v12, %v4921_v12  ;;  %v496_v8 = vsub.f32 %v4820_v25, %v4898_v38 }
 0x1e6   :  { %v561_v20 = vmul.f32 %v4896_v37, %v541_v14  ;;  %v4938_v44 = vmul.f32 0.010416667, %v365_v24  ;;  %v469_v57 = vmul.f32 %v4935_v33, %v4935_v33 }
 0x1e7   :  { %613 = vadd.xlane.f32.xlu0 %v4927_v28  ;;  %v435_v30 = vpop.xlane.xlu1 %434  ;;  %v661_v26 = vmul.f32 %v4927_v28, %v4927_v28 }
 0x1e8   :  { %v455_v40 = vmul.f32 0.010416667, %v435_v30  ;;  %v581_v41 = vadd.f32 %v4905_v54, %v561_v20  ;;  %v468_v52 = vmul.f32 %v4938_v44, %v4938_v44 }
 0x1e9   :  { %v433_v45 = vpop.xlane.xlu0 %432 }
 0x1ea   :  { %v487_v48 = vsub.f32 %v455_v40, %v471_v31  ;;  %v454_v16 = vmul.f32 0.010416667, %v433_v45  ;;  %v4944_v49 = vmax.f32 %v581_v41, 0.0 }
 0x1eb   :  { %v4291_v50 = vpop.eup %4290  ;;  %681 = vadd.xlane.f32.xlu0 %v663_v46  ;;  %v431_v56 = vpop.xlane.xlu1 %430 }
 0x1ec   :  { %v519_v58 = vadd.f32 1e-05, %v487_v48  ;;  %v486_v59 = vsub.f32 %v454_v16, %v470_v47  ;;  %v453_v60 = vmul.f32 0.010416667, %v431_v56  ;;  %615 = vadd.xlane.f32.xlu1 %v4944_v49  ;;  %v547_v15 = vmul.f32 %v4291_v50, %v499_v51 }
 0x1ed   :  { %v4293_v18 = vpop.eup %4292  ;;  %v429_v61 = vpop.xlane.xlu0 %428  ;;  %v662_v27 = vmul.f32 %v4944_v49, %v4944_v49  ;;  %v503_v51 = vsub.f32 %v4843_v34, %v4924_v19 }
 0x1ee   :  { %4298 = vrsqrt.f32 %v519_v58  ;;  %v518_v21 = vadd.f32 1e-05, %v486_v59  ;;  %v485_v62 = vsub.f32 %v453_v60, %v469_v57  ;;  %v452_v63 = vmul.f32 0.010416667, %v429_v61 }
 0x1ef   :  { %v4295_v0 = vpop.eup %4294  ;;  %677 = vadd.xlane.f32.xlu0 %v661_v26  ;;  %v379_v2 = vpop.xlane.xlu1 %378  ;;  %v546_v3 = vmul.f32 %v4293_v18, %v498_v53  ;;  %v567_v4 = vmul.f32 %v4896_v37, %v547_v15  ;;  %v502_v26 = vsub.f32 %v4833_v29, %v4930_v7 }
 0x1f0   :  { %4300 = vrsqrt.f32 %v518_v21  ;;  %v517_v5 = vadd.f32 1e-05, %v485_v62  ;;  %v484_v55 = vsub.f32 %v452_v63, %v468_v52  ;;  %683 = vadd.xlane.f32.xlu1 %v664_v22  ;;  %v545_v11 = vmul.f32 %v4295_v0, %v497_v1 }
 0x1f1   :  { %v4297_v6 = vpop.eup %4296  ;;  %v377_v9 = vpop.xlane.xlu0 %376  ;;  %v566_v10 = vmul.f32 %v4896_v37, %v546_v3  ;;  %v587_v23 = vadd.f32 %v4905_v54, %v567_v4  ;;  %v4987_v53 = vmul.f32 0.010416667, %v379_v2  ;;  %v501_v0 = vsub.f32 %v4847_v35, %v4935_v33 }
 0x1f2   :  { %4302 = vrsqrt.f32 %v517_v5  ;;  %v516_v13 = vadd.f32 1e-05, %v484_v55  ;;  %v544_v20 = vmul.f32 %v4297_v6, %v496_v8  ;;  %v565_v25 = vmul.f32 %v4896_v37, %v545_v11  ;;  %v4226_v55 = vld [vmem:[#allocation7 + $0x38] sm:$0xff]  }
 0x1f3   :  { %v375_v14 = vpop.xlane.xlu1 %374  ;;  %v586_v24 = vadd.f32 %v4905_v54, %v566_v10  ;;  %v4977_v45 = vmax.f32 %v587_v23, 0.0  ;;  %v4989_v56 = vmul.f32 0.010416667, %v377_v9  ;;  %v475_v34 = vmul.f32 %v4987_v53, %v4987_v53  ;;  %3974 = vmatprep.subr.bf16.mxu1 %v4226_v55 }
 0x1f4   :  { %4304 = vrsqrt.f32 %v516_v13  ;;  %v4969_v30 = vmul.f32 0.010416667, %v375_v14  ;;  %679 = vadd.xlane.f32.xlu1 %v662_v27  ;;  %v564_v40 = vmul.f32 %v4896_v37, %v544_v20  ;;  %v585_v46 = vadd.f32 %v4905_v54, %v565_v25  ;;  %3975 = vmatpush3.bf16.msra.mxu1 %v4226_v55  ;;  %v4227_v25 = vld [vmem:[#allocation7 + $0x30] sm:$0xff]  }
 0x1f5   :  { %v373_v38 = vpop.xlane.xlu0 %372  ;;  %v4972_v31 = vmax.f32 %v586_v24, 0.0  ;;  %v474_v1 = vmul.f32 %v4989_v56, %v4989_v56  ;;  %v668_v2 = vmul.f32 %v4977_v45, %v4977_v45  ;;  %v500_v8 = vsub.f32 %v4839_v32, %v4938_v44  ;;  %3976 = vmatprep.subr.bf16.mxu1 %v4227_v25 }
 0x1f6   :  { %v4975_v41 = vmul.f32 0.010416667, %v373_v38  ;;  %v584_v48 = vadd.f32 %v4905_v54, %v564_v40  ;;  %v473_v16 = vmul.f32 %v4969_v30, %v4969_v30  ;;  %v4995_v52 = vmax.f32 %v585_v46, 0.0 }
 0x1f7   :  { %625 = vadd.xlane.f32.xlu0 %v4972_v31  ;;  %v439_v47 = vpop.xlane.xlu1 %438  ;;  %v667_v7 = vmul.f32 %v4972_v31, %v4972_v31 }
 0x1f8   :  { %v457_v50 = vmul.f32 0.010416667, %v439_v47  ;;  %627 = vadd.xlane.f32.xlu1 %v4977_v45  ;;  %v4991_v58 = vmax.f32 %v584_v48, 0.0  ;;  %v472_v59 = vmul.f32 %v4975_v41, %v4975_v41  ;;  %v666_v23 = vmul.f32 %v4995_v52, %v4995_v52  ;;  %3977 = vmatpush3.bf16.msra.mxu1 %v4227_v25 }
 0x1f9   :  { %v437_v57 = vpop.xlane.xlu0 %436 }
 0x1fa   :  { %v489_v60 = vsub.f32 %v457_v50, %v473_v16  ;;  %v456_v18 = vmul.f32 0.010416667, %v437_v57  ;;  %v665_v27 = vmul.f32 %v4991_v58, %v4991_v58  ;;  %v4228_v50 = vld [vmem:[#allocation7 + $0x28] sm:$0xff]  }
 0x1fb   :  { %v4299_v61 = vpop.eup %4298  ;;  %621 = vadd.xlane.f32.xlu0 %v4991_v58  ;;  %v443_v19 = vpop.xlane.xlu1 %442  ;;  %3978 = vmatprep.subr.bf16.mxu1 %v4228_v50 }
 0x1fc   :  { %v521_v22 = vadd.f32 1e-05, %v489_v60  ;;  %v488_v15 = vsub.f32 %v456_v18, %v472_v59  ;;  %v459_v21 = vmul.f32 0.010416667, %v443_v19  ;;  %623 = vadd.xlane.f32.xlu1 %v4995_v52  ;;  %v551_v62 = vmul.f32 %v4299_v61, %v503_v51  ;;  %3979 = vmatpush3.bf16.msra.mxu1 %v4228_v50  ;;  %v4229_v59 = vld [vmem:[#allocation7 + $0x20] sm:$0xff]  }
 0x1fd   :  { %v4301_v63 = vpop.eup %4300  ;;  %v441_v29 = vpop.xlane.xlu0 %440  ;;  %v505_v18 = vsub.f32 %v4867_v43, %v4969_v30  ;;  %3980 = vmatprep.subr.bf16.mxu1 %v4229_v59  ;;  %v504_v19 = vsub.f32 %v4857_v39, %v4975_v41  ;;  %v506_v30 = vsub.f32 %v4850_v36, %v4989_v56 }
 0x1fe   :  { %4306 = vrsqrt.f32 %v521_v22  ;;  %v520_v3 = vadd.f32 1e-05, %v488_v15  ;;  %v491_v4 = vsub.f32 %v459_v21, %v475_v34  ;;  %v458_v5 = vmul.f32 0.010416667, %v441_v29  ;;  %v4230_v21 = vld [vmem:[#allocation7 + $0x18] sm:$0xff]   ;;  %v4231_v29 = vld [vmem:[#allocation7 + $0x10] sm:$0xff]  }
 0x1ff   :  { %v4303_v6 = vpop.eup %4302  ;;  %689 = vadd.xlane.f32.xlu0 %v667_v7  ;;  %v550_v35 = vmul.f32 %v4301_v63, %v502_v26  ;;  %v571_v33 = vmul.f32 %v4896_v37, %v551_v62  ;;  %v507_v34 = vsub.f32 %v4863_v42, %v4987_v53 }
 0x200   :  { %4308 = vrsqrt.f32 %v520_v3  ;;  %v523_v9 = vadd.f32 1e-05, %v491_v4  ;;  %v490_v10 = vsub.f32 %v458_v5, %v474_v1  ;;  %691 = vadd.xlane.f32.xlu1 %v668_v2  ;;  %v549_v11 = vmul.f32 %v4303_v6, %v501_v0  ;;  %3981 = vmatpush3.bf16.msra.mxu1 %v4229_v59  ;;  %v4232_v5 = vld [vmem:[#allocation7 + $0x8] sm:$0xff]  }
 0x201   :  { %v4305_v13 = vpop.eup %4304  ;;  %v570_v14 = vmul.f32 %v4896_v37, %v550_v35  ;;  %v591_v32 = vadd.f32 %v4905_v54, %v571_v33  ;;  %3982 = vmatprep.subr.bf16.mxu1 %v4230_v21 }
 0x202   :  { %4310 = vrsqrt.f32 %v523_v9  ;;  %v522_v44 = vadd.f32 1e-05, %v490_v10  ;;  %v548_v24 = vmul.f32 %v4305_v13, %v500_v8  ;;  %v569_v20 = vmul.f32 %v4896_v37, %v549_v11  ;;  %v4233_v8 = vld [vmem:[#allocation7] sm:$0xff]  }
 0x203   :  { %685 = vadd.xlane.f32.xlu0 %v665_v27  ;;  %v590_v38 = vadd.f32 %v4905_v54, %v570_v14  ;;  %v5025_v47 = vmax.f32 %v591_v32, 0.0 }
 0x204   :  { %4312 = vrsqrt.f32 %v522_v44  ;;  %687 = vadd.xlane.f32.xlu1 %v666_v23  ;;  %v568_v40 = vmul.f32 %v4896_v37, %v548_v24  ;;  %v589_v16 = vadd.f32 %v4905_v54, %v569_v20  ;;  %3983 = vmatpush3.bf16.msra.mxu1 %v4230_v21 }
 0x205   :  { %v5023_v46 = vmax.f32 %v590_v38, 0.0  ;;  %v672_v22 = vmul.f32 %v5025_v47, %v5025_v47  ;;  %3984 = vmatprep.subr.bf16.mxu1 %v4231_v29 }
 0x206   :  { %v588_v48 = vadd.f32 %v4905_v54, %v568_v40  ;;  %v5033_v57 = vmax.f32 %v589_v16, 0.0 }
 0x207   :  { %633 = vadd.xlane.f32.xlu0 %v5023_v46  ;;  %v671_v26 = vmul.f32 %v5023_v46, %v5023_v46 }
 0x208   :  { %635 = vadd.xlane.f32.xlu1 %v5025_v47  ;;  %v5031_v51 = vmax.f32 %v588_v48, 0.0  ;;  %v670_v39 = vmul.f32 %v5033_v57, %v5033_v57  ;;  %3985 = vmatpush3.bf16.msra.mxu1 %v4231_v29 }
 0x209   :  { %3986 = vmatprep.subr.bf16.mxu1 %v4232_v5 }
 0x20a   :  { %v669_v42 = vmul.f32 %v5031_v51, %v5031_v51 }
 0x20b   :  { %v4307_v60 = vpop.eup %4306  ;;  %629 = vadd.xlane.f32.xlu0 %v5031_v51 }
 0x20c   :  { %631 = vadd.xlane.f32.xlu1 %v5033_v57  ;;  %v553_v15 = vmul.f32 %v4307_v60, %v505_v18  ;;  %3987 = vmatpush3.bf16.msra.mxu1 %v4232_v5 }
 0x20d   :  { %v4309_v61 = vpop.eup %4308  ;;  %3988 = vmatprep.subr.bf16.mxu1 %v4233_v8 }
 0x20e   :  { %v552_v63 = vmul.f32 %v4309_v61, %v504_v19  ;;  %v573_v1 = vmul.f32 %v4896_v37, %v553_v15 }
 0x20f   :  { %v4311_v43 = vpop.eup %4310  ;;  %697 = vadd.xlane.f32.xlu0 %v671_v26 }
 0x210   :  { %699 = vadd.xlane.f32.xlu1 %v672_v22  ;;  %v555_v62 = vmul.f32 %v4311_v43, %v507_v34  ;;  %v572_v7 = vmul.f32 %v4896_v37, %v552_v63  ;;  %v593_v4 = vadd.f32 %v4905_v54, %v573_v1  ;;  %3989 = vmatpush3.bf16.msra.mxu1 %v4233_v8 }
 0x211   :  { %v4313_v0 = vpop.eup %4312 }
 0x212   :  { %v575_v41 = vmul.f32 %v4896_v37, %v555_v62  ;;  %v554_v53 = vmul.f32 %v4313_v0, %v506_v30  ;;  %v592_v6 = vadd.f32 %v4905_v54, %v572_v7  ;;  %v821_v30 = vlaneseq }
 0x213   :  { %693 = vadd.xlane.f32.xlu0 %v669_v42 }
 0x214   :  { %695 = vadd.xlane.f32.xlu1 %v670_v39  ;;  %v595_v36 = vadd.f32 %v4905_v54, %v575_v41  ;;  %v574_v56 = vmul.f32 %v4896_v37, %v554_v53  ;;  %v5067_v37 = vmax.f32 %v593_v4, 0.0  ;;  %v5070_v35 = vmax.f32 %v592_v6, 0.0 }
 0x215   :  { %v5089_v39 = vshrl.u32 %v821_v30, 7 }
 0x216   :  { %v5058_v2 = vmax.f32 %v595_v36, 0.0  ;;  %v594_v3 = vadd.f32 %v4905_v54, %v574_v56  ;;  %v674_v33 = vmul.f32 %v5067_v37, %v5067_v37  ;;  %v673_v54 = vmul.f32 %v5070_v35, %v5070_v35 }
 0x217   :  { %v5096_v36 = vsub.s32 0, %v5089_v39  ;;  %v5101_v4 = vsub.s32 1, %v5089_v39 }
 0x218   :  { %643 = vadd.xlane.f32.xlu1 %v5058_v2  ;;  %v5063_v55 = vmax.f32 %v594_v3, 0.0  ;;  %v676_v9 = vmul.f32 %v5058_v2, %v5058_v2  ;;  %v5098_v3 = vld [vmem:[#allocation11] sm:$0xff] }
 0x21a   :  { %641 = vadd.xlane.f32.xlu0 %v5063_v55  ;;  %v675_v10 = vmul.f32 %v5063_v55, %v5063_v55 }
 0x21c   :  { %639 = vadd.xlane.f32.xlu1 %v5067_v37 }
 0x21e   :  { %637 = vadd.xlane.f32.xlu0 %v5070_v35 }
 0x220   :  { %703 = vadd.xlane.f32.xlu1 %v674_v33 }
 0x222   :  { %701 = vadd.xlane.f32.xlu0 %v673_v54 }
 0x224   :  { %707 = vadd.xlane.f32.xlu1 %v676_v9 }
 0x226   :  { %705 = vadd.xlane.f32.xlu0 %v675_v10 }
 0x26c   :  { %v618_v11 = vpop.xlane.xlu0 %617 }
 0x26d   :  { %v647_v27 = vmul.f32 0.010416667, %v618_v11 }
 0x26e   :  { %v620_v23 = vpop.xlane.xlu1 %619 }
 0x26f   :  { %v727_v32 = vmul.f32 %v647_v27, %v647_v27  ;;  %v5081_v25 = vmul.f32 0.010416667, %v620_v23  ;;  %v759_v5 = vsub.f32 %v4914_v17, %v647_v27 }
 0x270   :  { %v614_v13 = vpop.xlane.xlu0 %613 }
 0x271   :  { %v645_v44 = vmul.f32 0.010416667, %v614_v13  ;;  %v728_v60 = vmul.f32 %v5081_v25, %v5081_v25 }
 0x273   :  { %v725_v48 = vmul.f32 %v645_v44, %v645_v44  ;;  %v757_v13 = vsub.f32 %v4927_v28, %v645_v44 }
 0x274   :  { %v682_v14 = vpop.xlane.xlu0 %681 }
 0x275   :  { %v711_v24 = vmul.f32 0.010416667, %v682_v14  ;;  %v616_v20 = vpop.xlane.xlu1 %615  ;;  %v5115_v14 = vrot.slane %v5098_v3, %v5096_v36 }
 0x276   :  { %v5085_v18 = vmul.f32 0.010416667, %v616_v20 }
 0x277   :  { %v743_v38 = vsub.f32 %v711_v24, %v727_v32  ;;  %v760_v24 = vsub.f32 %v4921_v12, %v5081_v25 }
 0x278   :  { %v678_v40 = vpop.xlane.xlu0 %677  ;;  %v726_v15 = vmul.f32 %v5085_v18, %v5085_v18 }
 0x279   :  { %v775_v16 = vadd.f32 1e-05, %v743_v38  ;;  %v709_v50 = vmul.f32 0.010416667, %v678_v40  ;;  %v684_v59 = vpop.xlane.xlu1 %683  ;;  %v5121_v40 = vrot.slane %v5098_v3, %v5101_v4 }
 0x27a   :  { %v712_v61 = vmul.f32 0.010416667, %v684_v59 }
 0x27b   :  { %4314 = vrsqrt.f32 %v775_v16  ;;  %v741_v26 = vsub.f32 %v709_v50, %v725_v48 }
 0x27c   :  { %v744_v34 = vsub.f32 %v712_v61, %v728_v60 }
 0x27d   :  { %v773_v19 = vadd.f32 1e-05, %v741_v26  ;;  %v680_v22 = vpop.xlane.xlu1 %679 }
 0x27e   :  { %v776_v21 = vadd.f32 1e-05, %v744_v34  ;;  %v710_v43 = vmul.f32 0.010416667, %v680_v22 }
 0x27f   :  { %4316 = vrsqrt.f32 %v773_v19  ;;  %v758_v19 = vsub.f32 %v4944_v49, %v5085_v18 }
 0x280   :  { %4318 = vrsqrt.f32 %v776_v21  ;;  %v742_v62 = vsub.f32 %v710_v43, %v726_v15  ;;  %v626_v63 = vpop.xlane.xlu0 %625 }
 0x281   :  { %v628_v0 = vpop.xlane.xlu1 %627  ;;  %v5091_v53 = vmul.f32 0.010416667, %v626_v63 }
 0x282   :  { %v774_v42 = vadd.f32 1e-05, %v742_v62  ;;  %v5093_v29 = vmul.f32 0.010416667, %v628_v0 }
 0x283   :  { %v731_v6 = vmul.f32 %v5091_v53, %v5091_v53 }
 0x284   :  { %4320 = vrsqrt.f32 %v774_v42  ;;  %v622_v41 = vpop.xlane.xlu0 %621  ;;  %v732_v9 = vmul.f32 %v5093_v29, %v5093_v29 }
 0x285   :  { %v624_v1 = vpop.xlane.xlu1 %623  ;;  %v5106_v8 = vmul.f32 0.010416667, %v622_v41 }
 0x286   :  { %v5110_v10 = vmul.f32 0.010416667, %v624_v1 }
 0x287   :  { %v729_v44 = vmul.f32 %v5106_v8, %v5106_v8 }
 0x288   :  { %v4315_v56 = vpop.eup %4314  ;;  %v690_v7 = vpop.xlane.xlu0 %689  ;;  %v730_v61 = vmul.f32 %v5110_v10, %v5110_v10 }
 0x289   :  { %v715_v33 = vmul.f32 0.010416667, %v690_v7  ;;  %v692_v54 = vpop.xlane.xlu1 %691  ;;  %v807_v27 = vmul.f32 %v4315_v56, %v759_v5 }
 0x28a   :  { %v716_v11 = vmul.f32 0.010416667, %v692_v54 }
 0x28b   :  { %v747_v23 = vsub.f32 %v715_v33, %v731_v6  ;;  %v827_v15 = vmul.f32 %v5115_v14, %v807_v27 }
 0x28c   :  { %v4317_v32 = vpop.eup %4316  ;;  %v748_v20 = vsub.f32 %v716_v11, %v732_v9  ;;  %v686_v38 = vpop.xlane.xlu0 %685 }
 0x28d   :  { %v4319_v48 = vpop.eup %4318  ;;  %v779_v16 = vadd.f32 1e-05, %v747_v23  ;;  %v713_v50 = vmul.f32 0.010416667, %v686_v38  ;;  %v688_v59 = vpop.xlane.xlu1 %687  ;;  %v805_v60 = vmul.f32 %v4317_v32, %v757_v13  ;;  %v847_v6 = vadd.f32 %v5121_v40, %v827_v15 }
 0x28e   :  { %v780_v26 = vadd.f32 1e-05, %v748_v20  ;;  %v714_v34 = vmul.f32 0.010416667, %v688_v59  ;;  %v808_v25 = vmul.f32 %v4319_v48, %v760_v24 }
 0x28f   :  { %4322 = vrsqrt.f32 %v779_v16  ;;  %v745_v22 = vsub.f32 %v713_v50, %v729_v44  ;;  %v825_v30 = vmul.f32 %v5115_v14, %v805_v60  ;;  %v863_v24 = vmax.f32 %v847_v6, 0.0 }
 0x290   :  { %4324 = vrsqrt.f32 %v780_v26  ;;  %v746_v21 = vsub.f32 %v714_v34, %v730_v61  ;;  %v634_v43 = vpop.xlane.xlu0 %633  ;;  %v828_v62 = vmul.f32 %v5115_v14, %v808_v25  ;;  %v763_v25 = vsub.f32 %v4972_v31, %v5091_v53 }
 0x291   :  { %v4321_v63 = vpop.eup %4320  ;;  %v777_v0 = vadd.f32 1e-05, %v745_v22  ;;  %v636_v42 = vpop.xlane.xlu1 %635  ;;  %v845_v5 = vadd.f32 %v5121_v40, %v825_v30  ;;  %v5136_v33 = vmul.f32 0.010416667, %v634_v43 }
 0x292   :  { %v778_v41 = vadd.f32 1e-05, %v746_v21  ;;  %v806_v1 = vmul.f32 %v4321_v63, %v758_v19  ;;  %v848_v56 = vadd.f32 %v5121_v40, %v828_v62  ;;  %v5138_v9 = vmul.f32 0.010416667, %v636_v42 }
 0x293   :  { %4326 = vrsqrt.f32 %v777_v0  ;;  %v861_v27 = vmax.f32 %v845_v5, 0.0  ;;  %v735_v20 = vmul.f32 %v5136_v33, %v5136_v33  ;;  %v764_v19 = vsub.f32 %v4977_v45, %v5093_v29 }
 0x294   :  { %4328 = vrsqrt.f32 %v778_v41  ;;  %v630_v18 = vpop.xlane.xlu0 %629  ;;  %v826_v7 = vmul.f32 %v5115_v14, %v806_v1  ;;  %v864_v13 = vmax.f32 %v848_v56, 0.0  ;;  %v736_v50 = vmul.f32 %v5138_v9, %v5138_v9 }
 0x295   :  { %v632_v54 = vpop.xlane.xlu1 %631  ;;  %v5143_v38 = vmul.f32 0.010416667, %v630_v18  ;;  %v761_v29 = vsub.f32 %v4991_v58, %v5106_v8 }
 0x296   :  { %v846_v11 = vadd.f32 %v5121_v40, %v826_v7  ;;  %v5145_v48 = vmul.f32 0.010416667, %v632_v54  ;;  %v878_v26 = vpack.c.bf16 %v864_v13, %v863_v24  ;;  %v762_v7 = vsub.f32 %v4995_v52, %v5110_v10 }
 0x297   :  { %v733_v43 = vmul.f32 %v5143_v38, %v5143_v38 }
 0x298   :  { %v698_v23 = vpop.xlane.xlu0 %697  ;;  %v862_v32 = vmax.f32 %v846_v11, 0.0  ;;  %v734_v30 = vmul.f32 %v5145_v48, %v5145_v48 }
 0x299   :  { %v719_v44 = vmul.f32 0.010416667, %v698_v23  ;;  %v700_v16 = vpop.xlane.xlu1 %699 }
 0x29a   :  { %v720_v59 = vmul.f32 0.010416667, %v700_v16  ;;  %v877_v60 = vpack.c.bf16 %v862_v32, %v861_v27 }
 0x29b   :  { %v751_v61 = vsub.f32 %v719_v44, %v735_v20 }
 0x29c   :  { %v4323_v34 = vpop.eup %4322  ;;  %v752_v22 = vsub.f32 %v720_v59, %v736_v50  ;;  %v694_v15 = vpop.xlane.xlu0 %693  ;;  %3990 = vmatprep.mubr.bf16.mxu1 %v877_v60 }
 0x29d   :  { %v4325_v21 = vpop.eup %4324  ;;  %v783_v62 = vadd.f32 1e-05, %v751_v61  ;;  %v717_v63 = vmul.f32 0.010416667, %v694_v15  ;;  %3991 = vmatmul.mubr.bf16.vlgmr.msra.gmra.mxu1 %v878_v26  ;;  %v696_v0 = vpop.xlane.xlu1 %695  ;;  %v811_v53 = vmul.f32 %v4323_v34, %v763_v25 }
 0x29e   :  { %v784_v42 = vadd.f32 1e-05, %v752_v22  ;;  %v718_v41 = vmul.f32 0.010416667, %v696_v0  ;;  %v812_v1 = vmul.f32 %v4325_v21, %v764_v19  ;;  %v768_v0 = vsub.f32 %v5025_v47, %v5138_v9 }
 0x29f   :  { %4330 = vrsqrt.f32 %v783_v62  ;;  %v749_v56 = vsub.f32 %v717_v63, %v733_v43  ;;  %v831_v24 = vmul.f32 %v5115_v14, %v811_v53  ;;  %v767_v63 = vsub.f32 %v5023_v46, %v5136_v33 }
 0x2a0   :  { %v4327_v18 = vpop.eup %4326  ;;  %4332 = vrsqrt.f32 %v784_v42  ;;  %v750_v5 = vsub.f32 %v718_v41, %v734_v30  ;;  %v832_v6 = vmul.f32 %v5115_v14, %v812_v1 }
 0x2a1   :  { %v4329_v54 = vpop.eup %4328  ;;  %v781_v11 = vadd.f32 1e-05, %v749_v56  ;;  %v644_v13 = vpop.xlane.xlu1 %643  ;;  %v809_v23 = vmul.f32 %v4327_v18, %v761_v29  ;;  %v851_v60 = vadd.f32 %v5121_v40, %v831_v24 }
 0x2a2   :  { %v782_v27 = vadd.f32 1e-05, %v750_v5  ;;  %v810_v32 = vmul.f32 %v4329_v54, %v762_v7  ;;  %v852_v44 = vadd.f32 %v5121_v40, %v832_v6  ;;  %v5173_v19 = vmul.f32 0.010416667, %v644_v13 }
 0x2a3   :  { %4334 = vrsqrt.f32 %v781_v11  ;;  %v642_v8 = vpop.xlane.xlu0 %641  ;;  %v829_v20 = vmul.f32 %v5115_v14, %v809_v23  ;;  %v867_v62 = vmax.f32 %v851_v60, 0.0 }
 0x2a4   :  { %4336 = vrsqrt.f32 %v782_v27  ;;  %v830_v16 = vmul.f32 %v5115_v14, %v810_v32  ;;  %v868_v25 = vmax.f32 %v852_v44, 0.0  ;;  %v5181_v42 = vmul.f32 0.010416667, %v642_v8 }
 0x2a5   :  { %v640_v10 = vpop.xlane.xlu1 %639  ;;  %v849_v50 = vadd.f32 %v5121_v40, %v829_v20  ;;  %v740_v6 = vmul.f32 %v5173_v19, %v5173_v19  ;;  %v765_v27 = vsub.f32 %v5031_v51, %v5143_v38  ;;  %v766_v32 = vsub.f32 %v5033_v57, %v5145_v48 }
 0x2a6   :  { %v5167_v59 = vmul.f32 0.010416667, %v640_v10  ;;  %v850_v26 = vadd.f32 %v5121_v40, %v830_v16  ;;  %v880_v7 = vpack.c.bf16 %v868_v25, %v867_v62  ;;  %v739_v24 = vmul.f32 %v5181_v42, %v5181_v42 }
 0x2a7   :  { %v638_v61 = vpop.xlane.xlu0 %637  ;;  %v865_v15 = vmax.f32 %v849_v50, 0.0 }
 0x2a8   :  { %v5171_v34 = vmul.f32 0.010416667, %v638_v61  ;;  %v866_v21 = vmax.f32 %v850_v26, 0.0  ;;  %v738_v43 = vmul.f32 %v5167_v59, %v5167_v59 }
 0x2a9   :  { %v704_v22 = vpop.xlane.xlu1 %703 }
 0x2aa   :  { %v722_v30 = vmul.f32 0.010416667, %v704_v22  ;;  %v879_v53 = vpack.c.bf16 %v866_v21, %v865_v15  ;;  %v737_v29 = vmul.f32 %v5171_v34, %v5171_v34 }
 0x2ab   :  { %v702_v41 = vpop.xlane.xlu0 %701 }
 0x2ac   :  { %v4331_v1 = vpop.eup %4330  ;;  %v754_v56 = vsub.f32 %v722_v30, %v738_v43  ;;  %v721_v18 = vmul.f32 0.010416667, %v702_v41  ;;  %3994 = vmatprep.mubr.bf16.mxu1 %v879_v53 }
 0x2ad   :  { %v4333_v5 = vpop.eup %4332  ;;  %v708_v33 = vpop.xlane.xlu1 %707  ;;  %v815_v54 = vmul.f32 %v4331_v1, %v767_v63  ;;  %3995 = vmatmul.mubr.bf16.gmra.mxu1 %v880_v7 }
 0x2ae   :  { %v786_v11 = vadd.f32 1e-05, %v754_v56  ;;  %v753_v9 = vsub.f32 %v721_v18, %v737_v29  ;;  %v724_v13 = vmul.f32 0.010416667, %v708_v33  ;;  %v816_v23 = vmul.f32 %v4333_v5, %v768_v0 }
 0x2af   :  { %v706_v8 = vpop.xlane.xlu0 %705  ;;  %v835_v61 = vmul.f32 %v5115_v14, %v815_v54  ;;  %v770_v18 = vsub.f32 %v5067_v37, %v5167_v59  ;;  %v769_v5 = vsub.f32 %v5070_v35, %v5171_v34  ;;  %v772_v54 = vsub.f32 %v5058_v2, %v5173_v19 }
 0x2b0   :  { %v4335_v20 = vpop.eup %4334  ;;  %4338 = vrsqrt.f32 %v786_v11  ;;  %v785_v44 = vadd.f32 1e-05, %v753_v9  ;;  %v756_v10 = vsub.f32 %v724_v13, %v740_v6  ;;  %v723_v16 = vmul.f32 0.010416667, %v706_v8 }
 0x2b1   :  { %v4337_v50 = vpop.eup %4336  ;;  %v813_v60 = vmul.f32 %v4335_v20, %v765_v27  ;;  %v836_v26 = vmul.f32 %v5115_v14, %v816_v23  ;;  %v855_v62 = vadd.f32 %v5121_v40, %v835_v61  ;;  %v771_v23 = vsub.f32 %v5063_v55, %v5181_v42 }
 0x2b2   :  { %4340 = vrsqrt.f32 %v785_v44  ;;  %v788_v38 = vadd.f32 1e-05, %v756_v10  ;;  %v755_v25 = vsub.f32 %v723_v16, %v739_v24  ;;  %v814_v22 = vmul.f32 %v4337_v50, %v766_v32 }
 0x2b3   :  { %v833_v48 = vmul.f32 %v5115_v14, %v813_v60  ;;  %v856_v15 = vadd.f32 %v5121_v40, %v836_v26  ;;  %v871_v1 = vmax.f32 %v855_v62, 0.0 }
 0x2b4   :  { %4342 = vrsqrt.f32 %v788_v38  ;;  %v787_v21 = vadd.f32 1e-05, %v755_v25  ;;  %v834_v43 = vmul.f32 %v5115_v14, %v814_v22 }
 0x2b5   :  { %v853_v30 = vadd.f32 %v5121_v40, %v833_v48  ;;  %v872_v0 = vmax.f32 %v856_v15, 0.0 }
 0x2b6   :  { %4344 = vrsqrt.f32 %v787_v21  ;;  %v854_v63 = vadd.f32 %v5121_v40, %v834_v43 }
 0x2b7   :  { %v869_v41 = vmax.f32 %v853_v30, 0.0  ;;  %v882_v56 = vpack.c.bf16 %v872_v0, %v871_v1 }
 0x2b8   :  { %v870_v53 = vmax.f32 %v854_v63, 0.0 }
 0x2ba   :  { %v881_v29 = vpack.c.bf16 %v870_v53, %v869_v41  ;;  %v4234_v41 = vld [vmem:[#allocation8 + $0x38] sm:$0xff]  }
 0x2bb   :  { %4006 = vmatprep.subr.bf16.mxu0 %v4234_v41 }
 0x2bc   :  { %3998 = vmatprep.mubr.bf16.mxu1 %v881_v29  ;;  %4007 = vmatpush3.bf16.msra.mxu0 %v4234_v41  ;;  %v4235_v29 = vld [vmem:[#allocation8 + $0x30] sm:$0xff]  }
 0x2bd   :  { %v4339_v7 = vpop.eup %4338  ;;  %3999 = vmatmul.mubr.bf16.gmra.mxu1 %v882_v56  ;;  %4008 = vmatprep.subr.bf16.mxu0 %v4235_v29 }
 0x2be   :  { %v818_v6 = vmul.f32 %v4339_v7, %v770_v18 }
 0x2bf   :  { %v4341_v33 = vpop.eup %4340 }
 0x2c0   :  { %v817_v11 = vmul.f32 %v4341_v33, %v769_v5  ;;  %v838_v9 = vmul.f32 %v5115_v14, %v818_v6  ;;  %v4236_v5 = vld [vmem:[#allocation8 + $0x28] sm:$0xff]   ;;  %4009 = vmatpush3.bf16.msra.mxu0 %v4235_v29  ;;  %v4237_v33 = vld [vmem:[#allocation8 + $0x20] sm:$0xff]  }
 0x2c1   :  { %v4343_v13 = vpop.eup %4342  ;;  %4010 = vmatprep.subr.bf16.mxu0 %v4236_v5 }
 0x2c2   :  { %v837_v59 = vmul.f32 %v5115_v14, %v817_v11  ;;  %v858_v27 = vadd.f32 %v5121_v40, %v838_v9  ;;  %v820_v32 = vmul.f32 %v4343_v13, %v772_v54  ;;  %v4238_v9 = vld [vmem:[#allocation8 + $0x18] sm:$0xff]  }
 0x2c3   :  { %v4345_v24 = vpop.eup %4344 }
 0x2c4   :  { %v857_v34 = vadd.f32 %v5121_v40, %v837_v59  ;;  %v819_v8 = vmul.f32 %v4345_v24, %v771_v23  ;;  %v840_v20 = vmul.f32 %v5115_v14, %v820_v32  ;;  %v874_v19 = vmax.f32 %v858_v27, 0.0  ;;  %4011 = vmatpush3.bf16.msra.mxu0 %v4236_v5  ;;  %v4239_v59 = vld [vmem:[#allocation8 + $0x10] sm:$0xff]  }
 0x2c5   :  { %4012 = vmatprep.subr.bf16.mxu0 %v4237_v33 }
 0x2c6   :  { %v873_v44 = vmax.f32 %v857_v34, 0.0  ;;  %v839_v10 = vmul.f32 %v5115_v14, %v819_v8  ;;  %v860_v16 = vadd.f32 %v5121_v40, %v840_v20  ;;  %v4240_v34 = vld [vmem:[#allocation8 + $0x8] sm:$0xff]   ;;  %v4241_v20 = vld [vmem:[#allocation8] sm:$0xff]  }
 0x2c8   :  { %v883_v50 = vpack.c.bf16 %v874_v19, %v873_v44  ;;  %v859_v42 = vadd.f32 %v5121_v40, %v839_v10  ;;  %v876_v61 = vmax.f32 %v860_v16, 0.0  ;;  %4013 = vmatpush3.bf16.msra.mxu0 %v4237_v33 }
 0x2c9   :  { %4014 = vmatprep.subr.bf16.mxu0 %v4238_v9 }
 0x2ca   :  { %4002 = vmatprep.mubr.bf16.mxu1 %v883_v50  ;;  %v875_v60 = vmax.f32 %v859_v42, 0.0 }
 0x2cc   :  { %v884_v26 = vpack.c.bf16 %v876_v61, %v875_v60  ;;  %4015 = vmatpush3.bf16.msra.mxu0 %v4238_v9 }
 0x2cd   :  { %4016 = vmatprep.subr.bf16.mxu0 %v4239_v59 }
 0x2ce   :  { %4003 = vmatmul.mubr.bf16.gmra.mxu1 %v884_v26 }
 0x2d0   :  { %4017 = vmatpush3.bf16.msra.mxu0 %v4239_v59 }
 0x2d1   :  { %4018 = vmatprep.subr.bf16.mxu0 %v4240_v34 }
 0x2d4   :  { %4019 = vmatpush3.bf16.msra.mxu0 %v4240_v34 }
 0x2d5   :  { %4020 = vmatprep.subr.bf16.mxu0 %v4241_v20 }
 0x2d8   :  { %4021 = vmatpush3.bf16.msra.mxu0 %v4241_v20 }
 0x35d   :  { %v5217_v38 = vpop.f32.mrf.mxu1 }
 0x35e   :  { %1050 = vadd.xlane.f32.xlu0 %v5217_v38  ;;  %v1096_v14 = vmul.f32 %v5217_v38, %v5217_v38 }
 0x35f   :  { %v5220_v25 = vpop.f32.mrf.mxu1 }
 0x360   :  { %v1094_v48 = vmul.f32 %v5220_v25, %v5220_v25 }
 0x361   :  { %v5222_v22 = vpop.f32.mrf.mxu1 }
 0x362   :  { %1046 = vadd.xlane.f32.xlu0 %v5220_v25  ;;  %1052 = vadd.xlane.f32.xlu1 %v5222_v22  ;;  %v1097_v15 = vmul.f32 %v5222_v22, %v5222_v22 }
 0x363   :  { %v5228_v40 = vpop.f32.mrf.mxu1 }
 0x364   :  { %v1095_v21 = vmul.f32 %v5228_v40, %v5228_v40 }
 0x366   :  { %1114 = vadd.xlane.f32.xlu0 %v1096_v14  ;;  %1048 = vadd.xlane.f32.xlu1 %v5228_v40 }
 0x36a   :  { %1110 = vadd.xlane.f32.xlu0 %v1094_v48  ;;  %1116 = vadd.xlane.f32.xlu1 %v1097_v15 }
 0x36d   :  { %v5237_v43 = vpop.f32.mrf.mxu1 }
 0x36e   :  { %1112 = vadd.xlane.f32.xlu1 %v1095_v21  ;;  %1058 = vadd.xlane.f32.xlu0 %v5237_v43  ;;  %v1100_v63 = vmul.f32 %v5237_v43, %v5237_v43 }
 0x36f   :  { %v5240_v30 = vpop.f32.mrf.mxu1 }
 0x370   :  { %v1098_v53 = vmul.f32 %v5240_v30, %v5240_v30 }
 0x371   :  { %v5242_v62 = vpop.f32.mrf.mxu1 }
 0x372   :  { %1054 = vadd.xlane.f32.xlu0 %v5240_v30  ;;  %1060 = vadd.xlane.f32.xlu1 %v5242_v62  ;;  %v1101_v1 = vmul.f32 %v5242_v62, %v5242_v62 }
 0x373   :  { %v5248_v0 = vpop.f32.mrf.mxu1 }
 0x374   :  { %v1099_v18 = vmul.f32 %v5248_v0, %v5248_v0 }
 0x376   :  { %1122 = vadd.xlane.f32.xlu0 %v1100_v63  ;;  %1056 = vadd.xlane.f32.xlu1 %v5248_v0 }
 0x37a   :  { %1118 = vadd.xlane.f32.xlu0 %v1098_v53  ;;  %1124 = vadd.xlane.f32.xlu1 %v1101_v1 }
 0x37d   :  { %v5255_v56 = vpop.f32.mrf.mxu1 }
 0x37e   :  { %1120 = vadd.xlane.f32.xlu1 %v1099_v18  ;;  %1066 = vadd.xlane.f32.xlu0 %v5255_v56  ;;  %v1104_v54 = vmul.f32 %v5255_v56, %v5255_v56 }
 0x37f   :  { %v5260_v7 = vpop.f32.mrf.mxu1 }
 0x380   :  { %v1102_v13 = vmul.f32 %v5260_v7, %v5260_v7 }
 0x381   :  { %v5262_v6 = vpop.f32.mrf.mxu1 }
 0x382   :  { %1062 = vadd.xlane.f32.xlu0 %v5260_v7  ;;  %1068 = vadd.xlane.f32.xlu1 %v5262_v6  ;;  %v1105_v23 = vmul.f32 %v5262_v6, %v5262_v6 }
 0x383   :  { %v5268_v11 = vpop.f32.mrf.mxu1 }
 0x384   :  { %v1103_v27 = vmul.f32 %v5268_v11, %v5268_v11 }
 0x386   :  { %1130 = vadd.xlane.f32.xlu0 %v1104_v54  ;;  %1064 = vadd.xlane.f32.xlu1 %v5268_v11 }
 0x38a   :  { %1126 = vadd.xlane.f32.xlu0 %v1102_v13  ;;  %1132 = vadd.xlane.f32.xlu1 %v1105_v23 }
 0x38e   :  { %v5277_v32 = vpop.f32.mrf.mxu1  ;;  %1128 = vadd.xlane.f32.xlu1 %v1103_v27 }
 0x38f   :  { %1074 = vadd.xlane.f32.xlu0 %v5277_v32  ;;  %v1108_v10 = vmul.f32 %v5277_v32, %v5277_v32 }
 0x390   :  { %v5280_v24 = vpop.f32.mrf.mxu1 }
 0x391   :  { %v1106_v44 = vmul.f32 %v5280_v24, %v5280_v24 }
 0x392   :  { %v5282_v8 = vpop.f32.mrf.mxu1 }
 0x393   :  { %1070 = vadd.xlane.f32.xlu0 %v5280_v24  ;;  %1076 = vadd.xlane.f32.xlu1 %v5282_v8  ;;  %v1109_v50 = vmul.f32 %v5282_v8, %v5282_v8 }
 0x394   :  { %v5288_v19 = vpop.f32.mrf.mxu1 }
 0x395   :  { %v1107_v16 = vmul.f32 %v5288_v19, %v5288_v19 }
 0x397   :  { %1134 = vadd.xlane.f32.xlu0 %v1106_v44  ;;  %1072 = vadd.xlane.f32.xlu1 %v5288_v19 }
 0x39b   :  { %1138 = vadd.xlane.f32.xlu0 %v1108_v10  ;;  %1136 = vadd.xlane.f32.xlu1 %v1107_v16 }
 0x39f   :  { %1140 = vadd.xlane.f32.xlu1 %v1109_v50 }
 0x3e7   :  { %v1051_v42 = vpop.xlane.xlu0 %1050 }
 0x3e8   :  { %v1080_v26 = vmul.f32 0.010416667, %v1051_v42 }
 0x3ea   :  { %v1160_v21 = vmul.f32 %v1080_v26, %v1080_v26 }
 0x3eb   :  { %v1047_v60 = vpop.xlane.xlu0 %1046  ;;  %v1053_v61 = vpop.xlane.xlu1 %1052 }
 0x3ec   :  { %v5297_v14 = vmul.f32 0.010416667, %v1047_v60  ;;  %v1081_v63 = vmul.f32 0.010416667, %v1053_v61 }
 0x3ee   :  { %v1158_v1 = vmul.f32 %v5297_v14, %v5297_v14  ;;  %v1161_v33 = vmul.f32 %v1081_v63, %v1081_v63 }
 0x3ef   :  { %v1115_v48 = vpop.xlane.xlu0 %1114  ;;  %v1049_v15 = vpop.xlane.xlu1 %1048 }
 0x3f0   :  { %v1144_v41 = vmul.f32 0.010416667, %v1115_v48  ;;  %v5301_v29 = vmul.f32 0.010416667, %v1049_v15 }
 0x3f2   :  { %v1176_v53 = vsub.f32 %v1144_v41, %v1160_v21  ;;  %v1159_v34 = vmul.f32 %v5301_v29, %v5301_v29 }
 0x3f3   :  { %v1111_v18 = vpop.xlane.xlu0 %1110  ;;  %v1117_v5 = vpop.xlane.xlu1 %1116 }
 0x3f4   :  { %v1208_v54 = vadd.f32 1e-05, %v1176_v53  ;;  %v1142_v9 = vmul.f32 0.010416667, %v1111_v18  ;;  %v1145_v13 = vmul.f32 0.010416667, %v1117_v5 }
 0x3f5   :  { %v5314_v5 = vsub.s32 2, %v5089_v39 }
 0x3f6   :  { %v1174_v23 = vsub.f32 %v1142_v9, %v1158_v1  ;;  %v1177_v59 = vsub.f32 %v1145_v13, %v1161_v33  ;;  %4346 = vrsqrt.f32 %v1208_v54  ;;  %v1192_v9 = vsub.f32 %v5217_v38, %v1080_v26 }
 0x3f7   :  { %v1113_v27 = vpop.xlane.xlu1 %1112  ;;  %v1059_v10 = vpop.xlane.xlu0 %1058  ;;  %6498 = vst [vmem:[#allocation20_spill] sm:$0xff] %v5314_v5  ;;  %v5330_v38 = vsub.s32 3, %v5089_v39 }
 0x3f8   :  { %v1206_v20 = vadd.f32 1e-05, %v1174_v23  ;;  %v1209_v44 = vadd.f32 1e-05, %v1177_v59  ;;  %v1143_v16 = vmul.f32 0.010416667, %v1113_v27 }
 0x3f9   :  { %v5305_v48 = vmul.f32 0.010416667, %v1059_v10  ;;  %v1190_v10 = vsub.f32 %v5220_v25, %v5297_v14 }
 0x3fa   :  { %4348 = vrsqrt.f32 %v1206_v20  ;;  %v1175_v50 = vsub.f32 %v1143_v16, %v1159_v34 }
 0x3fb   :  { %4350 = vrsqrt.f32 %v1209_v44  ;;  %v1055_v60 = vpop.xlane.xlu0 %1054  ;;  %v1061_v61 = vpop.xlane.xlu1 %1060  ;;  %v1164_v53 = vmul.f32 %v5305_v48, %v5305_v48 }
 0x3fc   :  { %v1207_v42 = vadd.f32 1e-05, %v1175_v50  ;;  %v5307_v15 = vmul.f32 0.010416667, %v1055_v60  ;;  %v5311_v1 = vmul.f32 0.010416667, %v1061_v61  ;;  %v5327_v50 = vrot.slane %v5098_v3, %v5314_v5 }
 0x3fe   :  { %4352 = vrsqrt.f32 %v1207_v42  ;;  %v1162_v13 = vmul.f32 %v5307_v15, %v5307_v15  ;;  %v1165_v27 = vmul.f32 %v5311_v1, %v5311_v1  ;;  %v1193_v42 = vsub.f32 %v5222_v22, %v1081_v63 }
 0x3ff   :  { %v1123_v21 = vpop.xlane.xlu0 %1122  ;;  %v1057_v41 = vpop.xlane.xlu1 %1056 }
 0x400   :  { %v1148_v18 = vmul.f32 0.010416667, %v1123_v21  ;;  %v5323_v16 = vmul.f32 0.010416667, %v1057_v41 }
 0x402   :  { %v1180_v33 = vsub.f32 %v1148_v18, %v1164_v53  ;;  %v1163_v39 = vmul.f32 %v5323_v16, %v5323_v16 }
 0x403   :  { %v4347_v54 = vpop.eup %4346  ;;  %v1119_v23 = vpop.xlane.xlu0 %1118 }
 0x404   :  { %v1125_v59 = vpop.xlane.xlu1 %1124  ;;  %v1212_v34 = vadd.f32 1e-05, %v1180_v33  ;;  %v1146_v20 = vmul.f32 0.010416667, %v1119_v23  ;;  %v1240_v21 = vmul.f32 %v4347_v54, %v1192_v9  ;;  %v5340_v54 = vrot.slane %v5098_v3, %v5330_v38 }
 0x405   :  { %v1149_v44 = vmul.f32 0.010416667, %v1125_v59  ;;  %v1191_v59 = vsub.f32 %v5228_v40, %v5301_v29 }
 0x406   :  { %v1178_v60 = vsub.f32 %v1146_v20, %v1162_v13  ;;  %4354 = vrsqrt.f32 %v1212_v34  ;;  %v1260_v9 = vmul.f32 %v5327_v50, %v1240_v21 }
 0x407   :  { %v4349_v26 = vpop.eup %4348  ;;  %v1181_v61 = vsub.f32 %v1149_v44, %v1165_v27  ;;  %v1067_v18 = vpop.xlane.xlu0 %1066 }
 0x408   :  { %v4351_v53 = vpop.eup %4350  ;;  %v1121_v33 = vpop.xlane.xlu1 %1120  ;;  %v1238_v25 = vmul.f32 %v4349_v26, %v1190_v10  ;;  %v1210_v14 = vadd.f32 1e-05, %v1178_v60  ;;  %v5344_v20 = vmul.f32 0.010416667, %v1067_v18  ;;  %v1280_v3 = vadd.f32 %v5340_v54, %v1260_v9 }
 0x409   :  { %v1213_v41 = vadd.f32 1e-05, %v1181_v61  ;;  %v1241_v23 = vmul.f32 %v4351_v53, %v1193_v42  ;;  %v1147_v5 = vmul.f32 0.010416667, %v1121_v33 }
 0x40a   :  { %v1258_v22 = vmul.f32 %v5327_v50, %v1238_v25  ;;  %4356 = vrsqrt.f32 %v1210_v14  ;;  %v1168_v18 = vmul.f32 %v5344_v20, %v5344_v20 }
 0x40b   :  { %v4353_v63 = vpop.eup %4352  ;;  %v1261_v13 = vmul.f32 %v5327_v50, %v1241_v23  ;;  %4358 = vrsqrt.f32 %v1213_v41  ;;  %v1179_v27 = vsub.f32 %v1147_v5, %v1163_v39  ;;  %v1063_v34 = vpop.xlane.xlu0 %1062 }
 0x40c   :  { %v1069_v40 = vpop.xlane.xlu1 %1068  ;;  %v1239_v29 = vmul.f32 %v4353_v63, %v1191_v59  ;;  %v1278_v42 = vadd.f32 %v5340_v54, %v1258_v22  ;;  %v5350_v60 = vmul.f32 0.010416667, %v1063_v34  ;;  %v1296_v59 = vmax.f32 %v1280_v3, 0.0 }
 0x40d   :  { %v1281_v44 = vadd.f32 %v5340_v54, %v1261_v13  ;;  %v1211_v10 = vadd.f32 1e-05, %v1179_v27  ;;  %v5352_v61 = vmul.f32 0.010416667, %v1069_v40 }
 0x40e   :  { %v1259_v26 = vmul.f32 %v5327_v50, %v1239_v29  ;;  %v1294_v14 = vmax.f32 %v1278_v42, 0.0  ;;  %v1166_v39 = vmul.f32 %v5350_v60, %v5350_v60  ;;  %v1194_v42 = vsub.f32 %v5240_v30, %v5307_v15 }
 0x40f   :  { %4360 = vrsqrt.f32 %v1211_v10  ;;  %v1131_v5 = vpop.xlane.xlu0 %1130  ;;  %v1297_v25 = vmax.f32 %v1281_v44, 0.0  ;;  %v1169_v22 = vmul.f32 %v5352_v61, %v5352_v61  ;;  %v1195_v15 = vsub.f32 %v5248_v0, %v5323_v16 }
 0x410   :  { %v1065_v21 = vpop.xlane.xlu1 %1064  ;;  %v1279_v53 = vadd.f32 %v5340_v54, %v1259_v26  ;;  %v1152_v33 = vmul.f32 0.010416667, %v1131_v5  ;;  %v1196_v26 = vsub.f32 %v5237_v43, %v5305_v48 }
 0x411   :  { %v5361_v63 = vmul.f32 0.010416667, %v1065_v21  ;;  %v1311_v44 = vpack.c.bf16 %v1297_v25, %v1296_v59 }
 0x412   :  { %v1295_v41 = vmax.f32 %v1279_v53, 0.0  ;;  %v1184_v23 = vsub.f32 %v1152_v33, %v1168_v18  ;;  %v1197_v53 = vsub.f32 %v5242_v62, %v5311_v1 }
 0x413   :  { %v1127_v9 = vpop.xlane.xlu0 %1126  ;;  %v4355_v34 = vpop.eup %4354  ;;  %v1167_v18 = vmul.f32 %v5361_v63, %v5361_v63 }
 0x414   :  { %v1133_v13 = vpop.xlane.xlu1 %1132  ;;  %v1310_v27 = vpack.c.bf16 %v1295_v41, %v1294_v14  ;;  %v1216_v40 = vadd.f32 1e-05, %v1184_v23  ;;  %v1150_v29 = vmul.f32 0.010416667, %v1127_v9  ;;  %v1244_v14 = vmul.f32 %v4355_v34, %v1196_v26 }
 0x415   :  { %v1153_v10 = vmul.f32 0.010416667, %v1133_v13 }
 0x416   :  { %4022 = vmatprep.mubr.bf16.mxu0 %v1310_v27  ;;  %v1182_v3 = vsub.f32 %v1150_v29, %v1166_v39  ;;  %4362 = vrsqrt.f32 %v1216_v40  ;;  %v1264_v9 = vmul.f32 %v5327_v50, %v1244_v14 }
 0x417   :  { %v1185_v5 = vsub.f32 %v1153_v10, %v1169_v22  ;;  %4023 = vmatmul.mubr.bf16.vlgmr.msra.gmra.mxu0 %v1311_v44  ;;  %v4357_v21 = vpop.eup %4356 }
 0x418   :  { %v1129_v33 = vpop.xlane.xlu1 %1128  ;;  %v1075_v25 = vpop.xlane.xlu0 %1074  ;;  %v1214_v43 = vadd.f32 1e-05, %v1182_v3  ;;  %v1242_v59 = vmul.f32 %v4357_v21, %v1194_v42  ;;  %v1284_v3 = vadd.f32 %v5340_v54, %v1264_v9 }
 0x419   :  { %v4359_v41 = vpop.eup %4358  ;;  %v1217_v48 = vadd.f32 1e-05, %v1185_v5  ;;  %v1151_v23 = vmul.f32 0.010416667, %v1129_v33  ;;  %v5378_v10 = vmul.f32 0.010416667, %v1075_v25 }
 0x41a   :  { %v1245_v30 = vmul.f32 %v4359_v41, %v1197_v53  ;;  %4364 = vrsqrt.f32 %v1214_v43  ;;  %v1262_v22 = vmul.f32 %v5327_v50, %v1242_v59 }
 0x41b   :  { %v1183_v39 = vsub.f32 %v1151_v23, %v1167_v18  ;;  %4366 = vrsqrt.f32 %v1217_v48  ;;  %v1172_v33 = vmul.f32 %v5378_v10, %v5378_v10 }
 0x41c   :  { %v1071_v62 = vpop.xlane.xlu0 %1070  ;;  %v1077_v1 = vpop.xlane.xlu1 %1076  ;;  %v1265_v13 = vmul.f32 %v5327_v50, %v1245_v30  ;;  %v1282_v42 = vadd.f32 %v5340_v54, %v1262_v22  ;;  %v1300_v30 = vmax.f32 %v1284_v3, 0.0 }
 0x41d   :  { %v4361_v27 = vpop.eup %4360  ;;  %v1215_v34 = vadd.f32 1e-05, %v1183_v39  ;;  %v5376_v40 = vmul.f32 0.010416667, %v1071_v62  ;;  %v5391_v41 = vmul.f32 0.010416667, %v1077_v1 }
 0x41e   :  { %v1243_v29 = vmul.f32 %v4361_v27, %v1195_v15  ;;  %v1285_v0 = vadd.f32 %v5340_v54, %v1265_v13  ;;  %v1298_v23 = vmax.f32 %v1282_v42, 0.0  ;;  %v1200_v13 = vsub.f32 %v5255_v56, %v5344_v20 }
 0x41f   :  { %4368 = vrsqrt.f32 %v1215_v34  ;;  %v1170_v5 = vmul.f32 %v5376_v40, %v5376_v40  ;;  %v1198_v27 = vsub.f32 %v5260_v7, %v5350_v60 }
 0x420   :  { %v1135_v16 = vpop.xlane.xlu0 %1134  ;;  %v1073_v44 = vpop.xlane.xlu1 %1072  ;;  %v1263_v26 = vmul.f32 %v5327_v50, %v1243_v29  ;;  %v1301_v14 = vmax.f32 %v1285_v0, 0.0 }
 0x421   :  { %v1154_v21 = vmul.f32 0.010416667, %v1135_v16  ;;  %v5386_v53 = vmul.f32 0.010416667, %v1073_v44  ;;  %v1201_v44 = vsub.f32 %v5262_v6, %v5352_v61 }
 0x422   :  { %v1283_v18 = vadd.f32 %v5340_v54, %v1263_v26  ;;  %v1313_v0 = vpack.c.bf16 %v1301_v14, %v1300_v30  ;;  %v1173_v26 = vmul.f32 %v5391_v41, %v5391_v41 }
 0x423   :  { %v1186_v25 = vsub.f32 %v1154_v21, %v1170_v5  ;;  %v4363_v15 = vpop.eup %4362  ;;  %v1171_v62 = vmul.f32 %v5386_v53, %v5386_v53 }
 0x424   :  { %v1139_v43 = vpop.xlane.xlu0 %1138  ;;  %v1137_v48 = vpop.xlane.xlu1 %1136  ;;  %v1299_v59 = vmax.f32 %v1283_v18, 0.0  ;;  %v1248_v3 = vmul.f32 %v4363_v15, %v1200_v13  ;;  %v1199_v18 = vsub.f32 %v5268_v11, %v5361_v63 }
 0x425   :  { %v1218_v39 = vadd.f32 1e-05, %v1186_v25  ;;  %v1156_v22 = vmul.f32 0.010416667, %v1139_v43  ;;  %v1155_v9 = vmul.f32 0.010416667, %v1137_v48 }
 0x426   :  { %v1312_v1 = vpack.c.bf16 %v1299_v59, %v1298_v23  ;;  %v1268_v25 = vmul.f32 %v5327_v50, %v1248_v3 }
 0x427   :  { %4370 = vrsqrt.f32 %v1218_v39  ;;  %v1188_v34 = vsub.f32 %v1156_v22, %v1172_v33  ;;  %v1187_v29 = vsub.f32 %v1155_v9, %v1171_v62  ;;  %v4365_v16 = vpop.eup %4364  ;;  %v1202_v39 = vsub.f32 %v5280_v24, %v5376_v40 }
 0x428   :  { %4026 = vmatprep.mubr.bf16.mxu0 %v1312_v1  ;;  %v1141_v42 = vpop.xlane.xlu1 %1140  ;;  %v4367_v5 = vpop.eup %4366  ;;  %v1246_v60 = vmul.f32 %v4365_v16, %v1198_v27  ;;  %v1288_v11 = vadd.f32 %v5340_v54, %v1268_v25  ;;  %v1203_v16 = vsub.f32 %v5288_v19, %v5386_v53 }
 0x429   :  { %v1220_v56 = vadd.f32 1e-05, %v1188_v34  ;;  %v1219_v20 = vadd.f32 1e-05, %v1187_v29  ;;  %4027 = vmatmul.mubr.bf16.gmra.mxu0 %v1313_v0  ;;  %v1157_v7 = vmul.f32 0.010416667, %v1141_v42  ;;  %v1249_v21 = vmul.f32 %v4367_v5, %v1201_v44 }
 0x42a   :  { %v1266_v6 = vmul.f32 %v5327_v50, %v1246_v60  ;;  %v1304_v13 = vmax.f32 %v1288_v11, 0.0  ;;  %v1204_v29 = vsub.f32 %v5277_v32, %v5378_v10  ;;  %v1205_v42 = vsub.f32 %v5282_v8, %v5391_v41 }
 0x42b   :  { %4372 = vrsqrt.f32 %v1220_v56  ;;  %v1189_v33 = vsub.f32 %v1157_v7, %v1173_v26  ;;  %v1269_v14 = vmul.f32 %v5327_v50, %v1249_v21 }
 0x42c   :  { %v4369_v61 = vpop.eup %4368  ;;  %4374 = vrsqrt.f32 %v1219_v20  ;;  %v1286_v30 = vadd.f32 %v5340_v54, %v1266_v6 }
 0x42d   :  { %v1221_v43 = vadd.f32 1e-05, %v1189_v33  ;;  %v1247_v48 = vmul.f32 %v4369_v61, %v1199_v18  ;;  %v1289_v23 = vadd.f32 %v5340_v54, %v1269_v14 }
 0x42e   :  { %v1302_v62 = vmax.f32 %v1286_v30, 0.0 }
 0x42f   :  { %4376 = vrsqrt.f32 %v1221_v43  ;;  %v1267_v59 = vmul.f32 %v5327_v50, %v1247_v48  ;;  %v1305_v15 = vmax.f32 %v1289_v23, 0.0 }
 0x431   :  { %v1287_v63 = vadd.f32 %v5340_v54, %v1267_v59  ;;  %v1315_v34 = vpack.c.bf16 %v1305_v15, %v1304_v13 }
 0x433   :  { %v1303_v22 = vmax.f32 %v1287_v63, 0.0 }
 0x434   :  { %v4371_v9 = vpop.eup %4370 }
 0x435   :  { %v1314_v27 = vpack.c.bf16 %v1303_v22, %v1302_v62  ;;  %v1250_v1 = vmul.f32 %v4371_v9, %v1202_v39 }
 0x437   :  { %4030 = vmatprep.mubr.bf16.mxu0 %v1314_v27  ;;  %v1270_v44 = vmul.f32 %v5327_v50, %v1250_v1 }
 0x438   :  { %v4373_v0 = vpop.eup %4372  ;;  %4031 = vmatmul.mubr.bf16.gmra.mxu0 %v1315_v34 }
 0x439   :  { %v4375_v26 = vpop.eup %4374  ;;  %v1252_v24 = vmul.f32 %v4373_v0, %v1204_v29  ;;  %v1290_v32 = vadd.f32 %v5340_v54, %v1270_v44 }
 0x43a   :  { %v1251_v40 = vmul.f32 %v4375_v26, %v1203_v16 }
 0x43b   :  { %v1272_v3 = vmul.f32 %v5327_v50, %v1252_v24  ;;  %v1306_v7 = vmax.f32 %v1290_v32, 0.0  ;;  %v4244_v32 = vld [vmem:[#allocation7 + $0x68] sm:$0xff]  }
 0x43c   :  { %v4377_v5 = vpop.eup %4376  ;;  %v1271_v56 = vmul.f32 %v5327_v50, %v1251_v40  ;;  %v4243_v40 = vld [vmem:[#allocation7 + $0x70] sm:$0xff]  }
 0x43d   :  { %v1253_v10 = vmul.f32 %v4377_v5, %v1205_v42  ;;  %v1292_v53 = vadd.f32 %v5340_v54, %v1272_v3 }
 0x43e   :  { %v1291_v20 = vadd.f32 %v5340_v54, %v1271_v56 }
 0x43f   :  { %v1273_v19 = vmul.f32 %v5327_v50, %v1253_v10  ;;  %v1308_v8 = vmax.f32 %v1292_v53, 0.0 }
 0x440   :  { %v1307_v60 = vmax.f32 %v1291_v20, 0.0 }
 0x441   :  { %v1293_v21 = vadd.f32 %v5340_v54, %v1273_v19 }
 0x442   :  { %v1316_v18 = vpack.c.bf16 %v1307_v60, %v1306_v7  ;;  %v4246_v60 = vld [vmem:[#allocation7 + $0x58] sm:$0xff]  }
 0x443   :  { %v1309_v41 = vmax.f32 %v1293_v21, 0.0 }
 0x444   :  { %4034 = vmatprep.mubr.bf16.mxu0 %v1316_v18 }
 0x445   :  { %v1317_v33 = vpack.c.bf16 %v1309_v41, %v1308_v8 }
 0x447   :  { %4035 = vmatmul.mubr.bf16.gmra.mxu0 %v1317_v33 }
 0x4d7   :  { %v4024_v6 = vpop.f32.mrf.mxu0 }
 0x4d8   :  { %v1425_v61 = vadd.f32 %v4024_v6, %v4914_v17  ;;  %v4247_v6 = vld [vmem:[#allocation7 + $0x50] sm:$0xff]  }
 0x4d9   :  { %v1416_v25 = vpop.f32.mrf.mxu0 }
 0x4da   :  { %v5430_v14 = vmax.f32 %v1425_v61, 0.0  ;;  %v1417_v50 = vadd.f32 %v1416_v25, %v4927_v28 }
 0x4db   :  { %v4025_v43 = vpop.f32.mrf.mxu0 }
 0x4dc   :  { %v1428_v48 = vadd.f32 %v4025_v43, %v4921_v12  ;;  %1501 = vadd.xlane.f32.xlu0 %v5430_v14  ;;  %v5435_v23 = vmax.f32 %v1417_v50, 0.0  ;;  %v1547_v28 = vmul.f32 %v5430_v14, %v5430_v14 }
 0x4dd   :  { %v1419_v54 = vpop.f32.mrf.mxu0 }
 0x4de   :  { %v5437_v59 = vmax.f32 %v1428_v48, 0.0  ;;  %v1420_v30 = vadd.f32 %v1419_v54, %v4944_v49  ;;  %v1545_v11 = vmul.f32 %v5435_v23, %v5435_v23  ;;  %v4248_v48 = vld [vmem:[#allocation7 + $0x48] sm:$0xff]  }
 0x4e0   :  { %1503 = vadd.xlane.f32.xlu1 %v5437_v59  ;;  %1497 = vadd.xlane.f32.xlu0 %v5435_v23  ;;  %v5442_v17 = vmax.f32 %v1420_v30, 0.0  ;;  %v1548_v12 = vmul.f32 %v5437_v59, %v5437_v59 }
 0x4e2   :  { %v1546_v15 = vmul.f32 %v5442_v17, %v5442_v17 }
 0x4e4   :  { %1499 = vadd.xlane.f32.xlu1 %v5442_v17  ;;  %1565 = vadd.xlane.f32.xlu0 %v1547_v28 }
 0x4e8   :  { %1567 = vadd.xlane.f32.xlu1 %v1548_v12  ;;  %1561 = vadd.xlane.f32.xlu0 %v1545_v11 }
 0x4e9   :  { %v4028_v49 = vpop.f32.mrf.mxu0 }
 0x4ea   :  { %v1441_v63 = vadd.f32 %v4028_v49, %v4972_v31 }
 0x4eb   :  { %v1432_v39 = vpop.f32.mrf.mxu0 }
 0x4ec   :  { %v5454_v62 = vmax.f32 %v1441_v63, 0.0  ;;  %v1433_v22 = vadd.f32 %v1432_v39, %v4991_v58  ;;  %1563 = vadd.xlane.f32.xlu1 %v1546_v15 }
 0x4ed   :  { %v4029_v9 = vpop.f32.mrf.mxu0 }
 0x4ee   :  { %v1444_v13 = vadd.f32 %v4029_v9, %v4977_v45  ;;  %1509 = vadd.xlane.f32.xlu0 %v5454_v62  ;;  %v5459_v1 = vmax.f32 %v1433_v22, 0.0  ;;  %v1551_v58 = vmul.f32 %v5454_v62, %v5454_v62  ;;  %v4242_v45 = vld [vmem:[#allocation7 + $0x78] sm:$0xff]  }
 0x4ef   :  { %v1435_v27 = vpop.f32.mrf.mxu0  ;;  %4038 = vmatprep.subr.bf16.mxu1 %v4242_v45 }
 0x4f0   :  { %v5461_v34 = vmax.f32 %v1444_v13, 0.0  ;;  %v1436_v31 = vadd.f32 %v1435_v27, %v4995_v52  ;;  %v1549_v52 = vmul.f32 %v5459_v1, %v5459_v1  ;;  %4039 = vmatpush3.bf16.msra.mxu1 %v4242_v45 }
 0x4f1   :  { %4040 = vmatprep.subr.bf16.mxu1 %v4243_v40 }
 0x4f2   :  { %1511 = vadd.xlane.f32.xlu1 %v5461_v34  ;;  %1505 = vadd.xlane.f32.xlu0 %v5459_v1  ;;  %v5466_v29 = vmax.f32 %v1436_v31, 0.0  ;;  %v1552_v16 = vmul.f32 %v5461_v34, %v5461_v34 }
 0x4f4   :  { %v1550_v5 = vmul.f32 %v5466_v29, %v5466_v29  ;;  %4041 = vmatpush3.bf16.msra.mxu1 %v4243_v40 }
 0x4f5   :  { %4042 = vmatprep.subr.bf16.mxu1 %v4244_v32 }
 0x4f6   :  { %1507 = vadd.xlane.f32.xlu1 %v5466_v29  ;;  %1573 = vadd.xlane.f32.xlu0 %v1551_v58 }
 0x4f8   :  { %v4032_v0 = vpop.f32.mrf.mxu0  ;;  %4043 = vmatpush3.bf16.msra.mxu1 %v4244_v32 }
 0x4f9   :  { %v1457_v44 = vadd.f32 %v4032_v0, %v5023_v46 }
 0x4fa   :  { %1575 = vadd.xlane.f32.xlu1 %v1552_v16  ;;  %1569 = vadd.xlane.f32.xlu0 %v1549_v52  ;;  %v1448_v26 = vpop.f32.mrf.mxu0 }
 0x4fb   :  { %v5476_v24 = vmax.f32 %v1457_v44, 0.0  ;;  %v1449_v42 = vadd.f32 %v1448_v26, %v5031_v51 }
 0x4fc   :  { %v4033_v3 = vpop.f32.mrf.mxu0 }
 0x4fd   :  { %v1460_v56 = vadd.f32 %v4033_v3, %v5025_v47  ;;  %v5485_v20 = vmax.f32 %v1449_v42, 0.0  ;;  %v4245_v47 = vld [vmem:[#allocation7 + $0x60] sm:$0xff]   ;;  %v1555_v53 = vmul.f32 %v5476_v24, %v5476_v24 }
 0x4fe   :  { %1571 = vadd.xlane.f32.xlu1 %v1550_v5  ;;  %1517 = vadd.xlane.f32.xlu0 %v5476_v24  ;;  %v1451_v46 = vpop.f32.mrf.mxu0 }
 0x4ff   :  { %v5483_v10 = vmax.f32 %v1460_v56, 0.0  ;;  %v1452_v19 = vadd.f32 %v1451_v46, %v5033_v57  ;;  %4044 = vmatprep.subr.bf16.mxu1 %v4245_v47  ;;  %v1553_v18 = vmul.f32 %v5485_v20, %v5485_v20 }
 0x500   :  { %4045 = vmatpush3.bf16.msra.mxu1 %v4245_v47 }
 0x501   :  { %v5490_v51 = vmax.f32 %v1452_v19, 0.0  ;;  %v1556_v21 = vmul.f32 %v5483_v10, %v5483_v10  ;;  %4046 = vmatprep.subr.bf16.mxu1 %v4246_v60 }
 0x502   :  { %1519 = vadd.xlane.f32.xlu1 %v5483_v10  ;;  %1513 = vadd.xlane.f32.xlu0 %v5485_v20 }
 0x504   :  { %4047 = vmatpush3.bf16.msra.mxu1 %v4246_v60 }
 0x505   :  { %4048 = vmatprep.subr.bf16.mxu1 %v4247_v6 }
 0x506   :  { %1515 = vadd.xlane.f32.xlu1 %v5490_v51  ;;  %1581 = vadd.xlane.f32.xlu0 %v1555_v53 }
 0x507   :  { %v4036_v7 = vpop.f32.mrf.mxu0 }
 0x508   :  { %v1473_v57 = vadd.f32 %v4036_v7, %v5063_v55  ;;  %v1554_v55 = vmul.f32 %v5490_v51, %v5490_v51  ;;  %4049 = vmatpush3.bf16.msra.mxu1 %v4247_v6 }
 0x509   :  { %v1464_v8 = vpop.f32.mrf.mxu0  ;;  %4050 = vmatprep.subr.bf16.mxu1 %v4248_v48 }
 0x50a   :  { %v5500_v41 = vmax.f32 %v1473_v57, 0.0  ;;  %1583 = vadd.xlane.f32.xlu1 %v1556_v21  ;;  %1577 = vadd.xlane.f32.xlu0 %v1553_v18  ;;  %v1465_v61 = vadd.f32 %v1464_v8, %v5070_v35 }
 0x50b   :  { %v4037_v33 = vpop.f32.mrf.mxu0 }
 0x50c   :  { %v1476_v25 = vadd.f32 %v4037_v33, %v5058_v2  ;;  %v5509_v54 = vmax.f32 %v1465_v61, 0.0  ;;  %4051 = vmatpush3.bf16.msra.mxu1 %v4248_v48  ;;  %v4249_v2 = vld [vmem:[#allocation7 + $0x40] sm:$0xff]   ;;  %v1559_v12 = vmul.f32 %v5500_v41, %v5500_v41 }
 0x50d   :  { %v1467_v50 = vpop.f32.mrf.mxu0  ;;  %4052 = vmatprep.subr.bf16.mxu1 %v4249_v2 }
 0x50e   :  { %v5506_v43 = vmax.f32 %v1476_v25, 0.0  ;;  %1579 = vadd.xlane.f32.xlu1 %v1554_v55  ;;  %1525 = vadd.xlane.f32.xlu0 %v5500_v41  ;;  %v1468_v30 = vadd.f32 %v1467_v50, %v5067_v37  ;;  %v1557_v28 = vmul.f32 %v5509_v54, %v5509_v54 }
 0x510   :  { %v5514_v35 = vmax.f32 %v1468_v30, 0.0  ;;  %4053 = vmatpush3.bf16.msra.mxu1 %v4249_v2  ;;  %v1560_v11 = vmul.f32 %v5506_v43, %v5506_v43  ;;  %v5537_v2 = vld [vmem:[#allocation11 + $0x8] sm:$0xff] }
 0x512   :  { %1527 = vadd.xlane.f32.xlu1 %v5506_v43  ;;  %1521 = vadd.xlane.f32.xlu0 %v5509_v54  ;;  %v1558_v37 = vmul.f32 %v5514_v35, %v5514_v35 }
 0x516   :  { %1523 = vadd.xlane.f32.xlu1 %v5514_v35  ;;  %1585 = vadd.xlane.f32.xlu0 %v1557_v28 }
 0x51a   :  { %1587 = vadd.xlane.f32.xlu1 %v1558_v37  ;;  %1589 = vadd.xlane.f32.xlu0 %v1559_v12 }
 0x51e   :  { %1591 = vadd.xlane.f32.xlu1 %v1560_v11 }
 0x565   :  { %v1502_v49 = vpop.xlane.xlu0 %1501 }
 0x566   :  { %v1531_v39 = vmul.f32 0.010416667, %v1502_v49 }
 0x568   :  { %v1611_v27 = vmul.f32 %v1531_v39, %v1531_v39  ;;  %v1643_v28 = vsub.f32 %v5430_v14, %v1531_v39  ;;  %v5550_v39 = vrot.slane %v5537_v2, %v5096_v36 }
 0x569   :  { %v1498_v63 = vpop.xlane.xlu0 %1497  ;;  %v1504_v15 = vpop.xlane.xlu1 %1503 }
 0x56a   :  { %v1529_v22 = vmul.f32 0.010416667, %v1498_v63  ;;  %v1532_v31 = vmul.f32 0.010416667, %v1504_v15 }
 0x56c   :  { %v1609_v0 = vmul.f32 %v1529_v22, %v1529_v22  ;;  %v1612_v26 = vmul.f32 %v1532_v31, %v1532_v31  ;;  %v1641_v37 = vsub.f32 %v5435_v23, %v1529_v22 }
 0x56d   :  { %v1566_v9 = vpop.xlane.xlu0 %1565  ;;  %v1500_v13 = vpop.xlane.xlu1 %1499 }
 0x56e   :  { %v1595_v58 = vmul.f32 0.010416667, %v1566_v9  ;;  %v5525_v16 = vmul.f32 0.010416667, %v1500_v13 }
 0x570   :  { %v1627_v45 = vsub.f32 %v1595_v58, %v1611_v27  ;;  %v1610_v32 = vmul.f32 %v5525_v16, %v5525_v16  ;;  %v1644_v58 = vsub.f32 %v5437_v59, %v1532_v31 }
 0x571   :  { %v1562_v52 = vpop.xlane.xlu0 %1561  ;;  %v1568_v44 = vpop.xlane.xlu1 %1567 }
 0x572   :  { %v1659_v40 = vadd.f32 1e-05, %v1627_v45  ;;  %v1593_v42 = vmul.f32 0.010416667, %v1562_v52  ;;  %v1596_v3 = vmul.f32 0.010416667, %v1568_v44 }
 0x574   :  { %v1625_v5 = vsub.f32 %v1593_v42, %v1609_v0  ;;  %v1628_v56 = vsub.f32 %v1596_v3, %v1612_v26  ;;  %4378 = vrsqrt.f32 %v1659_v40 }
 0x575   :  { %v1564_v46 = vpop.xlane.xlu1 %1563 }
 0x576   :  { %v1657_v19 = vadd.f32 1e-05, %v1625_v5  ;;  %v1660_v47 = vadd.f32 1e-05, %v1628_v56  ;;  %v1594_v53 = vmul.f32 0.010416667, %v1564_v46  ;;  %v1642_v5 = vsub.f32 %v5442_v17, %v5525_v16 }
 0x577   :  { %v1510_v7 = vpop.xlane.xlu0 %1509 }
 0x578   :  { %4380 = vrsqrt.f32 %v1657_v19  ;;  %v1626_v60 = vsub.f32 %v1594_v53, %v1610_v32  ;;  %v5529_v8 = vmul.f32 0.010416667, %v1510_v7 }
 0x579   :  { %4382 = vrsqrt.f32 %v1660_v47 }
 0x57a   :  { %v1658_v57 = vadd.f32 1e-05, %v1626_v60  ;;  %v1615_v25 = vmul.f32 %v5529_v8, %v5529_v8  ;;  %v5560_v60 = vrot.slane %v5537_v2, %v5101_v4 }
 0x57b   :  { %v1506_v21 = vpop.xlane.xlu0 %1505  ;;  %v1512_v18 = vpop.xlane.xlu1 %1511 }
 0x57c   :  { %4384 = vrsqrt.f32 %v1658_v57  ;;  %v5531_v33 = vmul.f32 0.010416667, %v1506_v21  ;;  %v5535_v55 = vmul.f32 0.010416667, %v1512_v18 }
 0x57e   :  { %v1613_v12 = vmul.f32 %v5531_v33, %v5531_v33  ;;  %v1616_v63 = vmul.f32 %v5535_v55, %v5535_v55 }
 0x57f   :  { %v1574_v6 = vpop.xlane.xlu0 %1573  ;;  %v1508_v61 = vpop.xlane.xlu1 %1507 }
 0x580   :  { %v1599_v50 = vmul.f32 0.010416667, %v1574_v6  ;;  %v5546_v45 = vmul.f32 0.010416667, %v1508_v61 }
 0x581   :  { %v4379_v48 = vpop.eup %4378 }
 0x582   :  { %v1631_v30 = vsub.f32 %v1599_v50, %v1615_v25  ;;  %v1691_v22 = vmul.f32 %v4379_v48, %v1643_v28  ;;  %v1614_v32 = vmul.f32 %v5546_v45, %v5546_v45 }
 0x583   :  { %v1570_v11 = vpop.xlane.xlu0 %1569  ;;  %v1576_v49 = vpop.xlane.xlu1 %1575 }
 0x584   :  { %v1663_v15 = vadd.f32 1e-05, %v1631_v30  ;;  %v1597_v9 = vmul.f32 0.010416667, %v1570_v11  ;;  %v1600_v13 = vmul.f32 0.010416667, %v1576_v49  ;;  %v1711_v57 = vmul.f32 %v5550_v39, %v1691_v22 }
 0x585   :  { %v4381_v27 = vpop.eup %4380 }
 0x586   :  { %v4383_v0 = vpop.eup %4382  ;;  %4386 = vrsqrt.f32 %v1663_v15  ;;  %v1629_v52 = vsub.f32 %v1597_v9, %v1613_v12  ;;  %v1632_v44 = vsub.f32 %v1600_v13, %v1616_v63  ;;  %v1689_v26 = vmul.f32 %v4381_v27, %v1641_v37 }
 0x587   :  { %v1518_v40 = vpop.xlane.xlu0 %1517  ;;  %v1572_v42 = vpop.xlane.xlu1 %1571  ;;  %v1692_v3 = vmul.f32 %v4383_v0, %v1644_v58  ;;  %v1731_v30 = vadd.f32 %v5560_v60, %v1711_v57  ;;  %v1648_v57 = vsub.f32 %v5461_v34, %v5535_v55 }
 0x588   :  { %v1661_v56 = vadd.f32 1e-05, %v1629_v52  ;;  %v1664_v31 = vadd.f32 1e-05, %v1632_v44  ;;  %v1598_v19 = vmul.f32 0.010416667, %v1572_v42  ;;  %v1709_v47 = vmul.f32 %v5550_v39, %v1689_v26 }
 0x589   :  { %v4385_v46 = vpop.eup %4384  ;;  %v1712_v53 = vmul.f32 %v5550_v39, %v1692_v3  ;;  %v5563_v6 = vmul.f32 0.010416667, %v1518_v40  ;;  %v1747_v22 = vmax.f32 %v1731_v30, 0.0  ;;  %v1647_v52 = vsub.f32 %v5454_v62, %v5529_v8 }
 0x58a   :  { %4388 = vrsqrt.f32 %v1661_v56  ;;  %v1690_v7 = vmul.f32 %v4385_v46, %v1642_v5  ;;  %v1630_v16 = vsub.f32 %v1598_v19, %v1614_v32  ;;  %v1729_v48 = vadd.f32 %v5560_v60, %v1709_v47 }
 0x58b   :  { %4390 = vrsqrt.f32 %v1664_v31  ;;  %v1514_v21 = vpop.xlane.xlu0 %1513  ;;  %v1520_v18 = vpop.xlane.xlu1 %1519  ;;  %v1732_v25 = vadd.f32 %v5560_v60, %v1712_v53  ;;  %v1619_v63 = vmul.f32 %v5563_v6, %v5563_v6  ;;  %v1645_v19 = vsub.f32 %v5459_v1, %v5531_v33 }
 0x58c   :  { %v1710_v61 = vmul.f32 %v5550_v39, %v1690_v7  ;;  %v1662_v50 = vadd.f32 1e-05, %v1630_v16  ;;  %v5569_v28 = vmul.f32 0.010416667, %v1514_v21  ;;  %v5571_v37 = vmul.f32 0.010416667, %v1520_v18 }
 0x58d   :  { %v1748_v9 = vmax.f32 %v1732_v25, 0.0  ;;  %v1745_v13 = vmax.f32 %v1729_v48, 0.0 }
 0x58e   :  { %4392 = vrsqrt.f32 %v1662_v50  ;;  %v1730_v49 = vadd.f32 %v5560_v60, %v1710_v61  ;;  %v1617_v44 = vmul.f32 %v5569_v28, %v5569_v28  ;;  %v1620_v26 = vmul.f32 %v5571_v37, %v5571_v37 }
 0x58f   :  { %v1582_v12 = vpop.xlane.xlu0 %1581  ;;  %v1516_v11 = vpop.xlane.xlu1 %1515  ;;  %v1762_v46 = vpack.c.bf16 %v1748_v9, %v1747_v22 }
 0x590   :  { %v1603_v15 = vmul.f32 0.010416667, %v1582_v12  ;;  %v1746_v27 = vmax.f32 %v1730_v49, 0.0  ;;  %v5582_v32 = vmul.f32 0.010416667, %v1516_v11  ;;  %v1646_v12 = vsub.f32 %v5466_v29, %v5546_v45 }
 0x592   :  { %v1635_v58 = vsub.f32 %v1603_v15, %v1619_v63  ;;  %v1761_v3 = vpack.c.bf16 %v1746_v27, %v1745_v13  ;;  %v1618_v48 = vmul.f32 %v5582_v32, %v5582_v32 }
 0x593   :  { %v4387_v0 = vpop.eup %4386  ;;  %v1578_v40 = vpop.xlane.xlu0 %1577 }
 0x594   :  { %v1584_v42 = vpop.xlane.xlu1 %1583  ;;  %v1667_v5 = vadd.f32 1e-05, %v1635_v58  ;;  %v1601_v56 = vmul.f32 0.010416667, %v1578_v40  ;;  %4054 = vmatprep.mubr.bf16.mxu1 %v1761_v3  ;;  %v1695_v53 = vmul.f32 %v4387_v0, %v1647_v52 }
 0x595   :  { %v1604_v31 = vmul.f32 0.010416667, %v1584_v42  ;;  %4055 = vmatmul.mubr.bf16.vlgmr.msra.gmra.mxu1 %v1762_v46 }
 0x596   :  { %v1633_v8 = vsub.f32 %v1601_v56, %v1617_v44  ;;  %4394 = vrsqrt.f32 %v1667_v5  ;;  %v1715_v11 = vmul.f32 %v5550_v39, %v1695_v53 }
 0x597   :  { %v1636_v47 = vsub.f32 %v1604_v31, %v1620_v26  ;;  %v4389_v7 = vpop.eup %4388  ;;  %v1526_v16 = vpop.xlane.xlu0 %1525 }
 0x598   :  { %v1580_v21 = vpop.xlane.xlu1 %1579  ;;  %v4391_v18 = vpop.eup %4390  ;;  %v1665_v61 = vadd.f32 1e-05, %v1633_v8  ;;  %v1693_v50 = vmul.f32 %v4389_v7, %v1645_v19  ;;  %v5597_v0 = vmul.f32 0.010416667, %v1526_v16  ;;  %v1735_v42 = vadd.f32 %v5560_v60, %v1715_v11 }
 0x599   :  { %v1668_v25 = vadd.f32 1e-05, %v1636_v47  ;;  %v1602_v30 = vmul.f32 0.010416667, %v1580_v21  ;;  %v1696_v33 = vmul.f32 %v4391_v18, %v1648_v57 }
 0x59a   :  { %4396 = vrsqrt.f32 %v1665_v61  ;;  %v1713_v15 = vmul.f32 %v5550_v39, %v1693_v50  ;;  %v1623_v46 = vmul.f32 %v5597_v0, %v5597_v0  ;;  %v1751_v21 = vmax.f32 %v1735_v42, 0.0 }
 0x59b   :  { %4398 = vrsqrt.f32 %v1668_v25  ;;  %v1634_v55 = vsub.f32 %v1602_v30, %v1618_v48  ;;  %v1522_v49 = vpop.xlane.xlu0 %1521  ;;  %v1716_v9 = vmul.f32 %v5550_v39, %v1696_v33  ;;  %v4393_v13 = vpop.eup %4392  ;;  %v1651_v30 = vsub.f32 %v5476_v24, %v5563_v6 }
 0x59c   :  { %v1528_v63 = vpop.xlane.xlu1 %1527  ;;  %v5595_v27 = vmul.f32 0.010416667, %v1522_v49  ;;  %v1694_v22 = vmul.f32 %v4393_v13, %v1646_v12  ;;  %v1733_v40 = vadd.f32 %v5560_v60, %v1713_v15  ;;  %v1649_v33 = vsub.f32 %v5485_v20, %v5569_v28 }
 0x59d   :  { %v1666_v58 = vadd.f32 1e-05, %v1634_v55  ;;  %v1736_v45 = vadd.f32 %v5560_v60, %v1716_v9  ;;  %v5610_v47 = vmul.f32 0.010416667, %v1528_v63  ;;  %v1652_v15 = vsub.f32 %v5483_v10, %v5571_v37 }
 0x59e   :  { %v1714_v26 = vmul.f32 %v5550_v39, %v1694_v22  ;;  %v1621_v3 = vmul.f32 %v5595_v27, %v5595_v27  ;;  %v1749_v57 = vmax.f32 %v1733_v40, 0.0  ;;  %v1650_v40 = vsub.f32 %v5490_v51, %v5582_v32 }
 0x59f   :  { %4400 = vrsqrt.f32 %v1666_v58  ;;  %v1586_v52 = vpop.xlane.xlu0 %1585  ;;  %v1752_v8 = vmax.f32 %v1736_v45, 0.0  ;;  %v1624_v9 = vmul.f32 %v5610_v47, %v5610_v47 }
 0x5a0   :  { %v1524_v44 = vpop.xlane.xlu1 %1523  ;;  %v1605_v5 = vmul.f32 0.010416667, %v1586_v52  ;;  %v1734_v31 = vadd.f32 %v5560_v60, %v1714_v26 }
 0x5a1   :  { %v5605_v56 = vmul.f32 0.010416667, %v1524_v44  ;;  %v1764_v49 = vpack.c.bf16 %v1752_v8, %v1751_v21 }
 0x5a2   :  { %v1637_v19 = vsub.f32 %v1605_v5, %v1621_v3  ;;  %v1750_v16 = vmax.f32 %v1734_v31, 0.0 }
 0x5a3   :  { %v1590_v53 = vpop.xlane.xlu0 %1589  ;;  %v4395_v18 = vpop.eup %4394  ;;  %v1622_v25 = vmul.f32 %v5605_v56, %v5605_v56 }
 0x5a4   :  { %v1588_v7 = vpop.xlane.xlu1 %1587  ;;  %v1669_v61 = vadd.f32 1e-05, %v1637_v19  ;;  %v1607_v50 = vmul.f32 0.010416667, %v1590_v53  ;;  %v1763_v12 = vpack.c.bf16 %v1750_v16, %v1749_v57  ;;  %v1699_v58 = vmul.f32 %v4395_v18, %v1651_v30 }
 0x5a5   :  { %v1606_v48 = vmul.f32 0.010416667, %v1588_v7  ;;  %v1653_v57 = vsub.f32 %v5509_v54, %v5595_v27  ;;  %v1655_v30 = vsub.f32 %v5500_v41, %v5597_v0 }
 0x5a6   :  { %4402 = vrsqrt.f32 %v1669_v61  ;;  %v1639_v11 = vsub.f32 %v1607_v50, %v1623_v46  ;;  %4058 = vmatprep.mubr.bf16.mxu1 %v1763_v12  ;;  %v1719_v31 = vmul.f32 %v5550_v39, %v1699_v58 }
 0x5a7   :  { %v1638_v55 = vsub.f32 %v1606_v48, %v1622_v25  ;;  %v4397_v63 = vpop.eup %4396  ;;  %4059 = vmatmul.mubr.bf16.gmra.mxu1 %v1764_v49 }
 0x5a8   :  { %v1592_v13 = vpop.xlane.xlu1 %1591  ;;  %v4399_v22 = vpop.eup %4398  ;;  %v1671_v6 = vadd.f32 1e-05, %v1639_v11  ;;  %v1697_v52 = vmul.f32 %v4397_v63, %v1649_v33  ;;  %v1739_v7 = vadd.f32 %v5560_v60, %v1719_v31  ;;  %v1654_v11 = vsub.f32 %v5514_v35, %v5605_v56 }
 0x5a9   :  { %v1670_v45 = vadd.f32 1e-05, %v1638_v55  ;;  %v1608_v28 = vmul.f32 0.010416667, %v1592_v13  ;;  %v1700_v44 = vmul.f32 %v4399_v22, %v1652_v15  ;;  %v1656_v15 = vsub.f32 %v5506_v43, %v5610_v47 }
 0x5aa   :  { %4404 = vrsqrt.f32 %v1671_v6  ;;  %v1717_v37 = vmul.f32 %v5550_v39, %v1697_v52  ;;  %v1755_v25 = vmax.f32 %v1739_v7, 0.0 }
 0x5ab   :  { %v1640_v26 = vsub.f32 %v1608_v28, %v1624_v9  ;;  %4406 = vrsqrt.f32 %v1670_v45  ;;  %v1720_v42 = vmul.f32 %v5550_v39, %v1700_v44 }
 0x5ac   :  { %v4401_v3 = vpop.eup %4400  ;;  %v1737_v53 = vadd.f32 %v5560_v60, %v1717_v37 }
 0x5ad   :  { %v1672_v5 = vadd.f32 1e-05, %v1640_v26  ;;  %v1698_v46 = vmul.f32 %v4401_v3, %v1650_v40  ;;  %v1740_v19 = vadd.f32 %v5560_v60, %v1720_v42 }
 0x5ae   :  { %v1753_v18 = vmax.f32 %v1737_v53, 0.0 }
 0x5af   :  { %4408 = vrsqrt.f32 %v1672_v5  ;;  %v1718_v8 = vmul.f32 %v5550_v39, %v1698_v46  ;;  %v1756_v16 = vmax.f32 %v1740_v19, 0.0 }
 0x5b1   :  { %v1738_v32 = vadd.f32 %v5560_v60, %v1718_v8  ;;  %v1766_v33 = vpack.c.bf16 %v1756_v16, %v1755_v25  ;;  %v4250_v16 = vld [vmem:[#allocation8 + $0x78] sm:$0xff]  }
 0x5b2   :  { %4070 = vmatprep.subr.bf16.mxu0 %v4250_v16 }
 0x5b3   :  { %v4403_v21 = vpop.eup %4402  ;;  %v1754_v61 = vmax.f32 %v1738_v32, 0.0  ;;  %4071 = vmatpush3.bf16.msra.mxu0 %v4250_v16 }
 0x5b4   :  { %v1701_v50 = vmul.f32 %v4403_v21, %v1653_v57 }
 0x5b5   :  { %v1765_v48 = vpack.c.bf16 %v1754_v61, %v1753_v18  ;;  %v4251_v61 = vld [vmem:[#allocation8 + $0x70] sm:$0xff]  }
 0x5b6   :  { %v1721_v55 = vmul.f32 %v5550_v39, %v1701_v50  ;;  %4072 = vmatprep.subr.bf16.mxu0 %v4251_v61 }
 0x5b7   :  { %v4405_v12 = vpop.eup %4404  ;;  %4062 = vmatprep.mubr.bf16.mxu1 %v1765_v48  ;;  %4073 = vmatpush3.bf16.msra.mxu0 %v4251_v61  ;;  %v4252_v48 = vld [vmem:[#allocation8 + $0x68] sm:$0xff]  }
 0x5b8   :  { %v4407_v49 = vpop.eup %4406  ;;  %4063 = vmatmul.mubr.bf16.gmra.mxu1 %v1766_v33  ;;  %v1703_v27 = vmul.f32 %v4405_v12, %v1655_v30  ;;  %v1741_v58 = vadd.f32 %v5560_v60, %v1721_v55  ;;  %4074 = vmatprep.subr.bf16.mxu0 %v4252_v48  ;;  %v4253_v12 = vld [vmem:[#allocation8 + $0x60] sm:$0xff]  }
 0x5b9   :  { %v1702_v63 = vmul.f32 %v4407_v49, %v1654_v11  ;;  %v4254_v49 = vld [vmem:[#allocation8 + $0x58] sm:$0xff]  }
 0x5ba   :  { %v1723_v9 = vmul.f32 %v5550_v39, %v1703_v27  ;;  %v1757_v28 = vmax.f32 %v1741_v58, 0.0  ;;  %v4256_v58 = vld [vmem:[#allocation8 + $0x48] sm:$0xff]  }
 0x5bb   :  { %v1722_v0 = vmul.f32 %v5550_v39, %v1702_v63  ;;  %4075 = vmatpush3.bf16.msra.mxu0 %v4252_v48 }
 0x5bc   :  { %v4409_v13 = vpop.eup %4408  ;;  %v1743_v45 = vadd.f32 %v5560_v60, %v1723_v9  ;;  %4076 = vmatprep.subr.bf16.mxu0 %v4253_v12 }
 0x5bd   :  { %v1704_v22 = vmul.f32 %v4409_v13, %v1656_v15  ;;  %v1742_v56 = vadd.f32 %v5560_v60, %v1722_v0  ;;  %v4255_v15 = vld [vmem:[#allocation8 + $0x50] sm:$0xff]  }
 0x5be   :  { %v1759_v47 = vmax.f32 %v1743_v45, 0.0 }
 0x5bf   :  { %v1724_v6 = vmul.f32 %v5550_v39, %v1704_v22  ;;  %v1758_v52 = vmax.f32 %v1742_v56, 0.0  ;;  %4077 = vmatpush3.bf16.msra.mxu0 %v4253_v12  ;;  %v4257_v56 = vld [vmem:[#allocation8 + $0x40] sm:$0xff]  }
 0x5c0   :  { %4078 = vmatprep.subr.bf16.mxu0 %v4254_v49 }
 0x5c1   :  { %v1744_v44 = vadd.f32 %v5560_v60, %v1724_v6  ;;  %v1767_v26 = vpack.c.bf16 %v1758_v52, %v1757_v28 }
 0x5c3   :  { %v1760_v40 = vmax.f32 %v1744_v44, 0.0  ;;  %4066 = vmatprep.mubr.bf16.mxu1 %v1767_v26  ;;  %4079 = vmatpush3.bf16.msra.mxu0 %v4254_v49 }
 0x5c4   :  { %4080 = vmatprep.subr.bf16.mxu0 %v4255_v15 }
 0x5c5   :  { %v1768_v37 = vpack.c.bf16 %v1760_v40, %v1759_v47 }
 0x5c7   :  { %4067 = vmatmul.mubr.bf16.gmra.mxu1 %v1768_v37  ;;  %4081 = vmatpush3.bf16.msra.mxu0 %v4255_v15 }
 0x5c8   :  { %4082 = vmatprep.subr.bf16.mxu0 %v4256_v58 }
 0x5cb   :  { %4083 = vmatpush3.bf16.msra.mxu0 %v4256_v58 }
 0x5cc   :  { %4084 = vmatprep.subr.bf16.mxu0 %v4257_v56 }
 0x5cf   :  { %4085 = vmatpush3.bf16.msra.mxu0 %v4257_v56 }
 0x655   :  { %v5648_v42 = vpop.f32.mrf.mxu1 }
 0x656   :  { %1935 = vadd.xlane.f32.xlu0 %v5648_v42  ;;  %v1981_v39 = vmul.f32 %v5648_v42, %v5648_v42 }
 0x657   :  { %v5651_v3 = vpop.f32.mrf.mxu1 }
 0x658   :  { %v1979_v31 = vmul.f32 %v5651_v3, %v5651_v3 }
 0x659   :  { %v5653_v5 = vpop.f32.mrf.mxu1 }
 0x65a   :  { %1931 = vadd.xlane.f32.xlu0 %v5651_v3  ;;  %1937 = vadd.xlane.f32.xlu1 %v5653_v5  ;;  %v1982_v46 = vmul.f32 %v5653_v5, %v5653_v5 }
 0x65b   :  { %v5659_v60 = vpop.f32.mrf.mxu1 }
 0x65c   :  { %v1980_v19 = vmul.f32 %v5659_v60, %v5659_v60 }
 0x65e   :  { %1999 = vadd.xlane.f32.xlu0 %v1981_v39  ;;  %1933 = vadd.xlane.f32.xlu1 %v5659_v60 }
 0x662   :  { %1995 = vadd.xlane.f32.xlu0 %v1979_v31  ;;  %2001 = vadd.xlane.f32.xlu1 %v1982_v46 }
 0x666   :  { %1997 = vadd.xlane.f32.xlu1 %v1980_v19 }
 0x667   :  { %v5668_v8 = vpop.f32.mrf.mxu1 }
 0x668   :  { %1943 = vadd.xlane.f32.xlu0 %v5668_v8  ;;  %v1985_v32 = vmul.f32 %v5668_v8, %v5668_v8 }
 0x669   :  { %v5671_v53 = vpop.f32.mrf.mxu1 }
 0x66a   :  { %v1983_v21 = vmul.f32 %v5671_v53, %v5671_v53 }
 0x66b   :  { %v5673_v7 = vpop.f32.mrf.mxu1 }
 0x66c   :  { %1939 = vadd.xlane.f32.xlu0 %v5671_v53  ;;  %1945 = vadd.xlane.f32.xlu1 %v5673_v7  ;;  %v1986_v18 = vmul.f32 %v5673_v7, %v5673_v7 }
 0x66d   :  { %v5679_v57 = vpop.f32.mrf.mxu1 }
 0x66e   :  { %v1984_v25 = vmul.f32 %v5679_v57, %v5679_v57 }
 0x670   :  { %2007 = vadd.xlane.f32.xlu0 %v1985_v32  ;;  %1941 = vadd.xlane.f32.xlu1 %v5679_v57 }
 0x674   :  { %2003 = vadd.xlane.f32.xlu0 %v1983_v21  ;;  %2009 = vadd.xlane.f32.xlu1 %v1986_v18 }
 0x678   :  { %v5688_v50 = vpop.f32.mrf.mxu1  ;;  %2005 = vadd.xlane.f32.xlu1 %v1984_v25 }
 0x679   :  { %1951 = vadd.xlane.f32.xlu0 %v5688_v50  ;;  %v1989_v11 = vmul.f32 %v5688_v50, %v5688_v50 }
 0x67a   :  { %v5691_v30 = vpop.f32.mrf.mxu1 }
 0x67b   :  { %v1987_v27 = vmul.f32 %v5691_v30, %v5691_v30 }
 0x67c   :  { %v5693_v33 = vpop.f32.mrf.mxu1 }
 0x67d   :  { %1947 = vadd.xlane.f32.xlu0 %v5691_v30  ;;  %1953 = vadd.xlane.f32.xlu1 %v5693_v33  ;;  %v1990_v63 = vmul.f32 %v5693_v33, %v5693_v33 }
 0x67e   :  { %v5699_v55 = vpop.f32.mrf.mxu1 }
 0x67f   :  { %v1988_v13 = vmul.f32 %v5699_v55, %v5699_v55 }
 0x681   :  { %2015 = vadd.xlane.f32.xlu0 %v1989_v11  ;;  %1949 = vadd.xlane.f32.xlu1 %v5699_v55 }
 0x685   :  { %2011 = vadd.xlane.f32.xlu0 %v1987_v27  ;;  %2017 = vadd.xlane.f32.xlu1 %v1990_v63 }
 0x687   :  { %v5706_v9 = vpop.f32.mrf.mxu1 }
 0x688   :  { %v1993_v28 = vmul.f32 %v5706_v9, %v5706_v9 }
 0x689   :  { %v5710_v0 = vpop.f32.mrf.mxu1  ;;  %2013 = vadd.xlane.f32.xlu1 %v1988_v13  ;;  %1959 = vadd.xlane.f32.xlu0 %v5706_v9 }
 0x68a   :  { %v1991_v6 = vmul.f32 %v5710_v0, %v5710_v0 }
 0x68b   :  { %v5713_v22 = vpop.f32.mrf.mxu1 }
 0x68c   :  { %v1994_v44 = vmul.f32 %v5713_v22, %v5713_v22 }
 0x68d   :  { %1955 = vadd.xlane.f32.xlu0 %v5710_v0  ;;  %1961 = vadd.xlane.f32.xlu1 %v5713_v22  ;;  %v5719_v45 = vpop.f32.mrf.mxu1 }
 0x68e   :  { %v1992_v52 = vmul.f32 %v5719_v45, %v5719_v45 }
 0x691   :  { %2019 = vadd.xlane.f32.xlu0 %v1991_v6  ;;  %1957 = vadd.xlane.f32.xlu1 %v5719_v45 }
 0x695   :  { %2023 = vadd.xlane.f32.xlu0 %v1993_v28  ;;  %2021 = vadd.xlane.f32.xlu1 %v1992_v52 }
 0x699   :  { %2025 = vadd.xlane.f32.xlu1 %v1994_v44 }
 0x6df   :  { %v1936_v26 = vpop.xlane.xlu0 %1935 }
 0x6e0   :  { %v1965_v37 = vmul.f32 0.010416667, %v1936_v26 }
 0x6e2   :  { %v2045_v19 = vmul.f32 %v1965_v37, %v1965_v37 }
 0x6e3   :  { %v1932_v47 = vpop.xlane.xlu0 %1931  ;;  %v1938_v40 = vpop.xlane.xlu1 %1937 }
 0x6e4   :  { %v1963_v39 = vmul.f32 0.010416667, %v1932_v47  ;;  %v1966_v32 = vmul.f32 0.010416667, %v1938_v40 }
 0x6e6   :  { %v2043_v18 = vmul.f32 %v1963_v39, %v1963_v39  ;;  %v2046_v12 = vmul.f32 %v1966_v32, %v1966_v32 }
 0x6e7   :  { %v2000_v31 = vpop.xlane.xlu0 %1999  ;;  %v1934_v46 = vpop.xlane.xlu1 %1933 }
 0x6e8   :  { %v2029_v16 = vmul.f32 0.010416667, %v2000_v31  ;;  %v5728_v61 = vmul.f32 0.010416667, %v1934_v46 }
 0x6ea   :  { %v2061_v21 = vsub.f32 %v2029_v16, %v2045_v19  ;;  %v2044_v58 = vmul.f32 %v5728_v61, %v5728_v61 }
 0x6eb   :  { %v1996_v25 = vpop.xlane.xlu0 %1995  ;;  %v2002_v48 = vpop.xlane.xlu1 %2001 }
 0x6ec   :  { %v2093_v11 = vadd.f32 1e-05, %v2061_v21  ;;  %v2027_v49 = vmul.f32 0.010416667, %v1996_v25  ;;  %v2030_v27 = vmul.f32 0.010416667, %v2002_v48 }
 0x6ee   :  { %v2059_v63 = vsub.f32 %v2027_v49, %v2043_v18  ;;  %v2062_v15 = vsub.f32 %v2030_v27, %v2046_v12  ;;  %4410 = vrsqrt.f32 %v2093_v11  ;;  %v2077_v11 = vsub.f32 %v5648_v42, %v1965_v37 }
 0x6ef   :  { %v1998_v13 = vpop.xlane.xlu1 %1997  ;;  %v2075_v49 = vsub.f32 %v5651_v3, %v1963_v39 }
 0x6f0   :  { %v2091_v56 = vadd.f32 1e-05, %v2059_v63  ;;  %v2094_v6 = vadd.f32 1e-05, %v2062_v15  ;;  %v2028_v28 = vmul.f32 0.010416667, %v1998_v13 }
 0x6f1   :  { %v1944_v52 = vpop.xlane.xlu0 %1943 }
 0x6f2   :  { %4412 = vrsqrt.f32 %v2091_v56  ;;  %v2060_v44 = vsub.f32 %v2028_v28, %v2044_v58  ;;  %v5732_v31 = vmul.f32 0.010416667, %v1944_v52  ;;  %v2078_v52 = vsub.f32 %v5653_v5, %v1966_v32 }
 0x6f3   :  { %4414 = vrsqrt.f32 %v2094_v6 }
 0x6f4   :  { %v2092_v26 = vadd.f32 1e-05, %v2060_v44  ;;  %v2049_v21 = vmul.f32 %v5732_v31, %v5732_v31 }
 0x6f5   :  { %v1940_v47 = vpop.xlane.xlu0 %1939  ;;  %v1946_v40 = vpop.xlane.xlu1 %1945 }
 0x6f6   :  { %4416 = vrsqrt.f32 %v2092_v26  ;;  %v5734_v46 = vmul.f32 0.010416667, %v1940_v47  ;;  %v5738_v18 = vmul.f32 0.010416667, %v1946_v40  ;;  %v6499_v26 = vld [vmem:[#allocation20_spill] sm:$0xff] }
 0x6f7   :  { %v5751_v42 = vrot.slane %v5537_v2, %v6499_v26 }
 0x6f8   :  { %v2047_v27 = vmul.f32 %v5734_v46, %v5734_v46  ;;  %v2050_v13 = vmul.f32 %v5738_v18, %v5738_v18 }
 0x6f9   :  { %v2008_v19 = vpop.xlane.xlu0 %2007  ;;  %v1942_v16 = vpop.xlane.xlu1 %1941 }
 0x6fa   :  { %v2033_v25 = vmul.f32 0.010416667, %v2008_v19  ;;  %v5747_v44 = vmul.f32 0.010416667, %v1942_v16 }
 0x6fb   :  { %v4411_v48 = vpop.eup %4410 }
 0x6fc   :  { %v2065_v12 = vsub.f32 %v2033_v25, %v2049_v21  ;;  %v2125_v3 = vmul.f32 %v4411_v48, %v2077_v11  ;;  %v2048_v16 = vmul.f32 %v5747_v44, %v5747_v44 }
 0x6fd   :  { %v2004_v63 = vpop.xlane.xlu0 %2003  ;;  %v2010_v15 = vpop.xlane.xlu1 %2009 }
 0x6fe   :  { %v2097_v58 = vadd.f32 1e-05, %v2065_v12  ;;  %v2031_v56 = vmul.f32 0.010416667, %v2004_v63  ;;  %v2034_v6 = vmul.f32 0.010416667, %v2010_v15  ;;  %v2076_v12 = vsub.f32 %v5659_v60, %v5728_v61 }
 0x6ff   :  { %v4413_v28 = vpop.eup %4412 }
 0x700   :  { %v4415_v37 = vpop.eup %4414  ;;  %4418 = vrsqrt.f32 %v2097_v58  ;;  %v2063_v39 = vsub.f32 %v2031_v56, %v2047_v27  ;;  %v2066_v47 = vsub.f32 %v2034_v6, %v2050_v13  ;;  %v2123_v40 = vmul.f32 %v4413_v28, %v2075_v49 }
 0x701   :  { %v2006_v21 = vpop.xlane.xlu1 %2005  ;;  %v2126_v25 = vmul.f32 %v4415_v37, %v2078_v52  ;;  %v5761_v49 = vrot.slane %v5537_v2, %v5330_v38  ;;  %v2145_v13 = vmul.f32 %v5751_v42, %v2125_v3 }
 0x702   :  { %v1952_v19 = vpop.xlane.xlu0 %1951  ;;  %v2095_v63 = vadd.f32 1e-05, %v2063_v39  ;;  %v2098_v5 = vadd.f32 1e-05, %v2066_v47  ;;  %v2032_v15 = vmul.f32 0.010416667, %v2006_v21  ;;  %v2143_v48 = vmul.f32 %v5751_v42, %v2123_v40 }
 0x703   :  { %v4417_v32 = vpop.eup %4416  ;;  %v2146_v11 = vmul.f32 %v5751_v42, %v2126_v25  ;;  %v5764_v56 = vmul.f32 0.010416667, %v1952_v19  ;;  %v2165_v39 = vadd.f32 %v5761_v49, %v2145_v13 }
 0x704   :  { %4420 = vrsqrt.f32 %v2095_v63  ;;  %v2124_v27 = vmul.f32 %v4417_v32, %v2076_v12  ;;  %v2064_v60 = vsub.f32 %v2032_v15, %v2048_v16  ;;  %v2163_v37 = vadd.f32 %v5761_v49, %v2143_v48 }
 0x705   :  { %4422 = vrsqrt.f32 %v2098_v5  ;;  %v2166_v28 = vadd.f32 %v5761_v49, %v2146_v11  ;;  %v2053_v19 = vmul.f32 %v5764_v56, %v5764_v56  ;;  %v2181_v16 = vmax.f32 %v2165_v39, 0.0 }
 0x706   :  { %v1948_v61 = vpop.xlane.xlu0 %1947  ;;  %v1954_v58 = vpop.xlane.xlu1 %1953  ;;  %v2144_v6 = vmul.f32 %v5751_v42, %v2124_v27  ;;  %v2096_v52 = vadd.f32 1e-05, %v2064_v60  ;;  %v2179_v63 = vmax.f32 %v2163_v37, 0.0  ;;  %v2081_v48 = vsub.f32 %v5668_v8, %v5732_v31 }
 0x707   :  { %v5770_v2 = vmul.f32 0.010416667, %v1948_v61  ;;  %v5772_v47 = vmul.f32 0.010416667, %v1954_v58  ;;  %v2182_v12 = vmax.f32 %v2166_v28, 0.0  ;;  %v2079_v39 = vsub.f32 %v5671_v53, %v5734_v46 }
 0x708   :  { %4424 = vrsqrt.f32 %v2096_v52  ;;  %v2164_v21 = vadd.f32 %v5761_v49, %v2144_v6  ;;  %v2080_v46 = vsub.f32 %v5679_v57, %v5747_v44 }
 0x709   :  { %v2051_v11 = vmul.f32 %v5770_v2, %v5770_v2  ;;  %v2054_v27 = vmul.f32 %v5772_v47, %v5772_v47  ;;  %v2196_v52 = vpack.c.bf16 %v2182_v12, %v2181_v16 }
 0x70a   :  { %v2016_v3 = vpop.xlane.xlu0 %2015  ;;  %v1950_v40 = vpop.xlane.xlu1 %1949  ;;  %v2180_v5 = vmax.f32 %v2164_v21, 0.0 }
 0x70b   :  { %v2037_v25 = vmul.f32 0.010416667, %v2016_v3  ;;  %v5783_v37 = vmul.f32 0.010416667, %v1950_v40 }
 0x70c   :  { %v2195_v61 = vpack.c.bf16 %v2180_v5, %v2179_v63 }
 0x70d   :  { %v2069_v32 = vsub.f32 %v2037_v25, %v2053_v19  ;;  %v4419_v15 = vpop.eup %4418  ;;  %v2082_v19 = vsub.f32 %v5673_v7, %v5738_v18  ;;  %v2052_v16 = vmul.f32 %v5783_v37, %v5783_v37 }
 0x70e   :  { %v2012_v13 = vpop.xlane.xlu0 %2011  ;;  %v2018_v60 = vpop.xlane.xlu1 %2017  ;;  %4086 = vmatprep.mubr.bf16.mxu0 %v2195_v61  ;;  %v2129_v3 = vmul.f32 %v4419_v15, %v2081_v48 }
 0x70f   :  { %v2101_v58 = vadd.f32 1e-05, %v2069_v32  ;;  %v2035_v6 = vmul.f32 0.010416667, %v2012_v13  ;;  %v2038_v28 = vmul.f32 0.010416667, %v2018_v60  ;;  %4087 = vmatmul.mubr.bf16.vlgmr.msra.gmra.mxu0 %v2196_v52 }
 0x710   :  { %v2149_v15 = vmul.f32 %v5751_v42, %v2129_v3 }
 0x711   :  { %v2067_v8 = vsub.f32 %v2035_v6, %v2051_v11  ;;  %v2070_v31 = vsub.f32 %v2038_v28, %v2054_v27  ;;  %v4421_v21 = vpop.eup %4420  ;;  %4426 = vrsqrt.f32 %v2101_v58 }
 0x712   :  { %v1960_v25 = vpop.xlane.xlu0 %1959  ;;  %v2014_v63 = vpop.xlane.xlu1 %2013  ;;  %v2127_v40 = vmul.f32 %v4421_v21, %v2079_v39 }
 0x713   :  { %v4423_v5 = vpop.eup %4422  ;;  %v2099_v32 = vadd.f32 1e-05, %v2067_v8  ;;  %v2102_v12 = vadd.f32 1e-05, %v2070_v31  ;;  %v2036_v13 = vmul.f32 0.010416667, %v2014_v63  ;;  %v2169_v31 = vadd.f32 %v5761_v49, %v2149_v15 }
 0x714   :  { %v2130_v53 = vmul.f32 %v4423_v5, %v2082_v19  ;;  %v2147_v11 = vmul.f32 %v5751_v42, %v2127_v40  ;;  %v5798_v28 = vmul.f32 0.010416667, %v1960_v25 }
 0x715   :  { %4428 = vrsqrt.f32 %v2099_v32  ;;  %v2068_v7 = vsub.f32 %v2036_v13, %v2052_v16  ;;  %v4425_v60 = vpop.eup %4424 }
 0x716   :  { %4430 = vrsqrt.f32 %v2102_v12  ;;  %v1956_v18 = vpop.xlane.xlu0 %1955  ;;  %v1962_v48 = vpop.xlane.xlu1 %1961  ;;  %v2150_v27 = vmul.f32 %v5751_v42, %v2130_v53  ;;  %v2128_v6 = vmul.f32 %v4425_v60, %v2080_v46  ;;  %v2167_v8 = vadd.f32 %v5761_v49, %v2147_v11 }
 0x717   :  { %v5796_v61 = vmul.f32 0.010416667, %v1956_v18  ;;  %v2100_v58 = vadd.f32 1e-05, %v2068_v7  ;;  %v2057_v63 = vmul.f32 %v5798_v28, %v5798_v28  ;;  %v5811_v12 = vmul.f32 0.010416667, %v1962_v48 }
 0x718   :  { %v2170_v57 = vadd.f32 %v5761_v49, %v2150_v27  ;;  %v2148_v39 = vmul.f32 %v5751_v42, %v2128_v6  ;;  %v2183_v13 = vmax.f32 %v2167_v8, 0.0  ;;  %v2185_v46 = vmax.f32 %v2169_v31, 0.0 }
 0x719   :  { %4432 = vrsqrt.f32 %v2100_v58  ;;  %v2055_v3 = vmul.f32 %v5796_v61, %v5796_v61  ;;  %v2085_v60 = vsub.f32 %v5688_v50, %v5764_v56  ;;  %v2083_v58 = vsub.f32 %v5691_v30, %v5770_v2 }
 0x71a   :  { %v2020_v44 = vpop.xlane.xlu0 %2019  ;;  %v1958_v52 = vpop.xlane.xlu1 %1957  ;;  %v2168_v25 = vadd.f32 %v5761_v49, %v2148_v39  ;;  %v2186_v32 = vmax.f32 %v2170_v57, 0.0  ;;  %v2086_v39 = vsub.f32 %v5693_v33, %v5772_v47  ;;  %v2058_v8 = vmul.f32 %v5811_v12, %v5811_v12 }
 0x71b   :  { %v2039_v21 = vmul.f32 0.010416667, %v2020_v44  ;;  %v5806_v19 = vmul.f32 0.010416667, %v1958_v52 }
 0x71c   :  { %v2184_v53 = vmax.f32 %v2168_v25, 0.0  ;;  %v2198_v44 = vpack.c.bf16 %v2186_v32, %v2185_v46 }
 0x71d   :  { %v2071_v5 = vsub.f32 %v2039_v21, %v2055_v3  ;;  %v2056_v18 = vmul.f32 %v5806_v19, %v5806_v19 }
 0x71e   :  { %v2024_v40 = vpop.xlane.xlu0 %2023  ;;  %v2022_v16 = vpop.xlane.xlu1 %2021  ;;  %v2197_v48 = vpack.c.bf16 %v2184_v53, %v2183_v13 }
 0x71f   :  { %v4427_v15 = vpop.eup %4426  ;;  %v2103_v7 = vadd.f32 1e-05, %v2071_v5  ;;  %v2041_v11 = vmul.f32 0.010416667, %v2024_v40  ;;  %v2040_v27 = vmul.f32 0.010416667, %v2022_v16  ;;  %v2084_v5 = vsub.f32 %v5699_v55, %v5783_v37 }
 0x720   :  { %4090 = vmatprep.mubr.bf16.mxu0 %v2197_v48  ;;  %v2133_v3 = vmul.f32 %v4427_v15, %v2085_v60  ;;  %v2087_v37 = vsub.f32 %v5710_v0, %v5796_v61 }
 0x721   :  { %4434 = vrsqrt.f32 %v2103_v7  ;;  %v2073_v6 = vsub.f32 %v2041_v11, %v2057_v63  ;;  %v2072_v57 = vsub.f32 %v2040_v27, %v2056_v18  ;;  %4091 = vmatmul.mubr.bf16.gmra.mxu0 %v2198_v44 }
 0x722   :  { %v4429_v52 = vpop.eup %4428  ;;  %v2026_v31 = vpop.xlane.xlu1 %2025  ;;  %v2153_v16 = vmul.f32 %v5751_v42, %v2133_v3  ;;  %v2090_v3 = vsub.f32 %v5713_v22, %v5811_v12 }
 0x723   :  { %v4431_v21 = vpop.eup %4430  ;;  %v2105_v50 = vadd.f32 1e-05, %v2073_v6  ;;  %v2104_v56 = vadd.f32 1e-05, %v2072_v57  ;;  %v2042_v30 = vmul.f32 0.010416667, %v2026_v31  ;;  %v2131_v2 = vmul.f32 %v4429_v52, %v2083_v58 }
 0x724   :  { %v2134_v25 = vmul.f32 %v4431_v21, %v2086_v39  ;;  %v2173_v7 = vadd.f32 %v5761_v49, %v2153_v16  ;;  %v2089_v57 = vsub.f32 %v5706_v9, %v5798_v28  ;;  %v2088_v39 = vsub.f32 %v5719_v45, %v5806_v19 }
 0x725   :  { %4436 = vrsqrt.f32 %v2105_v50  ;;  %v2074_v63 = vsub.f32 %v2042_v30, %v2058_v8  ;;  %v2151_v33 = vmul.f32 %v5751_v42, %v2131_v2 }
 0x726   :  { %4438 = vrsqrt.f32 %v2104_v56  ;;  %v2154_v47 = vmul.f32 %v5751_v42, %v2134_v25  ;;  %v4433_v32 = vpop.eup %4432  ;;  %v2189_v58 = vmax.f32 %v2173_v7, 0.0 }
 0x727   :  { %v2106_v40 = vadd.f32 1e-05, %v2074_v63  ;;  %v2132_v13 = vmul.f32 %v4433_v32, %v2084_v5  ;;  %v2171_v15 = vadd.f32 %v5761_v49, %v2151_v33 }
 0x728   :  { %v2174_v53 = vadd.f32 %v5761_v49, %v2154_v47 }
 0x729   :  { %4440 = vrsqrt.f32 %v2106_v40  ;;  %v2152_v46 = vmul.f32 %v5751_v42, %v2132_v13  ;;  %v2187_v27 = vmax.f32 %v2171_v15, 0.0 }
 0x72a   :  { %v2190_v18 = vmax.f32 %v2174_v53, 0.0 }
 0x72b   :  { %v2172_v55 = vadd.f32 %v5761_v49, %v2152_v46 }
 0x72c   :  { %v2200_v44 = vpack.c.bf16 %v2190_v18, %v2189_v58 }
 0x72d   :  { %v2188_v60 = vmax.f32 %v2172_v55, 0.0 }
 0x72e   :  { %v4435_v11 = vpop.eup %4434 }
 0x72f   :  { %v2135_v48 = vmul.f32 %v4435_v11, %v2087_v37  ;;  %v2199_v6 = vpack.c.bf16 %v2188_v60, %v2187_v27 }
 0x731   :  { %4094 = vmatprep.mubr.bf16.mxu0 %v2199_v6  ;;  %v2155_v8 = vmul.f32 %v5751_v42, %v2135_v48 }
 0x732   :  { %v4437_v52 = vpop.eup %4436  ;;  %4095 = vmatmul.mubr.bf16.gmra.mxu0 %v2200_v44 }
 0x733   :  { %v4439_v31 = vpop.eup %4438  ;;  %v2137_v0 = vmul.f32 %v4437_v52, %v2089_v57  ;;  %v2175_v28 = vadd.f32 %v5761_v49, %v2155_v8 }
 0x734   :  { %v2136_v61 = vmul.f32 %v4439_v31, %v2088_v39  ;;  %v4258_v39 = vld [vmem:[#allocation7 + $0xb8] sm:$0xff]   ;;  %v4259_v31 = vld [vmem:[#allocation7 + $0xb0] sm:$0xff]  }
 0x735   :  { %v2157_v21 = vmul.f32 %v5751_v42, %v2137_v0  ;;  %v2191_v2 = vmax.f32 %v2175_v28, 0.0  ;;  %4102 = vmatprep.subr.bf16.mxu1 %v4258_v39  ;;  %v4260_v28 = vld [vmem:[#allocation7 + $0xa8] sm:$0xff]  }
 0x736   :  { %v4441_v50 = vpop.eup %4440  ;;  %v2156_v9 = vmul.f32 %v5751_v42, %v2136_v61  ;;  %4103 = vmatpush3.bf16.msra.mxu1 %v4258_v39 }
 0x737   :  { %v2138_v56 = vmul.f32 %v4441_v50, %v2090_v3  ;;  %v2177_v30 = vadd.f32 %v5761_v49, %v2157_v21  ;;  %4104 = vmatprep.subr.bf16.mxu1 %v4259_v31 }
 0x738   :  { %v2176_v45 = vadd.f32 %v5761_v49, %v2156_v9 }
 0x739   :  { %v2158_v19 = vmul.f32 %v5751_v42, %v2138_v56  ;;  %v2193_v22 = vmax.f32 %v2177_v30, 0.0 }
 0x73a   :  { %v2192_v25 = vmax.f32 %v2176_v45, 0.0  ;;  %4105 = vmatpush3.bf16.msra.mxu1 %v4259_v31 }
 0x73b   :  { %v2178_v63 = vadd.f32 %v5761_v49, %v2158_v19  ;;  %4106 = vmatprep.subr.bf16.mxu1 %v4260_v28 }
 0x73c   :  { %v2201_v5 = vpack.c.bf16 %v2192_v25, %v2191_v2  ;;  %v4262_v25 = vld [vmem:[#allocation7 + $0x98] sm:$0xff]  }
 0x73d   :  { %v2194_v12 = vmax.f32 %v2178_v63, 0.0 }
 0x73e   :  { %4098 = vmatprep.mubr.bf16.mxu0 %v2201_v5  ;;  %4107 = vmatpush3.bf16.msra.mxu1 %v4260_v28 }
 0x73f   :  { %v2202_v33 = vpack.c.bf16 %v2194_v12, %v2193_v22 }
 0x741   :  { %4099 = vmatmul.mubr.bf16.gmra.mxu0 %v2202_v33 }
 0x7cf   :  { %v4088_v47 = vpop.f32.mrf.mxu0 }
 0x7d0   :  { %v2311_v32 = vadd.f32 %v4088_v47, %v5430_v14  ;;  %v4263_v47 = vld [vmem:[#allocation7 + $0x90] sm:$0xff]  }
 0x7d1   :  { %v2302_v40 = vpop.f32.mrf.mxu0 }
 0x7d2   :  { %v5850_v16 = vmax.f32 %v2311_v32, 0.0  ;;  %v2303_v42 = vadd.f32 %v2302_v40, %v5435_v23 }
 0x7d3   :  { %v4089_v13 = vpop.f32.mrf.mxu0 }
 0x7d4   :  { %v2314_v53 = vadd.f32 %v4089_v13, %v5437_v59  ;;  %2387 = vadd.xlane.f32.xlu0 %v5850_v16  ;;  %v5855_v46 = vmax.f32 %v2303_v42, 0.0  ;;  %v2433_v23 = vmul.f32 %v5850_v16, %v5850_v16 }
 0x7d5   :  { %v2305_v49 = vpop.f32.mrf.mxu0 }
 0x7d6   :  { %v5857_v15 = vmax.f32 %v2314_v53, 0.0  ;;  %v2306_v7 = vadd.f32 %v2305_v49, %v5442_v17  ;;  %v2431_v55 = vmul.f32 %v5855_v46, %v5855_v46  ;;  %v4264_v49 = vld [vmem:[#allocation7 + $0x88] sm:$0xff]  }
 0x7d8   :  { %2389 = vadd.xlane.f32.xlu1 %v5857_v15  ;;  %2383 = vadd.xlane.f32.xlu0 %v5855_v46  ;;  %v5862_v14 = vmax.f32 %v2306_v7, 0.0  ;;  %v2434_v59 = vmul.f32 %v5857_v15, %v5857_v15 }
 0x7da   :  { %v2432_v18 = vmul.f32 %v5862_v14, %v5862_v14 }
 0x7dc   :  { %2385 = vadd.xlane.f32.xlu1 %v5862_v14  ;;  %2451 = vadd.xlane.f32.xlu0 %v2433_v23 }
 0x7e0   :  { %2453 = vadd.xlane.f32.xlu1 %v2434_v59  ;;  %2447 = vadd.xlane.f32.xlu0 %v2431_v55 }
 0x7e1   :  { %v4092_v17 = vpop.f32.mrf.mxu0 }
 0x7e2   :  { %v2327_v37 = vadd.f32 %v4092_v17, %v5454_v62 }
 0x7e3   :  { %v2318_v11 = vpop.f32.mrf.mxu0 }
 0x7e4   :  { %v5874_v27 = vmax.f32 %v2327_v37, 0.0  ;;  %v2319_v60 = vadd.f32 %v2318_v11, %v5459_v1  ;;  %2449 = vadd.xlane.f32.xlu1 %v2432_v18 }
 0x7e5   :  { %v4093_v58 = vpop.f32.mrf.mxu0 }
 0x7e6   :  { %v2330_v48 = vadd.f32 %v4093_v58, %v5461_v34  ;;  %2395 = vadd.xlane.f32.xlu0 %v5874_v27  ;;  %v5879_v57 = vmax.f32 %v2319_v60, 0.0  ;;  %v2437_v1 = vmul.f32 %v5874_v27, %v5874_v27 }
 0x7e7   :  { %v2321_v6 = vpop.f32.mrf.mxu0 }
 0x7e8   :  { %v5881_v44 = vmax.f32 %v2330_v48, 0.0  ;;  %v2322_v62 = vadd.f32 %v2321_v6, %v5466_v29  ;;  %v2435_v29 = vmul.f32 %v5879_v57, %v5879_v57 }
 0x7ea   :  { %2397 = vadd.xlane.f32.xlu1 %v5881_v44  ;;  %2391 = vadd.xlane.f32.xlu0 %v5879_v57  ;;  %v5886_v52 = vmax.f32 %v2322_v62, 0.0  ;;  %v2438_v34 = vmul.f32 %v5881_v44, %v5881_v44 }
 0x7ec   :  { %v2436_v50 = vmul.f32 %v5886_v52, %v5886_v52 }
 0x7ee   :  { %2393 = vadd.xlane.f32.xlu1 %v5886_v52  ;;  %2459 = vadd.xlane.f32.xlu0 %v2437_v1 }
 0x7f2   :  { %v4096_v8 = vpop.f32.mrf.mxu0  ;;  %2461 = vadd.xlane.f32.xlu1 %v2438_v34  ;;  %2455 = vadd.xlane.f32.xlu0 %v2435_v29 }
 0x7f3   :  { %v2343_v0 = vadd.f32 %v4096_v8, %v5476_v24 }
 0x7f4   :  { %v2334_v61 = vpop.f32.mrf.mxu0 }
 0x7f5   :  { %v5896_v3 = vmax.f32 %v2343_v0, 0.0  ;;  %v2335_v21 = vadd.f32 %v2334_v61, %v5485_v20  ;;  %v4261_v20 = vld [vmem:[#allocation7 + $0xa0] sm:$0xff]  }
 0x7f6   :  { %v4097_v9 = vpop.f32.mrf.mxu0  ;;  %2457 = vadd.xlane.f32.xlu1 %v2436_v50  ;;  %4108 = vmatprep.subr.bf16.mxu1 %v4261_v20 }
 0x7f7   :  { %v2346_v56 = vadd.f32 %v4097_v9, %v5483_v10  ;;  %2403 = vadd.xlane.f32.xlu0 %v5896_v3  ;;  %v5903_v45 = vmax.f32 %v2335_v21, 0.0  ;;  %v2441_v10 = vmul.f32 %v5896_v3, %v5896_v3  ;;  %4109 = vmatpush3.bf16.msra.mxu1 %v4261_v20 }
 0x7f8   :  { %v2337_v24 = vpop.f32.mrf.mxu0  ;;  %4110 = vmatprep.subr.bf16.mxu1 %v4262_v25 }
 0x7f9   :  { %v5905_v19 = vmax.f32 %v2346_v56, 0.0  ;;  %v2338_v30 = vadd.f32 %v2337_v24, %v5490_v51  ;;  %v2439_v22 = vmul.f32 %v5903_v45, %v5903_v45 }
 0x7fb   :  { %2405 = vadd.xlane.f32.xlu1 %v5905_v19  ;;  %2399 = vadd.xlane.f32.xlu0 %v5903_v45  ;;  %v5910_v2 = vmax.f32 %v2338_v30, 0.0  ;;  %v2442_v5 = vmul.f32 %v5905_v19, %v5905_v19 }
 0x7fc   :  { %4111 = vmatpush3.bf16.msra.mxu1 %v4262_v25 }
 0x7fd   :  { %4112 = vmatprep.subr.bf16.mxu1 %v4263_v47 }
 0x7ff   :  { %2401 = vadd.xlane.f32.xlu1 %v5910_v2  ;;  %2467 = vadd.xlane.f32.xlu0 %v2441_v10 }
 0x800   :  { %4113 = vmatpush3.bf16.msra.mxu1 %v4263_v47 }
 0x801   :  { %v4100_v63 = vpop.f32.mrf.mxu0  ;;  %4114 = vmatprep.subr.bf16.mxu1 %v4264_v49 }
 0x802   :  { %v2359_v51 = vadd.f32 %v4100_v63, %v5500_v41  ;;  %v2440_v41 = vmul.f32 %v5910_v2, %v5910_v2 }
 0x803   :  { %v2350_v12 = vpop.f32.mrf.mxu0  ;;  %2469 = vadd.xlane.f32.xlu1 %v2442_v5  ;;  %2463 = vadd.xlane.f32.xlu0 %v2439_v22 }
 0x804   :  { %v5920_v33 = vmax.f32 %v2359_v51, 0.0  ;;  %v2351_v40 = vadd.f32 %v2350_v12, %v5509_v54  ;;  %4115 = vmatpush3.bf16.msra.mxu1 %v4264_v49 }
 0x805   :  { %v4101_v32 = vpop.f32.mrf.mxu0 }
 0x806   :  { %v2362_v42 = vadd.f32 %v4101_v32, %v5506_v43  ;;  %v5929_v7 = vmax.f32 %v2351_v40, 0.0  ;;  %v4265_v43 = vld [vmem:[#allocation7 + $0x80] sm:$0xff]   ;;  %v2445_v55 = vmul.f32 %v5920_v33, %v5920_v33 }
 0x807   :  { %v2353_v13 = vpop.f32.mrf.mxu0  ;;  %2465 = vadd.xlane.f32.xlu1 %v2440_v41  ;;  %2411 = vadd.xlane.f32.xlu0 %v5920_v33 }
 0x808   :  { %v5926_v53 = vmax.f32 %v2362_v42, 0.0  ;;  %v2354_v23 = vadd.f32 %v2353_v13, %v5514_v35  ;;  %v2443_v59 = vmul.f32 %v5929_v7, %v5929_v7  ;;  %4116 = vmatprep.subr.bf16.mxu1 %v4265_v43 }
 0x809   :  { %4117 = vmatpush3.bf16.msra.mxu1 %v4265_v43 }
 0x80a   :  { %v5934_v54 = vmax.f32 %v2354_v23, 0.0  ;;  %v2446_v17 = vmul.f32 %v5926_v53, %v5926_v53 }
 0x80b   :  { %2413 = vadd.xlane.f32.xlu1 %v5926_v53  ;;  %2407 = vadd.xlane.f32.xlu0 %v5929_v7 }
 0x80c   :  { %v2444_v35 = vmul.f32 %v5934_v54, %v5934_v54 }
 0x80f   :  { %2409 = vadd.xlane.f32.xlu1 %v5934_v54  ;;  %2471 = vadd.xlane.f32.xlu0 %v2443_v59  ;;  %v5957_v59 = vld [vmem:[#allocation11 + $0x10] sm:$0xff] }
 0x813   :  { %2473 = vadd.xlane.f32.xlu1 %v2444_v35  ;;  %2475 = vadd.xlane.f32.xlu0 %v2445_v55 }
 0x817   :  { %2477 = vadd.xlane.f32.xlu1 %v2446_v17 }
 0x85d   :  { %v2388_v37 = vpop.xlane.xlu0 %2387 }
 0x85e   :  { %v2417_v60 = vmul.f32 0.010416667, %v2388_v37 }
 0x860   :  { %v2497_v62 = vmul.f32 %v2417_v60, %v2417_v60  ;;  %v2529_v35 = vsub.f32 %v5850_v16, %v2417_v60  ;;  %v5970_v60 = vrot.slane %v5957_v59, %v5096_v36 }
 0x861   :  { %v2384_v18 = vpop.xlane.xlu0 %2383  ;;  %v2390_v11 = vpop.xlane.xlu1 %2389 }
 0x862   :  { %v2415_v58 = vmul.f32 0.010416667, %v2384_v18  ;;  %v2418_v1 = vmul.f32 0.010416667, %v2390_v11 }
 0x864   :  { %v2495_v29 = vmul.f32 %v2415_v58, %v2415_v58  ;;  %v2498_v61 = vmul.f32 %v2418_v1, %v2418_v1  ;;  %v2527_v55 = vsub.f32 %v5855_v46, %v2415_v58 }
 0x865   :  { %v2452_v48 = vpop.xlane.xlu0 %2451  ;;  %v2386_v6 = vpop.xlane.xlu1 %2385 }
 0x866   :  { %v2481_v39 = vmul.f32 0.010416667, %v2452_v48  ;;  %v5945_v8 = vmul.f32 0.010416667, %v2386_v6 }
 0x868   :  { %v2513_v34 = vsub.f32 %v2481_v39, %v2497_v62  ;;  %v2496_v30 = vmul.f32 %v5945_v8, %v5945_v8 }
 0x869   :  { %v2448_v31 = vpop.xlane.xlu0 %2447  ;;  %v2454_v0 = vpop.xlane.xlu1 %2453 }
 0x86a   :  { %v2545_v21 = vadd.f32 1e-05, %v2513_v34  ;;  %v2479_v50 = vmul.f32 0.010416667, %v2448_v31  ;;  %v2482_v9 = vmul.f32 0.010416667, %v2454_v0  ;;  %v2530_v34 = vsub.f32 %v5857_v15, %v2418_v1 }
 0x86c   :  { %v2511_v28 = vsub.f32 %v2479_v50, %v2495_v29  ;;  %v2514_v56 = vsub.f32 %v2482_v9, %v2498_v61  ;;  %4442 = vrsqrt.f32 %v2545_v21 }
 0x86d   :  { %v2450_v24 = vpop.xlane.xlu1 %2449 }
 0x86e   :  { %v2543_v20 = vadd.f32 1e-05, %v2511_v28  ;;  %v2546_v10 = vadd.f32 1e-05, %v2514_v56  ;;  %v2480_v25 = vmul.f32 0.010416667, %v2450_v24  ;;  %v2528_v56 = vsub.f32 %v5862_v14, %v5945_v8 }
 0x86f   :  { %v2396_v63 = vpop.xlane.xlu0 %2395 }
 0x870   :  { %4444 = vrsqrt.f32 %v2543_v20  ;;  %v2512_v51 = vsub.f32 %v2480_v25, %v2496_v30  ;;  %v5949_v47 = vmul.f32 0.010416667, %v2396_v63 }
 0x871   :  { %4446 = vrsqrt.f32 %v2546_v10 }
 0x872   :  { %v2544_v5 = vadd.f32 1e-05, %v2512_v51  ;;  %v2501_v41 = vmul.f32 %v5949_v47, %v5949_v47  ;;  %v5980_v51 = vrot.slane %v5957_v59, %v5101_v4 }
 0x873   :  { %v2392_v22 = vpop.xlane.xlu0 %2391  ;;  %v2398_v12 = vpop.xlane.xlu1 %2397 }
 0x874   :  { %4448 = vrsqrt.f32 %v2544_v5  ;;  %v5951_v32 = vmul.f32 0.010416667, %v2392_v22  ;;  %v5955_v13 = vmul.f32 0.010416667, %v2398_v12 }
 0x876   :  { %v2499_v17 = vmul.f32 %v5951_v32, %v5951_v32  ;;  %v2502_v11 = vmul.f32 %v5955_v13, %v5955_v13 }
 0x877   :  { %v2460_v40 = vpop.xlane.xlu0 %2459  ;;  %v2394_v42 = vpop.xlane.xlu1 %2393 }
 0x878   :  { %v2485_v49 = vmul.f32 0.010416667, %v2460_v40  ;;  %v5966_v31 = vmul.f32 0.010416667, %v2394_v42 }
 0x879   :  { %v4443_v23 = vpop.eup %4442 }
 0x87a   :  { %v2517_v43 = vsub.f32 %v2485_v49, %v2501_v41  ;;  %v2577_v29 = vmul.f32 %v4443_v23, %v2529_v35  ;;  %v2500_v20 = vmul.f32 %v5966_v31, %v5966_v31 }
 0x87b   :  { %v2456_v37 = vpop.xlane.xlu0 %2455  ;;  %v2462_v18 = vpop.xlane.xlu1 %2461 }
 0x87c   :  { %v2549_v48 = vadd.f32 1e-05, %v2517_v43  ;;  %v2483_v6 = vmul.f32 0.010416667, %v2456_v37  ;;  %v2486_v62 = vmul.f32 0.010416667, %v2462_v18  ;;  %v2597_v5 = vmul.f32 %v5970_v60, %v2577_v29 }
 0x87d   :  { %v4445_v39 = vpop.eup %4444 }
 0x87e   :  { %v4447_v58 = vpop.eup %4446  ;;  %4450 = vrsqrt.f32 %v2549_v48  ;;  %v2515_v0 = vsub.f32 %v2483_v6, %v2499_v17  ;;  %v2518_v61 = vsub.f32 %v2486_v62, %v2502_v11  ;;  %v2575_v21 = vmul.f32 %v4445_v39, %v2527_v55 }
 0x87f   :  { %v2578_v50 = vmul.f32 %v4447_v58, %v2530_v34  ;;  %v2458_v28 = vpop.xlane.xlu1 %2457  ;;  %v2617_v43 = vadd.f32 %v5980_v51, %v2597_v5  ;;  %v2533_v58 = vsub.f32 %v5874_v27, %v5949_v47 }
 0x880   :  { %v2404_v9 = vpop.xlane.xlu0 %2403  ;;  %v2547_v24 = vadd.f32 1e-05, %v2515_v0  ;;  %v2550_v1 = vadd.f32 1e-05, %v2518_v61  ;;  %v2484_v10 = vmul.f32 0.010416667, %v2458_v28  ;;  %v2595_v36 = vmul.f32 %v5970_v60, %v2575_v21 }
 0x881   :  { %v4449_v30 = vpop.eup %4448  ;;  %v2598_v25 = vmul.f32 %v5970_v60, %v2578_v50  ;;  %v5983_v40 = vmul.f32 0.010416667, %v2404_v9  ;;  %v2633_v34 = vmax.f32 %v2617_v43, 0.0  ;;  %v2532_v43 = vsub.f32 %v5886_v52, %v5966_v31 }
 0x882   :  { %4452 = vrsqrt.f32 %v2547_v24  ;;  %v2576_v63 = vmul.f32 %v4449_v30, %v2528_v56  ;;  %v2516_v8 = vsub.f32 %v2484_v10, %v2500_v20  ;;  %v2615_v23 = vadd.f32 %v5980_v51, %v2595_v36 }
 0x883   :  { %4454 = vrsqrt.f32 %v2550_v1  ;;  %v2618_v41 = vadd.f32 %v5980_v51, %v2598_v25  ;;  %v2505_v18 = vmul.f32 %v5983_v40, %v5983_v40  ;;  %v2531_v20 = vsub.f32 %v5879_v57, %v5951_v32 }
 0x884   :  { %v2400_v22 = vpop.xlane.xlu0 %2399  ;;  %v2406_v12 = vpop.xlane.xlu1 %2405  ;;  %v2596_v42 = vmul.f32 %v5970_v60, %v2576_v63  ;;  %v2548_v49 = vadd.f32 1e-05, %v2516_v8  ;;  %v2631_v6 = vmax.f32 %v2615_v23, 0.0  ;;  %v2534_v63 = vsub.f32 %v5881_v44, %v5955_v13 }
 0x885   :  { %v5989_v4 = vmul.f32 0.010416667, %v2400_v22  ;;  %v5991_v35 = vmul.f32 0.010416667, %v2406_v12  ;;  %v2634_v48 = vmax.f32 %v2618_v41, 0.0 }
 0x886   :  { %4456 = vrsqrt.f32 %v2548_v49  ;;  %v2616_v37 = vadd.f32 %v5980_v51, %v2596_v42 }
 0x887   :  { %v2503_v0 = vmul.f32 %v5989_v4, %v5989_v4  ;;  %v2506_v61 = vmul.f32 %v5991_v35, %v5991_v35  ;;  %v2648_v1 = vpack.c.bf16 %v2634_v48, %v2633_v34 }
 0x888   :  { %v2468_v55 = vpop.xlane.xlu0 %2467  ;;  %v2402_v17 = vpop.xlane.xlu1 %2401  ;;  %v2632_v62 = vmax.f32 %v2616_v37, 0.0 }
 0x889   :  { %v2489_v11 = vmul.f32 0.010416667, %v2468_v55  ;;  %v6002_v30 = vmul.f32 0.010416667, %v2402_v17 }
 0x88a   :  { %v2647_v9 = vpack.c.bf16 %v2632_v62, %v2631_v6 }
 0x88b   :  { %v2521_v39 = vsub.f32 %v2489_v11, %v2505_v18  ;;  %v4451_v29 = vpop.eup %4450  ;;  %v2504_v49 = vmul.f32 %v6002_v30, %v6002_v30 }
 0x88c   :  { %v2464_v21 = vpop.xlane.xlu0 %2463  ;;  %v2470_v50 = vpop.xlane.xlu1 %2469  ;;  %4118 = vmatprep.mubr.bf16.mxu1 %v2647_v9  ;;  %v2581_v36 = vmul.f32 %v4451_v29, %v2533_v58 }
 0x88d   :  { %v2553_v28 = vadd.f32 1e-05, %v2521_v39  ;;  %v2487_v56 = vmul.f32 0.010416667, %v2464_v21  ;;  %v2490_v24 = vmul.f32 0.010416667, %v2470_v50  ;;  %4119 = vmatmul.mubr.bf16.vlgmr.msra.gmra.mxu1 %v2648_v1 }
 0x88e   :  { %v2601_v55 = vmul.f32 %v5970_v60, %v2581_v36 }
 0x88f   :  { %v2519_v47 = vsub.f32 %v2487_v56, %v2503_v0  ;;  %v2522_v10 = vsub.f32 %v2490_v24, %v2506_v61  ;;  %v4453_v25 = vpop.eup %4452  ;;  %4458 = vrsqrt.f32 %v2553_v28 }
 0x890   :  { %v2412_v5 = vpop.xlane.xlu0 %2411  ;;  %v2466_v8 = vpop.xlane.xlu1 %2465  ;;  %v2579_v41 = vmul.f32 %v4453_v25, %v2531_v20  ;;  %v2621_v21 = vadd.f32 %v5980_v51, %v2601_v55 }
 0x891   :  { %v4455_v22 = vpop.eup %4454  ;;  %v2551_v12 = vadd.f32 1e-05, %v2519_v47  ;;  %v2554_v42 = vadd.f32 1e-05, %v2522_v10  ;;  %v2488_v23 = vmul.f32 0.010416667, %v2466_v8 }
 0x892   :  { %v2582_v32 = vmul.f32 %v4455_v22, %v2534_v63  ;;  %v2599_v18 = vmul.f32 %v5970_v60, %v2579_v41  ;;  %v6017_v34 = vmul.f32 0.010416667, %v2412_v5  ;;  %v2637_v5 = vmax.f32 %v2621_v21, 0.0 }
 0x893   :  { %4460 = vrsqrt.f32 %v2551_v12  ;;  %v2520_v13 = vsub.f32 %v2488_v23, %v2504_v49  ;;  %v4457_v48 = vpop.eup %4456  ;;  %v2537_v49 = vsub.f32 %v5896_v3, %v5983_v40  ;;  %v2535_v23 = vsub.f32 %v5903_v45, %v5989_v4 }
 0x894   :  { %4462 = vrsqrt.f32 %v2554_v42  ;;  %v2408_v17 = vpop.xlane.xlu0 %2407  ;;  %v2414_v37 = vpop.xlane.xlu1 %2413  ;;  %v2602_v11 = vmul.f32 %v5970_v60, %v2582_v32  ;;  %v2580_v39 = vmul.f32 %v4457_v48, %v2532_v43  ;;  %v2619_v61 = vadd.f32 %v5980_v51, %v2599_v18 }
 0x895   :  { %v6015_v6 = vmul.f32 0.010416667, %v2408_v17  ;;  %v2552_v62 = vadd.f32 1e-05, %v2520_v13  ;;  %v2509_v24 = vmul.f32 %v6017_v34, %v6017_v34  ;;  %v6030_v47 = vmul.f32 0.010416667, %v2414_v37 }
 0x896   :  { %v2622_v31 = vadd.f32 %v5980_v51, %v2602_v11  ;;  %v2600_v0 = vmul.f32 %v5970_v60, %v2580_v39  ;;  %v2635_v25 = vmax.f32 %v2619_v61, 0.0  ;;  %v2538_v37 = vsub.f32 %v5905_v19, %v5991_v35 }
 0x897   :  { %4464 = vrsqrt.f32 %v2552_v62  ;;  %v2507_v50 = vmul.f32 %v6015_v6, %v6015_v6  ;;  %v2510_v18 = vmul.f32 %v6030_v47, %v6030_v47 }
 0x898   :  { %v2472_v29 = vpop.xlane.xlu0 %2471  ;;  %v2410_v58 = vpop.xlane.xlu1 %2409  ;;  %v2620_v56 = vadd.f32 %v5980_v51, %v2600_v0  ;;  %v2638_v20 = vmax.f32 %v2622_v31, 0.0  ;;  %v2536_v0 = vsub.f32 %v5910_v2, %v6002_v30 }
 0x899   :  { %v2491_v9 = vmul.f32 0.010416667, %v2472_v29  ;;  %v6025_v28 = vmul.f32 0.010416667, %v2410_v58 }
 0x89a   :  { %v2636_v63 = vmax.f32 %v2620_v56, 0.0  ;;  %v2650_v13 = vpack.c.bf16 %v2638_v20, %v2637_v5 }
 0x89b   :  { %v2523_v1 = vsub.f32 %v2491_v9, %v2507_v50  ;;  %v2508_v12 = vmul.f32 %v6025_v28, %v6025_v28 }
 0x89c   :  { %v2476_v10 = vpop.xlane.xlu0 %2475  ;;  %v2474_v36 = vpop.xlane.xlu1 %2473  ;;  %v2649_v32 = vpack.c.bf16 %v2636_v63, %v2635_v25 }
 0x89d   :  { %v4459_v8 = vpop.eup %4458  ;;  %v2555_v22 = vadd.f32 1e-05, %v2523_v1  ;;  %v2493_v42 = vmul.f32 0.010416667, %v2476_v10  ;;  %v2492_v41 = vmul.f32 0.010416667, %v2474_v36  ;;  %v2539_v36 = vsub.f32 %v5929_v7, %v6015_v6 }
 0x89e   :  { %4122 = vmatprep.mubr.bf16.mxu1 %v2649_v32  ;;  %v2585_v48 = vmul.f32 %v4459_v8, %v2537_v49  ;;  %v2540_v32 = vsub.f32 %v5934_v54, %v6025_v28 }
 0x89f   :  { %4466 = vrsqrt.f32 %v2555_v22  ;;  %v2525_v43 = vsub.f32 %v2493_v42, %v2509_v24  ;;  %v2524_v55 = vsub.f32 %v2492_v41, %v2508_v12  ;;  %4123 = vmatmul.mubr.bf16.gmra.mxu1 %v2650_v13  ;;  %v2541_v41 = vsub.f32 %v5920_v33, %v6017_v34 }
 0x8a0   :  { %v4461_v17 = vpop.eup %4460  ;;  %v2478_v11 = vpop.xlane.xlu1 %2477  ;;  %v2605_v9 = vmul.f32 %v5970_v60, %v2585_v48 }
 0x8a1   :  { %v4463_v62 = vpop.eup %4462  ;;  %v2557_v40 = vadd.f32 1e-05, %v2525_v43  ;;  %v2556_v39 = vadd.f32 1e-05, %v2524_v55  ;;  %v2494_v4 = vmul.f32 0.010416667, %v2478_v11  ;;  %v2583_v31 = vmul.f32 %v4461_v17, %v2535_v23 }
 0x8a2   :  { %v2586_v29 = vmul.f32 %v4463_v62, %v2538_v37  ;;  %v2625_v10 = vadd.f32 %v5980_v51, %v2605_v9  ;;  %v2542_v17 = vsub.f32 %v5926_v53, %v6030_v47 }
 0x8a3   :  { %4468 = vrsqrt.f32 %v2557_v40  ;;  %v2526_v58 = vsub.f32 %v2494_v4, %v2510_v18  ;;  %v2603_v35 = vmul.f32 %v5970_v60, %v2583_v31 }
 0x8a4   :  { %4470 = vrsqrt.f32 %v2556_v39  ;;  %v2606_v61 = vmul.f32 %v5970_v60, %v2586_v29  ;;  %v4465_v21 = vpop.eup %4464  ;;  %v2641_v22 = vmax.f32 %v2625_v10, 0.0 }
 0x8a5   :  { %v2558_v50 = vadd.f32 1e-05, %v2526_v58  ;;  %v2584_v56 = vmul.f32 %v4465_v21, %v2536_v0  ;;  %v2623_v20 = vadd.f32 %v5980_v51, %v2603_v35 }
 0x8a6   :  { %v2626_v24 = vadd.f32 %v5980_v51, %v2606_v61 }
 0x8a7   :  { %4472 = vrsqrt.f32 %v2558_v50  ;;  %v2604_v1 = vmul.f32 %v5970_v60, %v2584_v56  ;;  %v2639_v5 = vmax.f32 %v2623_v20, 0.0 }
 0x8a8   :  { %v2642_v25 = vmax.f32 %v2626_v24, 0.0 }
 0x8a9   :  { %v2624_v30 = vadd.f32 %v5980_v51, %v2604_v1 }
 0x8aa   :  { %v2652_v49 = vpack.c.bf16 %v2642_v25, %v2641_v22 }
 0x8ab   :  { %v2640_v8 = vmax.f32 %v2624_v30, 0.0 }
 0x8ac   :  { %v4467_v63 = vpop.eup %4466 }
 0x8ad   :  { %v2587_v12 = vmul.f32 %v4467_v63, %v2539_v36  ;;  %v2651_v42 = vpack.c.bf16 %v2640_v8, %v2639_v5  ;;  %v4266_v36 = vld [vmem:[#allocation8 + $0xb8] sm:$0xff]   ;;  %v4267_v5 = vld [vmem:[#allocation8 + $0xb0] sm:$0xff]  }
 0x8ae   :  { %4134 = vmatprep.subr.bf16.mxu0 %v4266_v36 }
 0x8af   :  { %4126 = vmatprep.mubr.bf16.mxu1 %v2651_v42  ;;  %v2607_v43 = vmul.f32 %v5970_v60, %v2587_v12  ;;  %4135 = vmatpush3.bf16.msra.mxu0 %v4266_v36  ;;  %v4268_v12 = vld [vmem:[#allocation8 + $0xa8] sm:$0xff]  }
 0x8b0   :  { %v4469_v23 = vpop.eup %4468  ;;  %4127 = vmatmul.mubr.bf16.gmra.mxu1 %v2652_v49  ;;  %4136 = vmatprep.subr.bf16.mxu0 %v4267_v5  ;;  %v4269_v49 = vld [vmem:[#allocation8 + $0xa0] sm:$0xff]  }
 0x8b1   :  { %v4471_v55 = vpop.eup %4470  ;;  %v2589_v6 = vmul.f32 %v4469_v23, %v2541_v41  ;;  %v2627_v11 = vadd.f32 %v5980_v51, %v2607_v43  ;;  %v4270_v43 = vld [vmem:[#allocation8 + $0x98] sm:$0xff]  }
 0x8b2   :  { %v2588_v13 = vmul.f32 %v4471_v55, %v2540_v32 }
 0x8b3   :  { %v2609_v37 = vmul.f32 %v5970_v60, %v2589_v6  ;;  %v2643_v39 = vmax.f32 %v2627_v11, 0.0  ;;  %4137 = vmatpush3.bf16.msra.mxu0 %v4267_v5 }
 0x8b4   :  { %v4473_v18 = vpop.eup %4472  ;;  %v2608_v34 = vmul.f32 %v5970_v60, %v2588_v13  ;;  %4138 = vmatprep.subr.bf16.mxu0 %v4268_v12  ;;  %v4271_v13 = vld [vmem:[#allocation8 + $0x90] sm:$0xff]  }
 0x8b5   :  { %v2590_v48 = vmul.f32 %v4473_v18, %v2542_v17  ;;  %v2629_v40 = vadd.f32 %v5980_v51, %v2609_v37 }
 0x8b6   :  { %v2628_v28 = vadd.f32 %v5980_v51, %v2608_v34  ;;  %v4272_v34 = vld [vmem:[#allocation8 + $0x88] sm:$0xff]  }
 0x8b7   :  { %v2610_v62 = vmul.f32 %v5970_v60, %v2590_v48  ;;  %v2645_v47 = vmax.f32 %v2629_v40, 0.0  ;;  %4139 = vmatpush3.bf16.msra.mxu0 %v4268_v12  ;;  %v4273_v48 = vld [vmem:[#allocation8 + $0x80] sm:$0xff]  }
 0x8b8   :  { %v2644_v4 = vmax.f32 %v2628_v28, 0.0  ;;  %4140 = vmatprep.subr.bf16.mxu0 %v4269_v49 }
 0x8b9   :  { %v2630_v31 = vadd.f32 %v5980_v51, %v2610_v62 }
 0x8ba   :  { %v2653_v29 = vpack.c.bf16 %v2644_v4, %v2643_v39 }
 0x8bb   :  { %v2646_v58 = vmax.f32 %v2630_v31, 0.0  ;;  %4141 = vmatpush3.bf16.msra.mxu0 %v4269_v49 }
 0x8bc   :  { %4130 = vmatprep.mubr.bf16.mxu1 %v2653_v29  ;;  %4142 = vmatprep.subr.bf16.mxu0 %v4270_v43 }
 0x8bd   :  { %v2654_v0 = vpack.c.bf16 %v2646_v58, %v2645_v47 }
 0x8bf   :  { %4131 = vmatmul.mubr.bf16.gmra.mxu1 %v2654_v0  ;;  %4143 = vmatpush3.bf16.msra.mxu0 %v4270_v43 }
 0x8c0   :  { %4144 = vmatprep.subr.bf16.mxu0 %v4271_v13 }
 0x8c3   :  { %4145 = vmatpush3.bf16.msra.mxu0 %v4271_v13 }
 0x8c4   :  { %4146 = vmatprep.subr.bf16.mxu0 %v4272_v34 }
 0x8c7   :  { %4147 = vmatpush3.bf16.msra.mxu0 %v4272_v34 }
 0x8c8   :  { %4148 = vmatprep.subr.bf16.mxu0 %v4273_v48 }
 0x8cb   :  { %4149 = vmatpush3.bf16.msra.mxu0 %v4273_v48 }
 0x94d   :  { %v6068_v35 = vpop.f32.mrf.mxu1 }
 0x94e   :  { %2821 = vadd.xlane.f32.xlu0 %v6068_v35  ;;  %v2867_v60 = vmul.f32 %v6068_v35, %v6068_v35 }
 0x94f   :  { %v6071_v61 = vpop.f32.mrf.mxu1 }
 0x950   :  { %v2865_v50 = vmul.f32 %v6071_v61, %v6071_v61 }
 0x951   :  { %v6073_v21 = vpop.f32.mrf.mxu1 }
 0x952   :  { %2817 = vadd.xlane.f32.xlu0 %v6071_v61  ;;  %2823 = vadd.xlane.f32.xlu1 %v6073_v21  ;;  %v2868_v9 = vmul.f32 %v6073_v21, %v6073_v21 }
 0x953   :  { %v6079_v51 = vpop.f32.mrf.mxu1 }
 0x954   :  { %v2866_v56 = vmul.f32 %v6079_v51, %v6079_v51 }
 0x956   :  { %2885 = vadd.xlane.f32.xlu0 %v2867_v60  ;;  %2819 = vadd.xlane.f32.xlu1 %v6079_v51 }
 0x95a   :  { %2881 = vadd.xlane.f32.xlu0 %v2865_v50  ;;  %2887 = vadd.xlane.f32.xlu1 %v2868_v9 }
 0x95e   :  { %2883 = vadd.xlane.f32.xlu1 %v2866_v56 }
 0x95f   :  { %v6088_v24 = vpop.f32.mrf.mxu1 }
 0x960   :  { %2829 = vadd.xlane.f32.xlu0 %v6088_v24  ;;  %v2871_v10 = vmul.f32 %v6088_v24, %v6088_v24 }
 0x961   :  { %v6091_v1 = vpop.f32.mrf.mxu1 }
 0x962   :  { %v2869_v25 = vmul.f32 %v6091_v1, %v6091_v1 }
 0x963   :  { %v6093_v20 = vpop.f32.mrf.mxu1 }
 0x964   :  { %2825 = vadd.xlane.f32.xlu0 %v6091_v1  ;;  %2831 = vadd.xlane.f32.xlu1 %v6093_v20  ;;  %v2872_v63 = vmul.f32 %v6093_v20, %v6093_v20 }
 0x965   :  { %v6099_v30 = vpop.f32.mrf.mxu1 }
 0x966   :  { %v2870_v8 = vmul.f32 %v6099_v30, %v6099_v30 }
 0x968   :  { %2893 = vadd.xlane.f32.xlu0 %v2871_v10  ;;  %2827 = vadd.xlane.f32.xlu1 %v6099_v30 }
 0x96c   :  { %2889 = vadd.xlane.f32.xlu0 %v2869_v25  ;;  %2895 = vadd.xlane.f32.xlu1 %v2872_v63 }
 0x970   :  { %v6108_v22 = vpop.f32.mrf.mxu1  ;;  %2891 = vadd.xlane.f32.xlu1 %v2870_v8 }
 0x971   :  { %2837 = vadd.xlane.f32.xlu0 %v6108_v22  ;;  %v2875_v23 = vmul.f32 %v6108_v22, %v6108_v22 }
 0x972   :  { %v6111_v42 = vpop.f32.mrf.mxu1 }
 0x973   :  { %v2873_v55 = vmul.f32 %v6111_v42, %v6111_v42 }
 0x974   :  { %v6113_v41 = vpop.f32.mrf.mxu1 }
 0x975   :  { %2833 = vadd.xlane.f32.xlu0 %v6111_v42  ;;  %2839 = vadd.xlane.f32.xlu1 %v6113_v41  ;;  %v2876_v6 = vmul.f32 %v6113_v41, %v6113_v41 }
 0x976   :  { %v6119_v32 = vpop.f32.mrf.mxu1 }
 0x977   :  { %v2874_v37 = vmul.f32 %v6119_v32, %v6119_v32 }
 0x979   :  { %2901 = vadd.xlane.f32.xlu0 %v2875_v23  ;;  %2835 = vadd.xlane.f32.xlu1 %v6119_v32 }
 0x97d   :  { %2897 = vadd.xlane.f32.xlu0 %v2873_v55  ;;  %2903 = vadd.xlane.f32.xlu1 %v2876_v6 }
 0x97f   :  { %v6126_v17 = vpop.f32.mrf.mxu1 }
 0x980   :  { %v2879_v40 = vmul.f32 %v6126_v17, %v6126_v17 }
 0x981   :  { %v6130_v18 = vpop.f32.mrf.mxu1  ;;  %2899 = vadd.xlane.f32.xlu1 %v2874_v37  ;;  %2845 = vadd.xlane.f32.xlu0 %v6126_v17 }
 0x982   :  { %v2877_v28 = vmul.f32 %v6130_v18, %v6130_v18 }
 0x983   :  { %v6133_v11 = vpop.f32.mrf.mxu1 }
 0x984   :  { %v2880_v4 = vmul.f32 %v6133_v11, %v6133_v11 }
 0x985   :  { %2841 = vadd.xlane.f32.xlu0 %v6130_v18  ;;  %2847 = vadd.xlane.f32.xlu1 %v6133_v11  ;;  %v6139_v62 = vpop.f32.mrf.mxu1 }
 0x986   :  { %v2878_v39 = vmul.f32 %v6139_v62, %v6139_v62 }
 0x989   :  { %2905 = vadd.xlane.f32.xlu0 %v2877_v28  ;;  %2843 = vadd.xlane.f32.xlu1 %v6139_v62 }
 0x98d   :  { %2909 = vadd.xlane.f32.xlu0 %v2879_v40  ;;  %2907 = vadd.xlane.f32.xlu1 %v2878_v39 }
 0x991   :  { %2911 = vadd.xlane.f32.xlu1 %v2880_v4 }
 0x9d7   :  { %v2822_v31 = vpop.xlane.xlu0 %2821 }
 0x9d8   :  { %v2851_v58 = vmul.f32 0.010416667, %v2822_v31 }
 0x9da   :  { %v2931_v9 = vmul.f32 %v2851_v58, %v2851_v58 }
 0x9db   :  { %v2818_v29 = vpop.xlane.xlu0 %2817  ;;  %v2824_v47 = vpop.xlane.xlu1 %2823 }
 0x9dc   :  { %v2849_v0 = vmul.f32 0.010416667, %v2818_v29  ;;  %v2852_v56 = vmul.f32 0.010416667, %v2824_v47 }
 0x9de   :  { %v2929_v25 = vmul.f32 %v2849_v0, %v2849_v0  ;;  %v2932_v12 = vmul.f32 %v2852_v56, %v2852_v56 }
 0x9df   :  { %v2886_v60 = vpop.xlane.xlu0 %2885  ;;  %v2820_v50 = vpop.xlane.xlu1 %2819 }
 0x9e0   :  { %v2915_v10 = vmul.f32 0.010416667, %v2886_v60  ;;  %v6148_v63 = vmul.f32 0.010416667, %v2820_v50 }
 0x9e2   :  { %v2947_v36 = vsub.f32 %v2915_v10, %v2931_v9  ;;  %v2930_v37 = vmul.f32 %v6148_v63, %v6148_v63 }
 0x9e3   :  { %v2882_v5 = vpop.xlane.xlu0 %2881  ;;  %v2888_v8 = vpop.xlane.xlu1 %2887 }
 0x9e4   :  { %v2979_v49 = vadd.f32 1e-05, %v2947_v36  ;;  %v2913_v23 = vmul.f32 0.010416667, %v2882_v5  ;;  %v2916_v43 = vmul.f32 0.010416667, %v2888_v8 }
 0x9e6   :  { %v2945_v55 = vsub.f32 %v2913_v23, %v2929_v25  ;;  %v2948_v6 = vsub.f32 %v2916_v43, %v2932_v12  ;;  %4474 = vrsqrt.f32 %v2979_v49  ;;  %v2963_v12 = vsub.f32 %v6068_v35, %v2851_v58 }
 0x9e7   :  { %v2884_v13 = vpop.xlane.xlu1 %2883  ;;  %v2961_v49 = vsub.f32 %v6071_v61, %v2849_v0  ;;  %v6171_v35 = vrot.slane %v5957_v59, %v6499_v26 }
 0x9e8   :  { %v2977_v34 = vadd.f32 1e-05, %v2945_v55  ;;  %v2980_v48 = vadd.f32 1e-05, %v2948_v6  ;;  %v2914_v28 = vmul.f32 0.010416667, %v2884_v13 }
 0x9e9   :  { %v2830_v40 = vpop.xlane.xlu0 %2829 }
 0x9ea   :  { %4476 = vrsqrt.f32 %v2977_v34  ;;  %v2946_v39 = vsub.f32 %v2914_v28, %v2930_v37  ;;  %v6152_v47 = vmul.f32 0.010416667, %v2830_v40  ;;  %v2964_v28 = vsub.f32 %v6073_v21, %v2852_v56 }
 0x9eb   :  { %4478 = vrsqrt.f32 %v2980_v48 }
 0x9ec   :  { %v2978_v4 = vadd.f32 1e-05, %v2946_v39  ;;  %v2935_v10 = vmul.f32 %v6152_v47, %v6152_v47 }
 0x9ed   :  { %v2826_v31 = vpop.xlane.xlu0 %2825  ;;  %v2832_v29 = vpop.xlane.xlu1 %2831 }
 0x9ee   :  { %4480 = vrsqrt.f32 %v2978_v4  ;;  %v6154_v60 = vmul.f32 0.010416667, %v2826_v31  ;;  %v6158_v36 = vmul.f32 0.010416667, %v2832_v29 }
 0x9f0   :  { %v2933_v23 = vmul.f32 %v6154_v60, %v6154_v60  ;;  %v2936_v6 = vmul.f32 %v6158_v36, %v6158_v36 }
 0x9f1   :  { %v2894_v50 = vpop.xlane.xlu0 %2893  ;;  %v2828_v9 = vpop.xlane.xlu1 %2827 }
 0x9f2   :  { %v2919_v25 = vmul.f32 0.010416667, %v2894_v50  ;;  %v6167_v39 = vmul.f32 0.010416667, %v2828_v9 }
 0x9f3   :  { %v4475_v5 = vpop.eup %4474 }
 0x9f4   :  { %v2951_v8 = vsub.f32 %v2919_v25, %v2935_v10  ;;  %v3011_v40 = vmul.f32 %v4475_v5, %v2963_v12  ;;  %v2962_v10 = vsub.f32 %v6079_v51, %v6148_v63  ;;  %v2934_v9 = vmul.f32 %v6167_v39, %v6167_v39 }
 0x9f5   :  { %v2890_v43 = vpop.xlane.xlu0 %2889  ;;  %v2896_v55 = vpop.xlane.xlu1 %2895 }
 0x9f6   :  { %v2983_v13 = vadd.f32 1e-05, %v2951_v8  ;;  %v2917_v37 = vmul.f32 0.010416667, %v2890_v43  ;;  %v2920_v34 = vmul.f32 0.010416667, %v2896_v55 }
 0x9f7   :  { %v4477_v48 = vpop.eup %4476 }
 0x9f8   :  { %v4479_v61 = vpop.eup %4478  ;;  %4482 = vrsqrt.f32 %v2983_v13  ;;  %v2949_v58 = vsub.f32 %v2917_v37, %v2933_v23  ;;  %v2952_v0 = vsub.f32 %v2920_v34, %v2936_v6  ;;  %v3009_v4 = vmul.f32 %v4477_v48, %v2961_v49 }
 0x9f9   :  { %v3012_v31 = vmul.f32 %v4479_v61, %v2964_v28  ;;  %v2892_v50 = vpop.xlane.xlu1 %2891  ;;  %v6181_v49 = vrot.slane %v5957_v59, %v5330_v38  ;;  %v3031_v23 = vmul.f32 %v6171_v35, %v3011_v40 }
 0x9fa   :  { %v2838_v29 = vpop.xlane.xlu0 %2837  ;;  %v2981_v25 = vadd.f32 1e-05, %v2949_v58  ;;  %v2984_v21 = vadd.f32 1e-05, %v2952_v0  ;;  %v2918_v5 = vmul.f32 0.010416667, %v2892_v50  ;;  %v3029_v26 = vmul.f32 %v6171_v35, %v3009_v4 }
 0x9fb   :  { %v4481_v56 = vpop.eup %4480  ;;  %v3032_v8 = vmul.f32 %v6171_v35, %v3012_v31  ;;  %v6184_v55 = vmul.f32 0.010416667, %v2838_v29  ;;  %v3051_v48 = vadd.f32 %v6181_v49, %v3031_v23 }
 0x9fc   :  { %4484 = vrsqrt.f32 %v2981_v25  ;;  %v3010_v12 = vmul.f32 %v4481_v56, %v2962_v10  ;;  %v2950_v51 = vsub.f32 %v2918_v5, %v2934_v9  ;;  %v3049_v34 = vadd.f32 %v6181_v49, %v3029_v26 }
 0x9fd   :  { %4486 = vrsqrt.f32 %v2984_v21  ;;  %v3052_v13 = vadd.f32 %v6181_v49, %v3032_v8  ;;  %v2939_v58 = vmul.f32 %v6184_v55, %v6184_v55  ;;  %v3067_v10 = vmax.f32 %v3051_v48, 0.0 }
 0x9fe   :  { %v2834_v63 = vpop.xlane.xlu0 %2833  ;;  %v2840_v43 = vpop.xlane.xlu1 %2839  ;;  %v3030_v6 = vmul.f32 %v6171_v35, %v3010_v12  ;;  %v2982_v37 = vadd.f32 1e-05, %v2950_v51  ;;  %v3065_v31 = vmax.f32 %v3049_v34, 0.0  ;;  %v2967_v21 = vsub.f32 %v6088_v24, %v6152_v47 }
 0x9ff   :  { %v6190_v38 = vmul.f32 0.010416667, %v2834_v63  ;;  %v6192_v59 = vmul.f32 0.010416667, %v2840_v43  ;;  %v3068_v4 = vmax.f32 %v3052_v13, 0.0  ;;  %v2968_v34 = vsub.f32 %v6093_v20, %v6158_v36 }
 0xa00   :  { %4488 = vrsqrt.f32 %v2982_v37  ;;  %v3050_v61 = vadd.f32 %v6181_v49, %v3030_v6  ;;  %v2965_v6 = vsub.f32 %v6091_v1, %v6154_v60  ;;  %v2966_v60 = vsub.f32 %v6099_v30, %v6167_v39 }
 0xa01   :  { %v2937_v56 = vmul.f32 %v6190_v38, %v6190_v38  ;;  %v2940_v9 = vmul.f32 %v6192_v59, %v6192_v59  ;;  %v3082_v63 = vpack.c.bf16 %v3068_v4, %v3067_v10 }
 0xa02   :  { %v2902_v28 = vpop.xlane.xlu0 %2901  ;;  %v2836_v40 = vpop.xlane.xlu1 %2835  ;;  %v3066_v29 = vmax.f32 %v3050_v61, 0.0 }
 0xa03   :  { %v2923_v0 = vmul.f32 0.010416667, %v2902_v28  ;;  %v6203_v43 = vmul.f32 0.010416667, %v2836_v40 }
 0xa04   :  { %v3081_v8 = vpack.c.bf16 %v3066_v29, %v3065_v31 }
 0xa05   :  { %v2955_v50 = vsub.f32 %v2923_v0, %v2939_v58  ;;  %v4483_v25 = vpop.eup %4482  ;;  %v2938_v4 = vmul.f32 %v6203_v43, %v6203_v43 }
 0xa06   :  { %v2898_v5 = vpop.xlane.xlu0 %2897  ;;  %v2904_v26 = vpop.xlane.xlu1 %2903  ;;  %4150 = vmatprep.mubr.bf16.mxu0 %v3081_v8  ;;  %v3015_v13 = vmul.f32 %v4483_v25, %v2967_v21 }
 0xa07   :  { %v2987_v12 = vadd.f32 1e-05, %v2955_v50  ;;  %v2921_v23 = vmul.f32 0.010416667, %v2898_v5  ;;  %v2924_v51 = vmul.f32 0.010416667, %v2904_v26  ;;  %4151 = vmatmul.mubr.bf16.vlgmr.msra.gmra.mxu0 %v3082_v63 }
 0xa08   :  { %v3035_v29 = vmul.f32 %v6171_v35, %v3015_v13 }
 0xa09   :  { %v2953_v24 = vsub.f32 %v2921_v23, %v2937_v56  ;;  %v2956_v47 = vsub.f32 %v2924_v51, %v2940_v9  ;;  %v4485_v37 = vpop.eup %4484  ;;  %4490 = vrsqrt.f32 %v2987_v12 }
 0xa0a   :  { %v2846_v48 = vpop.xlane.xlu0 %2845  ;;  %v2900_v28 = vpop.xlane.xlu1 %2899  ;;  %v3013_v40 = vmul.f32 %v4485_v37, %v2965_v6  ;;  %v3055_v51 = vadd.f32 %v6181_v49, %v3035_v29 }
 0xa0b   :  { %v4487_v61 = vpop.eup %4486  ;;  %v2985_v58 = vadd.f32 1e-05, %v2953_v24  ;;  %v2988_v0 = vadd.f32 1e-05, %v2956_v47  ;;  %v2922_v31 = vmul.f32 0.010416667, %v2900_v28 }
 0xa0c   :  { %v3016_v1 = vmul.f32 %v4487_v61, %v2968_v34  ;;  %v3033_v10 = vmul.f32 %v6171_v35, %v3013_v40  ;;  %v6218_v26 = vmul.f32 0.010416667, %v2846_v48  ;;  %v3071_v40 = vmax.f32 %v3055_v51, 0.0 }
 0xa0d   :  { %4492 = vrsqrt.f32 %v2985_v58  ;;  %v2954_v20 = vsub.f32 %v2922_v31, %v2938_v4  ;;  %v4489_v21 = vpop.eup %4488 }
 0xa0e   :  { %4494 = vrsqrt.f32 %v2988_v0  ;;  %v2842_v36 = vpop.xlane.xlu0 %2841  ;;  %v2848_v50 = vpop.xlane.xlu1 %2847  ;;  %v3036_v25 = vmul.f32 %v6171_v35, %v3016_v1  ;;  %v3014_v5 = vmul.f32 %v4489_v21, %v2966_v60  ;;  %v3053_v23 = vadd.f32 %v6181_v49, %v3033_v10 }
 0xa0f   :  { %v6216_v56 = vmul.f32 0.010416667, %v2842_v36  ;;  %v2986_v9 = vadd.f32 1e-05, %v2954_v20  ;;  %v2943_v13 = vmul.f32 %v6218_v26, %v6218_v26  ;;  %v6231_v48 = vmul.f32 0.010416667, %v2848_v50 }
 0xa10   :  { %v3056_v30 = vadd.f32 %v6181_v49, %v3036_v25  ;;  %v3034_v12 = vmul.f32 %v6171_v35, %v3014_v5  ;;  %v3069_v58 = vmax.f32 %v3053_v23, 0.0  ;;  %v2971_v20 = vsub.f32 %v6108_v22, %v6184_v55 }
 0xa11   :  { %4496 = vrsqrt.f32 %v2986_v9  ;;  %v2941_v63 = vmul.f32 %v6216_v56, %v6216_v56  ;;  %v2969_v36 = vsub.f32 %v6111_v42, %v6190_v38  ;;  %v2972_v5 = vsub.f32 %v6113_v41, %v6192_v59 }
 0xa12   :  { %v2906_v39 = vpop.xlane.xlu0 %2905  ;;  %v2844_v8 = vpop.xlane.xlu1 %2843  ;;  %v3054_v47 = vadd.f32 %v6181_v49, %v3034_v12  ;;  %v3072_v34 = vmax.f32 %v3056_v30, 0.0  ;;  %v2944_v30 = vmul.f32 %v6231_v48, %v6231_v48 }
 0xa13   :  { %v2925_v6 = vmul.f32 0.010416667, %v2906_v39  ;;  %v6226_v24 = vmul.f32 0.010416667, %v2844_v8 }
 0xa14   :  { %v3070_v0 = vmax.f32 %v3054_v47, 0.0  ;;  %v3084_v21 = vpack.c.bf16 %v3072_v34, %v3071_v40 }
 0xa15   :  { %v2957_v37 = vsub.f32 %v2925_v6, %v2941_v63  ;;  %v2942_v1 = vmul.f32 %v6226_v24, %v6226_v24  ;;  %v2970_v63 = vsub.f32 %v6119_v32, %v6203_v43  ;;  %v2973_v43 = vsub.f32 %v6130_v18, %v6216_v56 }
 0xa16   :  { %v2910_v28 = vpop.xlane.xlu0 %2909  ;;  %v2908_v61 = vpop.xlane.xlu1 %2907  ;;  %v3083_v50 = vpack.c.bf16 %v3070_v0, %v3069_v58 }
 0xa17   :  { %v4491_v4 = vpop.eup %4490  ;;  %v2989_v31 = vadd.f32 1e-05, %v2957_v37  ;;  %v2927_v60 = vmul.f32 0.010416667, %v2910_v28  ;;  %v2926_v29 = vmul.f32 0.010416667, %v2908_v61 }
 0xa18   :  { %4154 = vmatprep.mubr.bf16.mxu0 %v3083_v50  ;;  %v3019_v8 = vmul.f32 %v4491_v4, %v2971_v20  ;;  %v2975_v20 = vsub.f32 %v6126_v17, %v6218_v26 }
 0xa19   :  { %4498 = vrsqrt.f32 %v2989_v31  ;;  %v2959_v10 = vsub.f32 %v2927_v60, %v2943_v13  ;;  %v2958_v25 = vsub.f32 %v2926_v29, %v2942_v1  ;;  %4155 = vmatmul.mubr.bf16.gmra.mxu0 %v3084_v21 }
 0xa1a   :  { %v4493_v9 = vpop.eup %4492  ;;  %v2912_v39 = vpop.xlane.xlu1 %2911  ;;  %v3039_v13 = vmul.f32 %v6171_v35, %v3019_v8 }
 0xa1b   :  { %v4495_v12 = vpop.eup %4494  ;;  %v2991_v22 = vadd.f32 1e-05, %v2959_v10  ;;  %v2990_v55 = vadd.f32 1e-05, %v2958_v25  ;;  %v2928_v42 = vmul.f32 0.010416667, %v2912_v39  ;;  %v3017_v38 = vmul.f32 %v4493_v9, %v2969_v36 }
 0xa1c   :  { %v3020_v23 = vmul.f32 %v4495_v12, %v2972_v5  ;;  %v3059_v58 = vadd.f32 %v6181_v49, %v3039_v13  ;;  %v2974_v10 = vsub.f32 %v6139_v62, %v6226_v24  ;;  %v2976_v9 = vsub.f32 %v6133_v11, %v6231_v48 }
 0xa1d   :  { %4500 = vrsqrt.f32 %v2991_v22  ;;  %v2960_v51 = vsub.f32 %v2928_v42, %v2944_v30  ;;  %v3037_v41 = vmul.f32 %v6171_v35, %v3017_v38 }
 0xa1e   :  { %4502 = vrsqrt.f32 %v2990_v55  ;;  %v3040_v59 = vmul.f32 %v6171_v35, %v3020_v23  ;;  %v4497_v6 = vpop.eup %4496  ;;  %v3075_v1 = vmax.f32 %v3059_v58, 0.0 }
 0xa1f   :  { %v2992_v47 = vadd.f32 1e-05, %v2960_v51  ;;  %v3018_v37 = vmul.f32 %v4497_v6, %v2970_v63  ;;  %v3057_v61 = vadd.f32 %v6181_v49, %v3037_v41 }
 0xa20   :  { %v3060_v34 = vadd.f32 %v6181_v49, %v3040_v59 }
 0xa21   :  { %4504 = vrsqrt.f32 %v2992_v47  ;;  %v3038_v28 = vmul.f32 %v6171_v35, %v3018_v37  ;;  %v3073_v4 = vmax.f32 %v3057_v61, 0.0 }
 0xa22   :  { %v3076_v0 = vmax.f32 %v3060_v34, 0.0 }
 0xa23   :  { %v3058_v32 = vadd.f32 %v6181_v49, %v3038_v28 }
 0xa24   :  { %v3086_v36 = vpack.c.bf16 %v3076_v0, %v3075_v1 }
 0xa25   :  { %v3074_v31 = vmax.f32 %v3058_v32, 0.0 }
 0xa26   :  { %v4499_v40 = vpop.eup %4498 }
 0xa27   :  { %v3021_v60 = vmul.f32 %v4499_v40, %v2973_v43  ;;  %v3085_v29 = vpack.c.bf16 %v3074_v31, %v3073_v4 }
 0xa29   :  { %4158 = vmatprep.mubr.bf16.mxu0 %v3085_v29  ;;  %v3041_v25 = vmul.f32 %v6171_v35, %v3021_v60  ;;  %v4274_v29 = vld [vmem:[#allocation13 + $0x38] sm:$0xff]  }
 0xa2a   :  { %v4501_v50 = vpop.eup %4500  ;;  %4159 = vmatmul.mubr.bf16.gmra.mxu0 %v3086_v36  ;;  %4166 = vmatprep.subr.bf16.mxu1 %v4274_v29  ;;  %v4275_v36 = vld [vmem:[#allocation13 + $0x30] sm:$0xff]  }
 0xa2b   :  { %v4503_v21 = vpop.eup %4502  ;;  %v3023_v18 = vmul.f32 %v4501_v50, %v2975_v20  ;;  %v3061_v26 = vadd.f32 %v6181_v49, %v3041_v25  ;;  %4167 = vmatpush3.bf16.msra.mxu1 %v4274_v29 }
 0xa2c   :  { %v3022_v56 = vmul.f32 %v4503_v21, %v2974_v10  ;;  %4168 = vmatprep.subr.bf16.mxu1 %v4275_v36 }
 0xa2d   :  { %v3043_v5 = vmul.f32 %v6171_v35, %v3023_v18  ;;  %v3077_v12 = vmax.f32 %v3061_v26, 0.0 }
 0xa2e   :  { %v4505_v30 = vpop.eup %4504  ;;  %v3042_v17 = vmul.f32 %v6171_v35, %v3022_v56 }
 0xa2f   :  { %v3024_v39 = vmul.f32 %v4505_v30, %v2976_v9  ;;  %v3063_v8 = vadd.f32 %v6181_v49, %v3043_v5  ;;  %4169 = vmatpush3.bf16.msra.mxu1 %v4275_v36  ;;  %v4276_v9 = vld [vmem:[#allocation13 + $0x28] sm:$0xff]  }
 0xa30   :  { %v3062_v62 = vadd.f32 %v6181_v49, %v3042_v17  ;;  %4170 = vmatprep.subr.bf16.mxu1 %v4276_v9 }
 0xa31   :  { %v3044_v24 = vmul.f32 %v6171_v35, %v3024_v39  ;;  %v3079_v11 = vmax.f32 %v3063_v8, 0.0 }
 0xa32   :  { %v3078_v22 = vmax.f32 %v3062_v62, 0.0  ;;  %v4278_v62 = vld [vmem:[#allocation13 + $0x18] sm:$0xff]  }
 0xa33   :  { %v3064_v55 = vadd.f32 %v6181_v49, %v3044_v24  ;;  %4171 = vmatpush3.bf16.msra.mxu1 %v4276_v9 }
 0xa34   :  { %v3087_v42 = vpack.c.bf16 %v3078_v22, %v3077_v12 }
 0xa35   :  { %v3080_v48 = vmax.f32 %v3064_v55, 0.0 }
 0xa36   :  { %4162 = vmatprep.mubr.bf16.mxu0 %v3087_v42  ;;  %v4279_v42 = vld [vmem:[#allocation13 + $0x10] sm:$0xff]  }
 0xa37   :  { %v3088_v38 = vpack.c.bf16 %v3080_v48, %v3079_v11 }
 0xa39   :  { %4163 = vmatmul.mubr.bf16.gmra.mxu0 %v3088_v38 }
 0xac7   :  { %v4152_v23 = vpop.f32.mrf.mxu0 }
 0xac8   :  { %v3197_v51 = vadd.f32 %v4152_v23, %v5850_v16 }
 0xac9   :  { %v3188_v63 = vpop.f32.mrf.mxu0 }
 0xaca   :  { %v6270_v41 = vmax.f32 %v3197_v51, 0.0  ;;  %v3189_v35 = vadd.f32 %v3188_v63, %v5855_v46  ;;  %v4280_v63 = vld [vmem:[#allocation13 + $0x8] sm:$0xff]  }
 0xacb   :  { %v4153_v59 = vpop.f32.mrf.mxu0 }
 0xacc   :  { %v3200_v6 = vadd.f32 %v4153_v59, %v5857_v15  ;;  %3273 = vadd.xlane.f32.xlu0 %v6270_v41  ;;  %v6275_v47 = vmax.f32 %v3189_v35, 0.0  ;;  %v3319_v46 = vmul.f32 %v6270_v41, %v6270_v41 }
 0xacd   :  { %v3191_v49 = vpop.f32.mrf.mxu0 }
 0xace   :  { %v6277_v13 = vmax.f32 %v3200_v6, 0.0  ;;  %v3192_v37 = vadd.f32 %v3191_v49, %v5862_v14  ;;  %v3317_v34 = vmul.f32 %v6275_v47, %v6275_v47 }
 0xad0   :  { %3275 = vadd.xlane.f32.xlu1 %v6277_v13  ;;  %3269 = vadd.xlane.f32.xlu0 %v6275_v47  ;;  %v6282_v16 = vmax.f32 %v3192_v37, 0.0  ;;  %v3320_v15 = vmul.f32 %v6277_v13, %v6277_v13 }
 0xad2   :  { %v3318_v61 = vmul.f32 %v6282_v16, %v6282_v16 }
 0xad4   :  { %3271 = vadd.xlane.f32.xlu1 %v6282_v16  ;;  %3337 = vadd.xlane.f32.xlu0 %v3319_v46 }
 0xad8   :  { %3339 = vadd.xlane.f32.xlu1 %v3320_v15  ;;  %3333 = vadd.xlane.f32.xlu0 %v3317_v34 }
 0xad9   :  { %v4156_v14 = vpop.f32.mrf.mxu0 }
 0xada   :  { %v3213_v28 = vadd.f32 %v4156_v14, %v5874_v27 }
 0xadb   :  { %v3204_v58 = vpop.f32.mrf.mxu0 }
 0xadc   :  { %v6294_v32 = vmax.f32 %v3213_v28, 0.0  ;;  %v3205_v43 = vadd.f32 %v3204_v58, %v5879_v57  ;;  %3335 = vadd.xlane.f32.xlu1 %v3318_v61 }
 0xadd   :  { %v4157_v0 = vpop.f32.mrf.mxu0 }
 0xade   :  { %v3216_v40 = vadd.f32 %v4157_v0, %v5881_v44  ;;  %3281 = vadd.xlane.f32.xlu0 %v6294_v32  ;;  %v6299_v31 = vmax.f32 %v3205_v43, 0.0  ;;  %v3323_v57 = vmul.f32 %v6294_v32, %v6294_v32 }
 0xadf   :  { %v3207_v4 = vpop.f32.mrf.mxu0 }
 0xae0   :  { %v6301_v1 = vmax.f32 %v3216_v40, 0.0  ;;  %v3208_v27 = vadd.f32 %v3207_v4, %v5886_v52  ;;  %v3321_v52 = vmul.f32 %v6299_v31, %v6299_v31 }
 0xae2   :  { %3283 = vadd.xlane.f32.xlu1 %v6301_v1  ;;  %3277 = vadd.xlane.f32.xlu0 %v6299_v31  ;;  %v6306_v60 = vmax.f32 %v3208_v27, 0.0  ;;  %v3324_v44 = vmul.f32 %v6301_v1, %v6301_v1 }
 0xae4   :  { %v3322_v18 = vmul.f32 %v6306_v60, %v6306_v60 }
 0xae6   :  { %3279 = vadd.xlane.f32.xlu1 %v6306_v60  ;;  %3345 = vadd.xlane.f32.xlu0 %v3323_v57 }
 0xaea   :  { %v4160_v20 = vpop.f32.mrf.mxu0  ;;  %3347 = vadd.xlane.f32.xlu1 %v3324_v44  ;;  %3341 = vadd.xlane.f32.xlu0 %v3321_v52 }
 0xaeb   :  { %v3229_v50 = vadd.f32 %v4160_v20, %v5896_v3 }
 0xaec   :  { %v3220_v10 = vpop.f32.mrf.mxu0 }
 0xaed   :  { %v6316_v25 = vmax.f32 %v3229_v50, 0.0  ;;  %v3221_v21 = vadd.f32 %v3220_v10, %v5903_v45  ;;  %v4277_v45 = vld [vmem:[#allocation13 + $0x20] sm:$0xff]  }
 0xaee   :  { %v4161_v56 = vpop.f32.mrf.mxu0  ;;  %3343 = vadd.xlane.f32.xlu1 %v3322_v18  ;;  %4172 = vmatprep.subr.bf16.mxu1 %v4277_v45 }
 0xaef   :  { %v3232_v5 = vadd.f32 %v4161_v56, %v5905_v19  ;;  %3289 = vadd.xlane.f32.xlu0 %v6316_v25  ;;  %v6323_v30 = vmax.f32 %v3221_v21, 0.0  ;;  %v3327_v19 = vmul.f32 %v6316_v25, %v6316_v25  ;;  %4173 = vmatpush3.bf16.msra.mxu1 %v4277_v45 }
 0xaf0   :  { %v3223_v3 = vpop.f32.mrf.mxu0  ;;  %4174 = vmatprep.subr.bf16.mxu1 %v4278_v62 }
 0xaf1   :  { %v6325_v17 = vmax.f32 %v3232_v5, 0.0  ;;  %v3224_v26 = vadd.f32 %v3223_v3, %v5910_v2  ;;  %v3325_v12 = vmul.f32 %v6323_v30, %v6323_v30 }
 0xaf3   :  { %3291 = vadd.xlane.f32.xlu1 %v6325_v17  ;;  %3285 = vadd.xlane.f32.xlu0 %v6323_v30  ;;  %v6330_v39 = vmax.f32 %v3224_v26, 0.0  ;;  %v3328_v8 = vmul.f32 %v6325_v17, %v6325_v17 }
 0xaf4   :  { %4175 = vmatpush3.bf16.msra.mxu1 %v4278_v62 }
 0xaf5   :  { %4176 = vmatprep.subr.bf16.mxu1 %v4279_v42 }
 0xaf7   :  { %3287 = vadd.xlane.f32.xlu1 %v6330_v39  ;;  %3353 = vadd.xlane.f32.xlu0 %v3327_v19 }
 0xaf8   :  { %4177 = vmatpush3.bf16.msra.mxu1 %v4279_v42 }
 0xaf9   :  { %v4164_v24 = vpop.f32.mrf.mxu0  ;;  %4178 = vmatprep.subr.bf16.mxu1 %v4280_v63 }
 0xafa   :  { %v3245_v2 = vadd.f32 %v4164_v24, %v5920_v33  ;;  %v3326_v33 = vmul.f32 %v6330_v39, %v6330_v39 }
 0xafb   :  { %v3236_v22 = vpop.f32.mrf.mxu0  ;;  %3355 = vadd.xlane.f32.xlu1 %v3328_v8  ;;  %3349 = vadd.xlane.f32.xlu0 %v3325_v12 }
 0xafc   :  { %v6340_v55 = vmax.f32 %v3245_v2, 0.0  ;;  %v3237_v48 = vadd.f32 %v3236_v22, %v5929_v7  ;;  %4179 = vmatpush3.bf16.msra.mxu1 %v4280_v63 }
 0xafd   :  { %v4165_v11 = vpop.f32.mrf.mxu0 }
 0xafe   :  { %v3248_v38 = vadd.f32 %v4165_v11, %v5926_v53  ;;  %v6349_v35 = vmax.f32 %v3237_v48, 0.0  ;;  %v4281_v53 = vld [vmem:[#allocation13] sm:$0xff]   ;;  %v3331_v49 = vmul.f32 %v6340_v55, %v6340_v55 }
 0xaff   :  { %v3239_v23 = vpop.f32.mrf.mxu0  ;;  %3351 = vadd.xlane.f32.xlu1 %v3326_v33  ;;  %3297 = vadd.xlane.f32.xlu0 %v6340_v55 }
 0xb00   :  { %v6346_v51 = vmax.f32 %v3248_v38, 0.0  ;;  %v3240_v59 = vadd.f32 %v3239_v23, %v5934_v54  ;;  %v3329_v6 = vmul.f32 %v6349_v35, %v6349_v35  ;;  %4180 = vmatprep.subr.bf16.mxu1 %v4281_v53 }
 0xb01   :  { %4181 = vmatpush3.bf16.msra.mxu1 %v4281_v53 }
 0xb02   :  { %v6354_v7 = vmax.f32 %v3240_v59, 0.0  ;;  %v3332_v37 = vmul.f32 %v6346_v51, %v6346_v51 }
 0xb03   :  { %3299 = vadd.xlane.f32.xlu1 %v6346_v51  ;;  %3293 = vadd.xlane.f32.xlu0 %v6349_v35 }
 0xb04   :  { %v3330_v54 = vmul.f32 %v6354_v7, %v6354_v7 }
 0xb07   :  { %3295 = vadd.xlane.f32.xlu1 %v6354_v7  ;;  %3357 = vadd.xlane.f32.xlu0 %v3329_v6 }
 0xb0b   :  { %3359 = vadd.xlane.f32.xlu1 %v3330_v54  ;;  %3361 = vadd.xlane.f32.xlu0 %v3331_v49 }
 0xb0f   :  { %3363 = vadd.xlane.f32.xlu1 %v3332_v37 }
 0xb55   :  { %v3274_v46 = vpop.xlane.xlu0 %3273 }
 0xb56   :  { %v3303_v14 = vmul.f32 0.010416667, %v3274_v46 }
 0xb58   :  { %v3383_v43 = vmul.f32 %v3303_v14, %v3303_v14  ;;  %v3415_v23 = vsub.f32 %v6270_v41, %v3303_v14 }
 0xb59   :  { %v3270_v15 = vpop.xlane.xlu0 %3269  ;;  %v3276_v34 = vpop.xlane.xlu1 %3275 }
 0xb5a   :  { %v3301_v28 = vmul.f32 0.010416667, %v3270_v15  ;;  %v3304_v0 = vmul.f32 0.010416667, %v3276_v34 }
 0xb5c   :  { %v3381_v27 = vmul.f32 %v3301_v28, %v3301_v28  ;;  %v3384_v52 = vmul.f32 %v3304_v0, %v3304_v0  ;;  %v3413_v63 = vsub.f32 %v6275_v47, %v3301_v28  ;;  %v3416_v34 = vsub.f32 %v6277_v13, %v3304_v0 }
 0xb5d   :  { %v3338_v61 = vpop.xlane.xlu0 %3337  ;;  %v3272_v58 = vpop.xlane.xlu1 %3271 }
 0xb5e   :  { %v3367_v40 = vmul.f32 0.010416667, %v3338_v61  ;;  %v6365_v57 = vmul.f32 0.010416667, %v3272_v58 }
 0xb60   :  { %v3399_v4 = vsub.f32 %v3367_v40, %v3383_v43  ;;  %v3382_v56 = vmul.f32 %v6365_v57, %v6365_v57 }
 0xb61   :  { %v3334_v29 = vpop.xlane.xlu0 %3333  ;;  %v3340_v44 = vpop.xlane.xlu1 %3339 }
 0xb62   :  { %v3431_v20 = vadd.f32 1e-05, %v3399_v4  ;;  %v3365_v36 = vmul.f32 0.010416667, %v3334_v29  ;;  %v3368_v50 = vmul.f32 0.010416667, %v3340_v44  ;;  %v3414_v29 = vsub.f32 %v6282_v16, %v6365_v57 }
 0xb63   :  { %v6395_v16 = vld [vmem:[#allocation10 + $0x3] ss:$0 sm:$0xff] }
 0xb64   :  { %v3397_v10 = vsub.f32 %v3365_v36, %v3381_v27  ;;  %v3400_v21 = vsub.f32 %v3368_v50, %v3384_v52  ;;  %4506 = vrsqrt.f32 %v3431_v20  ;;  %v6386_v27 = vld [vmem:[#allocation10 + $0x2] ss:$0 sm:$0xff] }
 0xb65   :  { %v3336_v18 = vpop.xlane.xlu1 %3335 }
 0xb66   :  { %v3429_v9 = vadd.f32 1e-05, %v3397_v10  ;;  %v3432_v5 = vadd.f32 1e-05, %v3400_v21  ;;  %v3366_v3 = vmul.f32 0.010416667, %v3336_v18 }
 0xb67   :  { %v3282_v26 = vpop.xlane.xlu0 %3281 }
 0xb68   :  { %4508 = vrsqrt.f32 %v3429_v9  ;;  %v3398_v45 = vsub.f32 %v3366_v3, %v3382_v56  ;;  %v6369_v2 = vmul.f32 0.010416667, %v3282_v26 }
 0xb69   :  { %4510 = vrsqrt.f32 %v3432_v5 }
 0xb6a   :  { %v3430_v19 = vadd.f32 1e-05, %v3398_v45  ;;  %v3387_v42 = vmul.f32 %v6369_v2, %v6369_v2 }
 0xb6b   :  { %v3278_v62 = vpop.xlane.xlu0 %3277  ;;  %v3284_v24 = vpop.xlane.xlu1 %3283 }
 0xb6c   :  { %4512 = vrsqrt.f32 %v3430_v19  ;;  %v6371_v8 = vmul.f32 0.010416667, %v3278_v62  ;;  %v6375_v11 = vmul.f32 0.010416667, %v3284_v24 }
 0xb6e   :  { %v3385_v59 = vmul.f32 %v6371_v8, %v6371_v8  ;;  %v3388_v54 = vmul.f32 %v6375_v11, %v6375_v11 }
 0xb6f   :  { %v3346_v12 = vpop.xlane.xlu0 %3345  ;;  %v3280_v22 = vpop.xlane.xlu1 %3279 }
 0xb70   :  { %v3371_v48 = vmul.f32 0.010416667, %v3346_v12  ;;  %v6384_v58 = vmul.f32 0.010416667, %v3280_v22 }
 0xb71   :  { %v4507_v38 = vpop.eup %4506 }
 0xb72   :  { %v3403_v33 = vsub.f32 %v3371_v48, %v3387_v42  ;;  %v3463_v61 = vmul.f32 %v4507_v38, %v3415_v23  ;;  %v3386_v13 = vmul.f32 %v6384_v58, %v6384_v58 }
 0xb73   :  { %v3342_v53 = vpop.xlane.xlu0 %3341  ;;  %v3348_v6 = vpop.xlane.xlu1 %3347 }
 0xb74   :  { %v3435_v49 = vadd.f32 1e-05, %v3403_v33  ;;  %v3369_v37 = vmul.f32 0.010416667, %v3342_v53  ;;  %v3372_v46 = vmul.f32 0.010416667, %v3348_v6  ;;  %v3483_v21 = vmul.f32 %v6386_v27, %v3463_v61 }
 0xb75   :  { %v4509_v15 = vpop.eup %4508 }
 0xb76   :  { %v4511_v41 = vpop.eup %4510  ;;  %4514 = vrsqrt.f32 %v3435_v49  ;;  %v3401_v47 = vsub.f32 %v3369_v37, %v3385_v59  ;;  %v3404_v14 = vsub.f32 %v3372_v46, %v3388_v54  ;;  %v3461_v28 = vmul.f32 %v4509_v15, %v3413_v63 }
 0xb77   :  { %v3464_v43 = vmul.f32 %v4511_v41, %v3416_v34  ;;  %v3344_v4 = vpop.xlane.xlu1 %3343  ;;  %v3503_v19 = vadd.f32 %v6395_v16, %v3483_v21  ;;  %v3419_v54 = vsub.f32 %v6294_v32, %v6369_v2 }
 0xb78   :  { %v3290_v40 = vpop.xlane.xlu0 %3289  ;;  %v3433_v44 = vadd.f32 1e-05, %v3401_v47  ;;  %v3436_v52 = vadd.f32 1e-05, %v3404_v14  ;;  %v3370_v0 = vmul.f32 0.010416667, %v3344_v4  ;;  %v3481_v36 = vmul.f32 %v6386_v27, %v3461_v28 }
 0xb79   :  { %v4513_v20 = vpop.eup %4512  ;;  %v3484_v50 = vmul.f32 %v6386_v27, %v3464_v43  ;;  %v6397_v57 = vmul.f32 0.010416667, %v3290_v40  ;;  %v3519_v53 = vmax.f32 %v3503_v19, 0.0  ;;  %v3417_v43 = vsub.f32 %v6299_v31, %v6371_v8 }
 0xb7a   :  { %4516 = vrsqrt.f32 %v3433_v44  ;;  %v3462_v10 = vmul.f32 %v4513_v20, %v3414_v29  ;;  %v3402_v18 = vsub.f32 %v3370_v0, %v3386_v13  ;;  %v3501_v45 = vadd.f32 %v6395_v16, %v3481_v36 }
 0xb7b   :  { %4518 = vrsqrt.f32 %v3436_v52  ;;  %v3504_v3 = vadd.f32 %v6395_v16, %v3484_v50  ;;  %v3391_v48 = vmul.f32 %v6397_v57, %v6397_v57  ;;  %v3420_v29 = vsub.f32 %v6301_v1, %v6375_v11 }
 0xb7c   :  { %v3286_v56 = vpop.xlane.xlu0 %3285  ;;  %v3292_v9 = vpop.xlane.xlu1 %3291  ;;  %v3482_v5 = vmul.f32 %v6386_v27, %v3462_v10  ;;  %v3434_v26 = vadd.f32 1e-05, %v3402_v18  ;;  %v3517_v23 = vmax.f32 %v3501_v45, 0.0  ;;  %v3418_v8 = vsub.f32 %v6306_v60, %v6384_v58 }
 0xb7d   :  { %v6403_v62 = vmul.f32 0.010416667, %v3286_v56  ;;  %v6405_v24 = vmul.f32 0.010416667, %v3292_v9  ;;  %v3520_v33 = vmax.f32 %v3504_v3, 0.0 }
 0xb7e   :  { %4520 = vrsqrt.f32 %v3434_v26  ;;  %v3502_v42 = vadd.f32 %v6395_v16, %v3482_v5 }
 0xb7f   :  { %v3389_v49 = vmul.f32 %v6403_v62, %v6403_v62  ;;  %v3392_v37 = vmul.f32 %v6405_v24, %v6405_v24  ;;  %v3534_v14 = vpack.c.bf16 %v3520_v33, %v3519_v53 }
 0xb80   :  { %v3354_v12 = vpop.xlane.xlu0 %3353  ;;  %v3288_v22 = vpop.xlane.xlu1 %3287  ;;  %v3518_v63 = vmax.f32 %v3502_v42, 0.0 }
 0xb81   :  { %v3375_v38 = vmul.f32 0.010416667, %v3354_v12  ;;  %v6416_v28 = vmul.f32 0.010416667, %v3288_v22 }
 0xb82   :  { %v3533_v34 = vpack.c.bf16 %v3518_v63, %v3517_v23 }
 0xb83   :  { %v3407_v59 = vsub.f32 %v3375_v38, %v3391_v48  ;;  %v4515_v6 = vpop.eup %4514  ;;  %v3390_v50 = vmul.f32 %v6416_v28, %v6416_v28 }
 0xb84   :  { %v3350_v46 = vpop.xlane.xlu0 %3349  ;;  %v3356_v15 = vpop.xlane.xlu1 %3355  ;;  %4182 = vmatprep.mubr.bf16.mxu1 %v3533_v34  ;;  %v3467_v40 = vmul.f32 %v4515_v6, %v3419_v54 }
 0xb85   :  { %v3439_v61 = vadd.f32 1e-05, %v3407_v59  ;;  %v3373_v41 = vmul.f32 0.010416667, %v3350_v46  ;;  %v3376_v47 = vmul.f32 0.010416667, %v3356_v15  ;;  %4183 = vmatmul.mubr.bf16.vlgmr.msra.gmra.mxu1 %v3534_v14 }
 0xb86   :  { %v3487_v21 = vmul.f32 %v6386_v27, %v3467_v40 }
 0xb87   :  { %v3405_v32 = vsub.f32 %v3373_v41, %v3389_v49  ;;  %v3408_v2 = vsub.f32 %v3376_v47, %v3392_v37  ;;  %v4517_v4 = vpop.eup %4516  ;;  %4522 = vrsqrt.f32 %v3439_v61 }
 0xb88   :  { %v3298_v44 = vpop.xlane.xlu0 %3297  ;;  %v3352_v52 = vpop.xlane.xlu1 %3351  ;;  %v3465_v36 = vmul.f32 %v4517_v4, %v3417_v43  ;;  %v3507_v48 = vadd.f32 %v6395_v16, %v3487_v21 }
 0xb89   :  { %v4519_v20 = vpop.eup %4518  ;;  %v3437_v13 = vadd.f32 1e-05, %v3405_v32  ;;  %v3440_v0 = vadd.f32 1e-05, %v3408_v2  ;;  %v3374_v10 = vmul.f32 0.010416667, %v3352_v52  ;;  %v3423_v32 = vsub.f32 %v6316_v25, %v6397_v57 }
 0xb8a   :  { %v3468_v31 = vmul.f32 %v4519_v20, %v3420_v29  ;;  %v3485_v56 = vmul.f32 %v6386_v27, %v3465_v36  ;;  %v6431_v19 = vmul.f32 0.010416667, %v3298_v44  ;;  %v3523_v34 = vmax.f32 %v3507_v48, 0.0 }
 0xb8b   :  { %4524 = vrsqrt.f32 %v3437_v13  ;;  %v3406_v1 = vsub.f32 %v3374_v10, %v3390_v50  ;;  %v4521_v5 = vpop.eup %4520  ;;  %v3421_v2 = vsub.f32 %v6323_v30, %v6403_v62  ;;  %v3424_v20 = vsub.f32 %v6325_v17, %v6405_v24 }
 0xb8c   :  { %4526 = vrsqrt.f32 %v3440_v0  ;;  %v3294_v11 = vpop.xlane.xlu0 %3293  ;;  %v3300_v18 = vpop.xlane.xlu1 %3299  ;;  %v3488_v9 = vmul.f32 %v6386_v27, %v3468_v31  ;;  %v3466_v45 = vmul.f32 %v4521_v5, %v3418_v8  ;;  %v3505_v42 = vadd.f32 %v6395_v16, %v3485_v56 }
 0xb8d   :  { %v6429_v3 = vmul.f32 0.010416667, %v3294_v11  ;;  %v3438_v26 = vadd.f32 1e-05, %v3406_v1  ;;  %v3395_v59 = vmul.f32 %v6431_v19, %v6431_v19  ;;  %v6444_v54 = vmul.f32 0.010416667, %v3300_v18 }
 0xb8e   :  { %v3508_v60 = vadd.f32 %v6395_v16, %v3488_v9  ;;  %v3486_v22 = vmul.f32 %v6386_v27, %v3466_v45  ;;  %v3521_v46 = vmax.f32 %v3505_v42, 0.0  ;;  %v3422_v8 = vsub.f32 %v6330_v39, %v6416_v28 }
 0xb8f   :  { %4528 = vrsqrt.f32 %v3438_v26  ;;  %v3393_v38 = vmul.f32 %v6429_v3, %v6429_v3  ;;  %v3396_v13 = vmul.f32 %v6444_v54, %v6444_v54  ;;  %v3425_v28 = vsub.f32 %v6349_v35, %v6429_v3 }
 0xb90   :  { %v3358_v58 = vpop.xlane.xlu0 %3357  ;;  %v3296_v12 = vpop.xlane.xlu1 %3295  ;;  %v3506_v63 = vadd.f32 %v6395_v16, %v3486_v22  ;;  %v3524_v6 = vmax.f32 %v3508_v60, 0.0 }
 0xb91   :  { %v3377_v33 = vmul.f32 0.010416667, %v3358_v58  ;;  %v6439_v23 = vmul.f32 0.010416667, %v3296_v12 }
 0xb92   :  { %v3522_v15 = vmax.f32 %v3506_v63, 0.0  ;;  %v3536_v44 = vpack.c.bf16 %v3524_v6, %v3523_v34 }
 0xb93   :  { %v3409_v53 = vsub.f32 %v3377_v33, %v3393_v38  ;;  %v3394_v47 = vmul.f32 %v6439_v23, %v6439_v23  ;;  %v3427_v38 = vsub.f32 %v6340_v55, %v6431_v19 }
 0xb94   :  { %v3362_v49 = vpop.xlane.xlu0 %3361  ;;  %v3360_v37 = vpop.xlane.xlu1 %3359  ;;  %v3535_v40 = vpack.c.bf16 %v3522_v15, %v3521_v46 }
 0xb95   :  { %v4523_v61 = vpop.eup %4522  ;;  %v3441_v41 = vadd.f32 1e-05, %v3409_v53  ;;  %v3379_v14 = vmul.f32 0.010416667, %v3362_v49  ;;  %v3378_v43 = vmul.f32 0.010416667, %v3360_v37  ;;  %v3428_v49 = vsub.f32 %v6346_v51, %v6444_v54 }
 0xb96   :  { %4186 = vmatprep.mubr.bf16.mxu1 %v3535_v40  ;;  %v3471_v36 = vmul.f32 %v4523_v61, %v3423_v32 }
 0xb97   :  { %4530 = vrsqrt.f32 %v3441_v41  ;;  %v3411_v4 = vsub.f32 %v3379_v14, %v3395_v59  ;;  %v3410_v29 = vsub.f32 %v3378_v43, %v3394_v47  ;;  %4187 = vmatmul.mubr.bf16.gmra.mxu1 %v3536_v44  ;;  %v3426_v59 = vsub.f32 %v6354_v7, %v6439_v23 }
 0xb98   :  { %v4525_v52 = vpop.eup %4524  ;;  %v3364_v0 = vpop.xlane.xlu1 %3363  ;;  %v3491_v11 = vmul.f32 %v6386_v27, %v3471_v36 }
 0xb99   :  { %v4527_v50 = vpop.eup %4526  ;;  %v3443_v25 = vadd.f32 1e-05, %v3411_v4  ;;  %v3442_v57 = vadd.f32 1e-05, %v3410_v29  ;;  %v3380_v30 = vmul.f32 0.010416667, %v3364_v0  ;;  %v3469_v62 = vmul.f32 %v4525_v52, %v3421_v2 }
 0xb9a   :  { %v3472_v10 = vmul.f32 %v4527_v50, %v3424_v20  ;;  %v3511_v26 = vadd.f32 %v6395_v16, %v3491_v11 }
 0xb9b   :  { %4532 = vrsqrt.f32 %v3443_v25  ;;  %v3412_v31 = vsub.f32 %v3380_v30, %v3396_v13  ;;  %v3489_v17 = vmul.f32 %v6386_v27, %v3469_v62 }
 0xb9c   :  { %4534 = vrsqrt.f32 %v3442_v57  ;;  %v3492_v24 = vmul.f32 %v6386_v27, %v3472_v10  ;;  %v4529_v21 = vpop.eup %4528  ;;  %v3527_v22 = vmax.f32 %v3511_v26, 0.0 }
 0xb9d   :  { %v3444_v1 = vadd.f32 1e-05, %v3412_v31  ;;  %v3470_v18 = vmul.f32 %v4529_v21, %v3422_v8  ;;  %v3509_v5 = vadd.f32 %v6395_v16, %v3489_v17 }
 0xb9e   :  { %v3512_v56 = vadd.f32 %v6395_v16, %v3492_v24 }
 0xb9f   :  { %4536 = vrsqrt.f32 %v3444_v1  ;;  %v3490_v9 = vmul.f32 %v6386_v27, %v3470_v18  ;;  %v3525_v58 = vmax.f32 %v3509_v5, 0.0 }
 0xba0   :  { %v3528_v45 = vmax.f32 %v3512_v56, 0.0 }
 0xba1   :  { %v3510_v39 = vadd.f32 %v6395_v16, %v3490_v9 }
 0xba2   :  { %v3538_v33 = vpack.c.bf16 %v3528_v45, %v3527_v22 }
 0xba3   :  { %v3526_v12 = vmax.f32 %v3510_v39, 0.0 }
 0xba4   :  { %v4531_v60 = vpop.eup %4530 }
 0xba5   :  { %v3473_v42 = vmul.f32 %v4531_v60, %v3425_v28  ;;  %v3537_v48 = vpack.c.bf16 %v3526_v12, %v3525_v58 }
 0xba7   :  { %4190 = vmatprep.mubr.bf16.mxu1 %v3537_v48  ;;  %v3493_v53 = vmul.f32 %v6386_v27, %v3473_v42 }
 0xba8   :  { %v4533_v63 = vpop.eup %4532  ;;  %4191 = vmatmul.mubr.bf16.gmra.mxu1 %v3538_v33 }
 0xba9   :  { %v4535_v6 = vpop.eup %4534  ;;  %v3475_v35 = vmul.f32 %v4533_v63, %v3427_v38  ;;  %v3513_v19 = vadd.f32 %v6395_v16, %v3493_v53 }
 0xbaa   :  { %v3474_v3 = vmul.f32 %v4535_v6, %v3426_v59 }
 0xbab   :  { %v3495_v37 = vmul.f32 %v6386_v27, %v3475_v35  ;;  %v3529_v61 = vmax.f32 %v3513_v19, 0.0 }
 0xbac   :  { %v4537_v46 = vpop.eup %4536  ;;  %v3494_v55 = vmul.f32 %v6386_v27, %v3474_v3 }
 0xbad   :  { %v3476_v15 = vmul.f32 %v4537_v46, %v3428_v49  ;;  %v3515_v34 = vadd.f32 %v6395_v16, %v3495_v37 }
 0xbae   :  { %v3514_v7 = vadd.f32 %v6395_v16, %v3494_v55 }
 0xbaf   :  { %v3496_v23 = vmul.f32 %v6386_v27, %v3476_v15  ;;  %v3531_v51 = vmax.f32 %v3515_v34, 0.0 }
 0xbb0   :  { %v3530_v41 = vmax.f32 %v3514_v7, 0.0 }
 0xbb1   :  { %v3516_v47 = vadd.f32 %v6395_v16, %v3496_v23 }
 0xbb2   :  { %v3539_v14 = vpack.c.bf16 %v3530_v41, %v3529_v61 }
 0xbb3   :  { %v3532_v54 = vmax.f32 %v3516_v47, 0.0 }
 0xbb4   :  { %4194 = vmatprep.mubr.bf16.mxu1 %v3539_v14 }
 0xbb5   :  { %v3540_v43 = vpack.c.bf16 %v3532_v54, %v3531_v51 }
 0xbb7   :  { %4195 = vmatmul.mubr.bf16.gmra.mxu1 %v3540_v43 }
 0xc45   :  { %v4184_v32 = vpop.f32.mrf.mxu1 }
 0xc46   :  { %3704 = vst [vmem:[#allocation14 + $0x10] sm:$0xff] %v4184_v32 }
 0xc47   :  { %v3639_v2 = vpop.f32.mrf.mxu1 }
 0xc48   :  { %3702 = vst [vmem:[#allocation14] sm:$0xff] %v3639_v2 }
 0xc49   :  { %v4185_v40 = vpop.f32.mrf.mxu1 }
 0xc4a   :  { %3705 = vst [vmem:[#allocation14 + $0x18] sm:$0xff] %v4185_v40 }
 0xc4b   :  { %v3642_v4 = vpop.f32.mrf.mxu1 }
 0xc4c   :  { %3703 = vst [vmem:[#allocation14 + $0x8] sm:$0xff] %v3642_v4 }
 0xc57   :  { %v4188_v27 = vpop.f32.mrf.mxu1 }
 0xc58   :  { %3708 = vst [vmem:[#allocation14 + $0x30] sm:$0xff] %v4188_v27 }
 0xc59   :  { %v3655_v29 = vpop.f32.mrf.mxu1 }
 0xc5a   :  { %3706 = vst [vmem:[#allocation14 + $0x20] sm:$0xff] %v3655_v29 }
 0xc5b   :  { %v4189_v44 = vpop.f32.mrf.mxu1 }
 0xc5c   :  { %3709 = vst [vmem:[#allocation14 + $0x38] sm:$0xff] %v4189_v44 }
 0xc5d   :  { %v3658_v16 = vpop.f32.mrf.mxu1 }
 0xc5e   :  { %3707 = vst [vmem:[#allocation14 + $0x28] sm:$0xff] %v3658_v16 }
 0xc68   :  { %v4192_v52 = vpop.f32.mrf.mxu1 }
 0xc69   :  { %3712 = vst [vmem:[#allocation14 + $0x50] sm:$0xff] %v4192_v52 }
 0xc6a   :  { %v3671_v20 = vpop.f32.mrf.mxu1 }
 0xc6b   :  { %3710 = vst [vmem:[#allocation14 + $0x40] sm:$0xff] %v3671_v20 }
 0xc6c   :  { %v4193_v13 = vpop.f32.mrf.mxu1 }
 0xc6d   :  { %3713 = vst [vmem:[#allocation14 + $0x58] sm:$0xff] %v4193_v13 }
 0xc6e   :  { %v3674_v0 = vpop.f32.mrf.mxu1 }
 0xc6f   :  { %3711 = vst [vmem:[#allocation14 + $0x48] sm:$0xff] %v3674_v0 }
 0xc77   :  { %v4196_v36 = vpop.f32.mrf.mxu1 }
 0xc78   :  { %3716 = vst [vmem:[#allocation14 + $0x70] sm:$0xff] %v4196_v36 }
 0xc79   :  { %v3687_v50 = vpop.f32.mrf.mxu1 }
 0xc7a   :  { %3714 = vst [vmem:[#allocation14 + $0x60] sm:$0xff] %v3687_v50 }
 0xc7b   :  { %v4197_v25 = vpop.f32.mrf.mxu1 }
 0xc7c   :  { %3717 = vst [vmem:[#allocation14 + $0x78] sm:$0xff] %v4197_v25 }
 0xc7d   :  { %v3690_v57 = vpop.f32.mrf.mxu1 }
 0xc7e   :  { %3715 = vst [vmem:[#allocation14 + $0x68] sm:$0xff] %v3690_v57 }
 0xc7f   :  { %4689 = shalt.err (!%p4686_p11)
}
 0xc80   :  { %3729 = dma.vmem_to_hbm [thread:$0]  %s3724_s6, 2048, %s6495_s7, [#allocation4], %s4713_s1, %s4713_s1, %s4714_s16  }
 0xc81   :  { %4706 = dma.done.wait [#allocation4], 2048  }
 0xc82   :  { %4707 = vsyncadd [#allocation4], 4294965248 }
 0xc83   :  { %3733 = vsyncpa [#allocation3], 1 }
 0xc84   :  { %3734 = vsyncpa [#allocation6], 1 }
 0xc85   :  { %3735 = vsyncpa [#allocation9], 1 }
 0xc86   :  { %3736 = vsyncpa [#allocation12], 1 }
 0xc87   :  { %3737 = vsyncpa [#allocation4], 1 }

</bundles_post_ra>
